<compile_context>
chip_gen: v7x
topology: tpu7x:2x2x1
jax: 0.10.0
libtpu: 0.0.40
codegen_flags: <defaults>
</compile_context>

<pallas_src>
import jax
import jax.numpy as jnp
from jax import lax
from jax.experimental import pallas as pl
from jax.experimental.pallas import tpu as pltpu


def _tap_windows(ky, kx, D, H):
    """Static dest/src windows of conv tap (ky, kx) for 'same' 3x3 padding."""
    dd0 = max(0, 1 - ky)
    dd1 = D - max(0, ky - 1)
    hh0 = max(0, 1 - kx)
    hh1 = H - max(0, kx - 1)
    sd0 = dd0 + ky - 1
    sh0 = hh0 + kx - 1
    return dd0, dd1, hh0, hh1, sd0, sh0


def _zero_border(p_ref):
    """Zero the d/h border strips of a (Bt, D, H, K) im2col patch scratch.

    Every tap's interior window is overwritten each grid step; only the border
    rows/cols (the conv zero-padding contributions) need explicit zeros, so we
    issue 4 strip stores instead of clearing the whole block.
    """
    Bt, D, H, K = p_ref.shape
    dt = p_ref.dtype
    p_ref[:, 0:1, :, :] = jnp.zeros((Bt, 1, H, K), dt)
    p_ref[:, D - 1:D, :, :] = jnp.zeros((Bt, 1, H, K), dt)
    p_ref[:, :, 0:1, :] = jnp.zeros((Bt, D, 1, K), dt)
    p_ref[:, :, H - 1:H, :] = jnp.zeros((Bt, D, 1, K), dt)


def _build_im2col(src_ref, patch_ref, C):
    """Scatter the 9 shifted (D, H) taps of src_ref into patch_ref channel slots.

    patch_ref[:, d, h, t*C:(t+1)*C] = src[d+ky-1, h+kx-1] (or 0 at the border),
    with t = ky*3 + kx — i.e. the im2col matrix for a single K=9*C matmul.
    """
    Bt, D, H, _ = src_ref.shape
    _zero_border(patch_ref)
    for ky in range(3):
        for kx in range(3):
            dd0, dd1, hh0, hh1, sd0, sh0 = _tap_windows(ky, kx, D, H)
            dl, hl = dd1 - dd0, hh1 - hh0
            if dl <= 0 or hl <= 0:          # only possible when D==1 or H==1
                continue
            t = ky * 3 + kx
            patch_ref[:, dd0:dd1, hh0:hh1, t * C:(t + 1) * C] = (
                src_ref[:, sd0:sd0 + dl, sh0:sh0 + hl, :])


def basic_block_kernel(x_ref, w1_ref, b1_ref, w2_ref, b2_ref, out_ref,
                       p1_ref, h1_ref, p2_ref):
    """One block of Bt slabs per grid step.

    x_ref  : (Bt, D, H, Cin)    input slabs (also the residual), compute dtype
    w1_ref : (9*Cin, Cout)      conv1 im2col weights, bn1 scale pre-folded
    b1_ref : (1, Cout)          bn1 folded bias (f32)
    w2_ref : (9*Cout, Cout)     conv2 im2col weights, bn2 scale pre-folded
    b2_ref : (1, Cout)          bn2 folded bias (f32)
    out_ref: (Bt, D, H, Cout)
    p1_ref : (Bt, D, H, 9*Cin)  VMEM im2col patch for conv1
    h1_ref : (Bt, D, H, Cout)   VMEM conv1 activation (compute dtype)
    p2_ref : (Bt, D, H, 9*Cout) VMEM im2col patch for conv2
    """
    Bt, D, H, Cin = x_ref.shape
    Cout = out_ref.shape[-1]
    M = Bt * D * H

    # ---- conv1 (single K = 9*Cin matmul) + folded bn1 + relu ----
    _build_im2col(x_ref, p1_ref, Cin)
    acc1 = jnp.dot(p1_ref[...].reshape(M, 9 * Cin), w1_ref[...],
                   preferred_element_type=jnp.float32)           # (M, Cout) f32
    h1 = jnp.maximum(acc1 + b1_ref[...], 0.0)
    h1_ref[...] = h1.reshape(Bt, D, H, Cout).astype(h1_ref.dtype)

    # ---- conv2 (single K = 9*Cout matmul) + folded bn2 + residual + relu ----
    _build_im2col(h1_ref, p2_ref, Cout)
    acc2 = jnp.dot(p2_ref[...].reshape(M, 9 * Cout), w2_ref[...],
                   preferred_element_type=jnp.float32)           # (M, Cout) f32
    res = x_ref[...].astype(jnp.float32).reshape(M, Cin)
    out = jnp.maximum(acc2 + b2_ref[...] + res, 0.0)
    out_ref[...] = out.reshape(Bt, D, H, Cout).astype(out_ref.dtype)


def _round_up(x, m):
    return ((x + m - 1) // m) * m


def _vmem_capacity_bytes():
    cap = 64 * 1024 * 1024          # conservative fallback (v7x per-core VMEM)
    try:
        cap = int(getattr(pltpu.get_tpu_info(), "vmem_capacity_bytes", cap))
    except Exception:
        pass
    return cap


def basic_block_3x3x1(x, w1, g1, be1, m1, v1, w2, g2, be2, m2, v2,
                      eps=1e-5, block_b=None, compute_dtype=jnp.bfloat16):
    """x: (N, C, D, H, W) (NCDHW, like PyTorch).  Returns NCDHW, dtype of x."""
    N, C, D, H, W = x.shape
    Cout = w1.shape[0]
    assert Cout == C, "expansion=1, stride=1, downsample=None => inplanes==planes"

    cdt = jnp.dtype(compute_dtype)
    odt = x.dtype

    # NCDHW -> (N*W, D, H, C) channels-last slabs (single relayout pass).
    xs = jnp.transpose(x, (0, 4, 2, 3, 1)).reshape(N * W, D, H, C).astype(cdt)

    # torch conv3d weight (Cout, Cin, 3, 3, 1) -> im2col (9*Cin, Cout) with row
    # index (ky*3+kx)*Cin + ci; fold the eval-mode BN scale into the weights in
    # f32, then cast to the compute dtype.  Biases stay f32.
    inv1 = g1 / jnp.sqrt(v1 + eps)
    inv2 = g2 / jnp.sqrt(v2 + eps)
    w1m = jnp.transpose(w1[..., 0], (2, 3, 1, 0)).reshape(9 * C, Cout)
    w2m = jnp.transpose(w2[..., 0], (2, 3, 1, 0)).reshape(9 * Cout, Cout)
    w1m = (w1m.astype(jnp.float32) * inv1[None, :]).astype(cdt)
    w2m = (w2m.astype(jnp.float32) * inv2[None, :]).astype(cdt)
    b1 = (be1 - m1 * inv1).reshape(1, Cout).astype(jnp.float32)
    b2 = (be2 - m2 * inv2).reshape(1, Cout).astype(jnp.float32)

    B = N * W
    esz = cdt.itemsize
    osz = jnp.dtype(odt).itemsize

    vmem_cap = _vmem_capacity_bytes()
    # v5e/v6e have 128 MiB VMEM, v7x 64 MiB per core; use ~70% and leave the
    # rest as compiler headroom.
    vmem_limit = max(32 * 1024 * 1024,
                     min(int(vmem_cap * 0.70), 96 * 1024 * 1024))

    if block_b is None:
        # Conservative per-slab VMEM footprint (lane/sublane padded): the
        # double-buffered I/O blocks, the three scratches, the patch values fed
        # to the MXU, and the f32 accumulators / epilogue temporaries.
        hs = _round_up(H, 16)
        lc = _round_up(C, 128)
        lo = _round_up(Cout, 128)
        l9c = _round_up(9 * C, 128)
        l9o = _round_up(9 * Cout, 128)
        slab = (2 * D * hs * lc * esz                 # input block, dbl-buffered
                + 2 * D * hs * lo * osz               # output block, dbl-buffered
                + D * hs * (l9c + l9o + lo) * esz     # p1, p2, h1 scratches
                + 2 * D * hs * (l9c + l9o) * esz      # patch values -> MXU
                + 6 * D * hs * lo * 4)                # f32 acc/h1/out/residual
        budget = vmem_limit // 2
        block_b = max(1, min(B, budget // max(slab, 1), 256))
        # Only a 2-TensorCore part (v7x-class, 64 MiB/core) needs >= 2 parallel
        # grid steps; on single-core v5e/v6e a bigger block beats extra steps.
        if vmem_cap <= 64 * 1024 * 1024 and B >= 2:
            block_b = min(block_b, pl.cdiv(B, 2))

    grid_b = pl.cdiv(B, block_b)
    Bpad = grid_b * block_b
    if Bpad != B:
        xs = jnp.pad(xs, ((0, Bpad - B), (0, 0), (0, 0), (0, 0)))

    out = pl.pallas_call(
        basic_block_kernel,
        out_shape=jax.ShapeDtypeStruct((Bpad, D, H, Cout), odt),
        grid_spec=pltpu.PrefetchScalarGridSpec(
            num_scalar_prefetch=0,
            grid=(grid_b,),
            in_specs=[
                pl.BlockSpec((block_b, D, H, C), lambda b: (b, 0, 0, 0)),
                pl.BlockSpec((9 * C, Cout), lambda b: (0, 0)),
                pl.BlockSpec((1, Cout), lambda b: (0, 0)),
                pl.BlockSpec((9 * Cout, Cout), lambda b: (0, 0)),
                pl.BlockSpec((1, Cout), lambda b: (0, 0)),
            ],
            out_specs=pl.BlockSpec((block_b, D, H, Cout),
                                   lambda b: (b, 0, 0, 0)),
            scratch_shapes=[
                pltpu.VMEM((block_b, D, H, 9 * C), cdt),      # conv1 im2col
                pltpu.VMEM((block_b, D, H, Cout), cdt),       # conv1 activation
                pltpu.VMEM((block_b, D, H, 9 * Cout), cdt),   # conv2 im2col
            ],
        ),
        compiler_params=pltpu.CompilerParams(
            dimension_semantics=("parallel",),
            vmem_limit_bytes=vmem_limit),
    )(xs, w1m, b1, w2m, b2)

    # (Bpad, D, H, C) -> NCDHW (drop any batch padding)
    out = out[:B].reshape(N, W, D, H, Cout)
    return jnp.transpose(out, (0, 4, 2, 3, 1))


def reference_block(x, w1, g1, be1, m1, v1, w2, g2, be2, m2, v2, eps=1e-5):
    """Pure-JAX reference (NCDHW), eval-mode BN."""
    def conv(inp, w):
        return lax.conv_general_dilated(
            inp, w, window_strides=(1, 1, 1),
            padding=((1, 1), (1, 1), (0, 0)),
            dimension_numbers=('NCDHW', 'OIDHW', 'NCDHW'))

    def bn(inp, g, b, m, v):
        sh = (1, -1, 1, 1, 1)
        return (inp - m.reshape(sh)) / jnp.sqrt(v.reshape(sh) + eps) \
            * g.reshape(sh) + b.reshape(sh)

    out = jnp.maximum(bn(conv(x, w1), g1, be1, m1, v1), 0.0)
    out = bn(conv(out, w2), g2, be2, m2, v2)
    return jnp.maximum(out + x, 0.0)


if __name__ == "__main__":
    key = jax.random.PRNGKey(0)
    N, C, D, H, W = 2, 4, 8, 8, 3          # inplanes = planes = 4
    planes = C

    ks = jax.random.split(key, 12)
    x = jax.random.normal(ks[0], (N, C, D, H, W), jnp.float32)

    w1 = jax.random.normal(ks[1], (planes, C, 3, 3, 1), jnp.float32) * 0.1
    w2 = jax.random.normal(ks[2], (planes, planes, 3, 3, 1), jnp.float32) * 0.1

    g1 = jax.random.uniform(ks[3], (planes,), jnp.float32, 0.5, 1.5)
    be1 = jax.random.normal(ks[4], (planes,), jnp.float32) * 0.1
    m1 = jax.random.normal(ks[5], (planes,), jnp.float32) * 0.1
    v1 = jax.random.uniform(ks[6], (planes,), jnp.float32, 0.5, 1.5)

    g2 = jax.random.uniform(ks[7], (planes,), jnp.float32, 0.5, 1.5)
    be2 = jax.random.normal(ks[8], (planes,), jnp.float32) * 0.1
    m2 = jax.random.normal(ks[9], (planes,), jnp.float32) * 0.1
    v2 = jax.random.uniform(ks[10], (planes,), jnp.float32, 0.5, 1.5)

    ref = reference_block(x, w1, g1, be1, m1, v1, w2, g2, be2, m2, v2)

    # Exact-math check: f32 compute path, tight tolerance.
    out_f32 = basic_block_3x3x1(x, w1, g1, be1, m1, v1, w2, g2, be2, m2, v2,
                                compute_dtype=jnp.float32)
    out_f32 = jax.block_until_ready(out_f32)
    assert out_f32.shape == (N, planes, D, H, W)
    assert jnp.allclose(out_f32, ref, atol=1e-4, rtol=1e-4), \
        f"f32 max err {jnp.max(jnp.abs(out_f32 - ref))}"

    # Default (bf16 I/O + bf16 MXU, f32 accumulation): loose tolerance.
    out_bf16 = basic_block_3x3x1(x, w1, g1, be1, m1, v1, w2, g2, be2, m2, v2)
    out_bf16 = jax.block_until_ready(out_bf16)
    assert out_bf16.shape == (N, planes, D, H, W)
    assert jnp.allclose(out_bf16, ref, atol=5e-2, rtol=5e-2), \
        f"bf16 max err {jnp.max(jnp.abs(out_bf16 - ref))}"

    print("KERNEL_OK")
</pallas_src>

<mosaic_0001>
module attributes {stable_mosaic.version = 11 : i64} {
  func.func @basic_block_kernel(%arg0: i32, %arg1: memref<3x8x8x4xf32, #tpu.memory_space<vmem>>, %arg2: memref<36x4xf32, #tpu.memory_space<vmem>>, %arg3: memref<1x4xf32, #tpu.memory_space<vmem>>, %arg4: memref<36x4xf32, #tpu.memory_space<vmem>>, %arg5: memref<1x4xf32, #tpu.memory_space<vmem>>, %arg6: memref<3x8x8x4xf32, #tpu.memory_space<vmem>>, %arg7: memref<3x8x8x36xf32, #tpu.memory_space<vmem>>, %arg8: memref<3x8x8x4xf32, #tpu.memory_space<vmem>>, %arg9: memref<3x8x8x36xf32, #tpu.memory_space<vmem>>) attributes {dimension_semantics = [#tpu.dimension_semantics<parallel>], iteration_bounds = array<i64: 2>, scalar_prefetch = 0 : i64, scratch_operands = 3 : i64, tpu.core_type = #tpu.core_type<tc>, window_params = [{transform_indices = @transform_0, window_bounds = array<i64: 3, 8, 8, 4>}, {pipeline_mode = #tpu.pipeline_mode<synchronous>, transform_indices = @transform_1, window_bounds = array<i64: 36, 4>}, {pipeline_mode = #tpu.pipeline_mode<synchronous>, transform_indices = @transform_2, window_bounds = array<i64: 1, 4>}, {pipeline_mode = #tpu.pipeline_mode<synchronous>, transform_indices = @transform_3, window_bounds = array<i64: 36, 4>}, {pipeline_mode = #tpu.pipeline_mode<synchronous>, transform_indices = @transform_4, window_bounds = array<i64: 1, 4>}, {transform_indices = @transform_5, window_bounds = array<i64: 3, 8, 8, 4>}]} {
    %cst = arith.constant 0.000000e+00 : f32
    %0 = vector.broadcast %cst : f32 to vector<3x1x8x36xf32>
    %c0 = arith.constant 0 : index
    %c0_0 = arith.constant 0 : index
    %c0_1 = arith.constant 0 : index
    %c0_2 = arith.constant 0 : index
    %1 = vector.load %arg7[%c0, %c0_0, %c0_1, %c0_2] : memref<3x8x8x36xf32, #tpu.memory_space<vmem>>, vector<3x1x8x36xf32>
    tpu.vector_store %arg7[%c0, %c0_0, %c0_1, %c0_2], %0 {strides = array<i32>} : memref<3x8x8x36xf32, #tpu.memory_space<vmem>>, vector<3x1x8x36xf32>,
    %cst_3 = arith.constant 0.000000e+00 : f32
    %2 = vector.broadcast %cst_3 : f32 to vector<3x1x8x36xf32>
    %c0_4 = arith.constant 0 : index
    %c7 = arith.constant 7 : index
    %c0_5 = arith.constant 0 : index
    %c0_6 = arith.constant 0 : index
    %3 = vector.load %arg7[%c0_4, %c7, %c0_5, %c0_6] : memref<3x8x8x36xf32, #tpu.memory_space<vmem>>, vector<3x1x8x36xf32>
    tpu.vector_store %arg7[%c0_4, %c7, %c0_5, %c0_6], %2 {strides = array<i32>} : memref<3x8x8x36xf32, #tpu.memory_space<vmem>>, vector<3x1x8x36xf32>,
    %cst_7 = arith.constant 0.000000e+00 : f32
    %4 = vector.broadcast %cst_7 : f32 to vector<3x8x1x36xf32>
    %c0_8 = arith.constant 0 : index
    %c0_9 = arith.constant 0 : index
    %c0_10 = arith.constant 0 : index
    %c0_11 = arith.constant 0 : index
    %5 = vector.load %arg7[%c0_8, %c0_9, %c0_10, %c0_11] : memref<3x8x8x36xf32, #tpu.memory_space<vmem>>, vector<3x8x1x36xf32>
    tpu.vector_store %arg7[%c0_8, %c0_9, %c0_10, %c0_11], %4 {strides = array<i32>} : memref<3x8x8x36xf32, #tpu.memory_space<vmem>>, vector<3x8x1x36xf32>,
    %cst_12 = arith.constant 0.000000e+00 : f32
    %6 = vector.broadcast %cst_12 : f32 to vector<3x8x1x36xf32>
    %c0_13 = arith.constant 0 : index
    %c0_14 = arith.constant 0 : index
    %c7_15 = arith.constant 7 : index
    %c0_16 = arith.constant 0 : index
    %7 = vector.load %arg7[%c0_13, %c0_14, %c7_15, %c0_16] : memref<3x8x8x36xf32, #tpu.memory_space<vmem>>, vector<3x8x1x36xf32>
    tpu.vector_store %arg7[%c0_13, %c0_14, %c7_15, %c0_16], %6 {strides = array<i32>} : memref<3x8x8x36xf32, #tpu.memory_space<vmem>>, vector<3x8x1x36xf32>,
    %c0_17 = arith.constant 0 : index
    %c0_18 = arith.constant 0 : index
    %c0_19 = arith.constant 0 : index
    %c0_20 = arith.constant 0 : index
    %8 = vector.load %arg1[%c0_17, %c0_18, %c0_19, %c0_20] : memref<3x8x8x4xf32, #tpu.memory_space<vmem>>, vector<3x7x7x4xf32>
    %c0_21 = arith.constant 0 : index
    %c1 = arith.constant 1 : index
    %c1_22 = arith.constant 1 : index
    %c0_23 = arith.constant 0 : index
    %9 = vector.load %arg7[%c0_21, %c1, %c1_22, %c0_23] : memref<3x8x8x36xf32, #tpu.memory_space<vmem>>, vector<3x7x7x4xf32>
    tpu.vector_store %arg7[%c0_21, %c1, %c1_22, %c0_23], %8 {strides = array<i32>} : memref<3x8x8x36xf32, #tpu.memory_space<vmem>>, vector<3x7x7x4xf32>,
    %c0_24 = arith.constant 0 : index
    %c0_25 = arith.constant 0 : index
    %c0_26 = arith.constant 0 : index
    %c0_27 = arith.constant 0 : index
    %10 = vector.load %arg1[%c0_24, %c0_25, %c0_26, %c0_27] : memref<3x8x8x4xf32, #tpu.memory_space<vmem>>, vector<3x7x8x4xf32>
    %c0_28 = arith.constant 0 : index
    %c1_29 = arith.constant 1 : index
    %c0_30 = arith.constant 0 : index
    %c4 = arith.constant 4 : index
    %11 = vector.load %arg7[%c0_28, %c1_29, %c0_30, %c4] : memref<3x8x8x36xf32, #tpu.memory_space<vmem>>, vector<3x7x8x4xf32>
    tpu.vector_store %arg7[%c0_28, %c1_29, %c0_30, %c4], %10 {strides = array<i32>} : memref<3x8x8x36xf32, #tpu.memory_space<vmem>>, vector<3x7x8x4xf32>,
    %c0_31 = arith.constant 0 : index
    %c0_32 = arith.constant 0 : index
    %c1_33 = arith.constant 1 : index
    %c0_34 = arith.constant 0 : index
    %12 = vector.load %arg1[%c0_31, %c0_32, %c1_33, %c0_34] : memref<3x8x8x4xf32, #tpu.memory_space<vmem>>, vector<3x7x7x4xf32>
    %c0_35 = arith.constant 0 : index
    %c1_36 = arith.constant 1 : index
    %c0_37 = arith.constant 0 : index
    %c8 = arith.constant 8 : index
    %13 = vector.load %arg7[%c0_35, %c1_36, %c0_37, %c8] : memref<3x8x8x36xf32, #tpu.memory_space<vmem>>, vector<3x7x7x4xf32>
    tpu.vector_store %arg7[%c0_35, %c1_36, %c0_37, %c8], %12 {strides = array<i32>} : memref<3x8x8x36xf32, #tpu.memory_space<vmem>>, vector<3x7x7x4xf32>,
    %c0_38 = arith.constant 0 : index
    %c0_39 = arith.constant 0 : index
    %c0_40 = arith.constant 0 : index
    %c0_41 = arith.constant 0 : index
    %14 = vector.load %arg1[%c0_38, %c0_39, %c0_40, %c0_41] : memref<3x8x8x4xf32, #tpu.memory_space<vmem>>, vector<3x8x7x4xf32>
    %c0_42 = arith.constant 0 : index
    %c0_43 = arith.constant 0 : index
    %c1_44 = arith.constant 1 : index
    %c12 = arith.constant 12 : index
    %15 = vector.load %arg7[%c0_42, %c0_43, %c1_44, %c12] : memref<3x8x8x36xf32, #tpu.memory_space<vmem>>, vector<3x8x7x4xf32>
    tpu.vector_store %arg7[%c0_42, %c0_43, %c1_44, %c12], %14 {strides = array<i32>} : memref<3x8x8x36xf32, #tpu.memory_space<vmem>>, vector<3x8x7x4xf32>,
    %c0_45 = arith.constant 0 : index
    %c0_46 = arith.constant 0 : index
    %c0_47 = arith.constant 0 : index
    %c0_48 = arith.constant 0 : index
    %16 = vector.load %arg1[%c0_45, %c0_46, %c0_47, %c0_48] : memref<3x8x8x4xf32, #tpu.memory_space<vmem>>, vector<3x8x8x4xf32>
    %c0_49 = arith.constant 0 : index
    %c0_50 = arith.constant 0 : index
    %c0_51 = arith.constant 0 : index
    %c16 = arith.constant 16 : index
    %17 = vector.load %arg7[%c0_49, %c0_50, %c0_51, %c16] : memref<3x8x8x36xf32, #tpu.memory_space<vmem>>, vector<3x8x8x4xf32>
    tpu.vector_store %arg7[%c0_49, %c0_50, %c0_51, %c16], %16 {strides = array<i32>} : memref<3x8x8x36xf32, #tpu.memory_space<vmem>>, vector<3x8x8x4xf32>,
    %c0_52 = arith.constant 0 : index
    %c0_53 = arith.constant 0 : index
    %c1_54 = arith.constant 1 : index
    %c0_55 = arith.constant 0 : index
    %18 = vector.load %arg1[%c0_52, %c0_53, %c1_54, %c0_55] : memref<3x8x8x4xf32, #tpu.memory_space<vmem>>, vector<3x8x7x4xf32>
    %c0_56 = arith.constant 0 : index
    %c0_57 = arith.constant 0 : index
    %c0_58 = arith.constant 0 : index
    %c20 = arith.constant 20 : index
    %19 = vector.load %arg7[%c0_56, %c0_57, %c0_58, %c20] : memref<3x8x8x36xf32, #tpu.memory_space<vmem>>, vector<3x8x7x4xf32>
    tpu.vector_store %arg7[%c0_56, %c0_57, %c0_58, %c20], %18 {strides = array<i32>} : memref<3x8x8x36xf32, #tpu.memory_space<vmem>>, vector<3x8x7x4xf32>,
    %c0_59 = arith.constant 0 : index
    %c1_60 = arith.constant 1 : index
    %c0_61 = arith.constant 0 : index
    %c0_62 = arith.constant 0 : index
    %20 = vector.load %arg1[%c0_59, %c1_60, %c0_61, %c0_62] : memref<3x8x8x4xf32, #tpu.memory_space<vmem>>, vector<3x7x7x4xf32>
    %c0_63 = arith.constant 0 : index
    %c0_64 = arith.constant 0 : index
    %c1_65 = arith.constant 1 : index
    %c24 = arith.constant 24 : index
    %21 = vector.load %arg7[%c0_63, %c0_64, %c1_65, %c24] : memref<3x8x8x36xf32, #tpu.memory_space<vmem>>, vector<3x7x7x4xf32>
    tpu.vector_store %arg7[%c0_63, %c0_64, %c1_65, %c24], %20 {strides = array<i32>} : memref<3x8x8x36xf32, #tpu.memory_space<vmem>>, vector<3x7x7x4xf32>,
    %c0_66 = arith.constant 0 : index
    %c1_67 = arith.constant 1 : index
    %c0_68 = arith.constant 0 : index
    %c0_69 = arith.constant 0 : index
    %22 = vector.load %arg1[%c0_66, %c1_67, %c0_68, %c0_69] : memref<3x8x8x4xf32, #tpu.memory_space<vmem>>, vector<3x7x8x4xf32>
    %c0_70 = arith.constant 0 : index
    %c0_71 = arith.constant 0 : index
    %c0_72 = arith.constant 0 : index
    %c28 = arith.constant 28 : index
    %23 = vector.load %arg7[%c0_70, %c0_71, %c0_72, %c28] : memref<3x8x8x36xf32, #tpu.memory_space<vmem>>, vector<3x7x8x4xf32>
    tpu.vector_store %arg7[%c0_70, %c0_71, %c0_72, %c28], %22 {strides = array<i32>} : memref<3x8x8x36xf32, #tpu.memory_space<vmem>>, vector<3x7x8x4xf32>,
    %c0_73 = arith.constant 0 : index
    %c1_74 = arith.constant 1 : index
    %c1_75 = arith.constant 1 : index
    %c0_76 = arith.constant 0 : index
    %24 = vector.load %arg1[%c0_73, %c1_74, %c1_75, %c0_76] : memref<3x8x8x4xf32, #tpu.memory_space<vmem>>, vector<3x7x7x4xf32>
    %c0_77 = arith.constant 0 : index
    %c0_78 = arith.constant 0 : index
    %c0_79 = arith.constant 0 : index
    %c32 = arith.constant 32 : index
    %25 = vector.load %arg7[%c0_77, %c0_78, %c0_79, %c32] : memref<3x8x8x36xf32, #tpu.memory_space<vmem>>, vector<3x7x7x4xf32>
    tpu.vector_store %arg7[%c0_77, %c0_78, %c0_79, %c32], %24 {strides = array<i32>} : memref<3x8x8x36xf32, #tpu.memory_space<vmem>>, vector<3x7x7x4xf32>,
    %c0_80 = arith.constant 0 : index
    %c0_81 = arith.constant 0 : index
    %c0_82 = arith.constant 0 : index
    %c0_83 = arith.constant 0 : index
    %26 = vector.load %arg7[%c0_80, %c0_81, %c0_82, %c0_83] : memref<3x8x8x36xf32, #tpu.memory_space<vmem>>, vector<3x8x8x36xf32>
    %27 = vector.shape_cast %26 : vector<3x8x8x36xf32> to vector<192x36xf32>
    %c0_84 = arith.constant 0 : index
    %c0_85 = arith.constant 0 : index
    %28 = vector.load %arg2[%c0_84, %c0_85] : memref<36x4xf32, #tpu.memory_space<vmem>>, vector<36x4xf32>
    %cst_86 = arith.constant dense<0.000000e+00> : vector<192x4xf32>
    %29 = tpu.matmul %27, %28, %cst_86 {dimension_numbers = #tpu.dot_dimension_numbers<[1], [0], [0], [1], [0, 0, 1, 1], [], []>} : vector<192x36xf32>, vector<36x4xf32>, vector<192x4xf32> -> vector<192x4xf32>
    %c0_87 = arith.constant 0 : index
    %c0_88 = arith.constant 0 : index
    %30 = vector.load %arg3[%c0_87, %c0_88] : memref<1x4xf32, #tpu.memory_space<vmem>>, vector<1x4xf32>
    %31 = vector.broadcast %30 : vector<1x4xf32> to vector<192x4xf32>
    %32 = arith.addf %29, %31 : vector<192x4xf32>
    %cst_89 = arith.constant 0.000000e+00 : f32
    %33 = vector.broadcast %cst_89 : f32 to vector<192x4xf32>
    %34 = arith.maximumf %32, %33 : vector<192x4xf32>
    %35 = vector.shape_cast %34 : vector<192x4xf32> to vector<3x8x8x4xf32>
    %c0_90 = arith.constant 0 : index
    %c0_91 = arith.constant 0 : index
    %c0_92 = arith.constant 0 : index
    %c0_93 = arith.constant 0 : index
    %36 = vector.load %arg8[%c0_90, %c0_91, %c0_92, %c0_93] : memref<3x8x8x4xf32, #tpu.memory_space<vmem>>, vector<3x8x8x4xf32>
    tpu.vector_store %arg8[%c0_90, %c0_91, %c0_92, %c0_93], %35 {strides = array<i32>} : memref<3x8x8x4xf32, #tpu.memory_space<vmem>>, vector<3x8x8x4xf32>,
    %cst_94 = arith.constant 0.000000e+00 : f32
    %37 = vector.broadcast %cst_94 : f32 to vector<3x1x8x36xf32>
    %c0_95 = arith.constant 0 : index
    %c0_96 = arith.constant 0 : index
    %c0_97 = arith.constant 0 : index
    %c0_98 = arith.constant 0 : index
    %38 = vector.load %arg9[%c0_95, %c0_96, %c0_97, %c0_98] : memref<3x8x8x36xf32, #tpu.memory_space<vmem>>, vector<3x1x8x36xf32>
    tpu.vector_store %arg9[%c0_95, %c0_96, %c0_97, %c0_98], %37 {strides = array<i32>} : memref<3x8x8x36xf32, #tpu.memory_space<vmem>>, vector<3x1x8x36xf32>,
    %cst_99 = arith.constant 0.000000e+00 : f32
    %39 = vector.broadcast %cst_99 : f32 to vector<3x1x8x36xf32>
    %c0_100 = arith.constant 0 : index
    %c7_101 = arith.constant 7 : index
    %c0_102 = arith.constant 0 : index
    %c0_103 = arith.constant 0 : index
    %40 = vector.load %arg9[%c0_100, %c7_101, %c0_102, %c0_103] : memref<3x8x8x36xf32, #tpu.memory_space<vmem>>, vector<3x1x8x36xf32>
    tpu.vector_store %arg9[%c0_100, %c7_101, %c0_102, %c0_103], %39 {strides = array<i32>} : memref<3x8x8x36xf32, #tpu.memory_space<vmem>>, vector<3x1x8x36xf32>,
    %cst_104 = arith.constant 0.000000e+00 : f32
    %41 = vector.broadcast %cst_104 : f32 to vector<3x8x1x36xf32>
    %c0_105 = arith.constant 0 : index
    %c0_106 = arith.constant 0 : index
    %c0_107 = arith.constant 0 : index
    %c0_108 = arith.constant 0 : index
    %42 = vector.load %arg9[%c0_105, %c0_106, %c0_107, %c0_108] : memref<3x8x8x36xf32, #tpu.memory_space<vmem>>, vector<3x8x1x36xf32>
    tpu.vector_store %arg9[%c0_105, %c0_106, %c0_107, %c0_108], %41 {strides = array<i32>} : memref<3x8x8x36xf32, #tpu.memory_space<vmem>>, vector<3x8x1x36xf32>,
    %cst_109 = arith.constant 0.000000e+00 : f32
    %43 = vector.broadcast %cst_109 : f32 to vector<3x8x1x36xf32>
    %c0_110 = arith.constant 0 : index
    %c0_111 = arith.constant 0 : index
    %c7_112 = arith.constant 7 : index
    %c0_113 = arith.constant 0 : index
    %44 = vector.load %arg9[%c0_110, %c0_111, %c7_112, %c0_113] : memref<3x8x8x36xf32, #tpu.memory_space<vmem>>, vector<3x8x1x36xf32>
    tpu.vector_store %arg9[%c0_110, %c0_111, %c7_112, %c0_113], %43 {strides = array<i32>} : memref<3x8x8x36xf32, #tpu.memory_space<vmem>>, vector<3x8x1x36xf32>,
    %c0_114 = arith.constant 0 : index
    %c0_115 = arith.constant 0 : index
    %c0_116 = arith.constant 0 : index
    %c0_117 = arith.constant 0 : index
    %45 = vector.load %arg8[%c0_114, %c0_115, %c0_116, %c0_117] : memref<3x8x8x4xf32, #tpu.memory_space<vmem>>, vector<3x7x7x4xf32>
    %c0_118 = arith.constant 0 : index
    %c1_119 = arith.constant 1 : index
    %c1_120 = arith.constant 1 : index
    %c0_121 = arith.constant 0 : index
    %46 = vector.load %arg9[%c0_118, %c1_119, %c1_120, %c0_121] : memref<3x8x8x36xf32, #tpu.memory_space<vmem>>, vector<3x7x7x4xf32>
    tpu.vector_store %arg9[%c0_118, %c1_119, %c1_120, %c0_121], %45 {strides = array<i32>} : memref<3x8x8x36xf32, #tpu.memory_space<vmem>>, vector<3x7x7x4xf32>,
    %c0_122 = arith.constant 0 : index
    %c0_123 = arith.constant 0 : index
    %c0_124 = arith.constant 0 : index
    %c0_125 = arith.constant 0 : index
    %47 = vector.load %arg8[%c0_122, %c0_123, %c0_124, %c0_125] : memref<3x8x8x4xf32, #tpu.memory_space<vmem>>, vector<3x7x8x4xf32>
    %c0_126 = arith.constant 0 : index
    %c1_127 = arith.constant 1 : index
    %c0_128 = arith.constant 0 : index
    %c4_129 = arith.constant 4 : index
    %48 = vector.load %arg9[%c0_126, %c1_127, %c0_128, %c4_129] : memref<3x8x8x36xf32, #tpu.memory_space<vmem>>, vector<3x7x8x4xf32>
    tpu.vector_store %arg9[%c0_126, %c1_127, %c0_128, %c4_129], %47 {strides = array<i32>} : memref<3x8x8x36xf32, #tpu.memory_space<vmem>>, vector<3x7x8x4xf32>,
    %c0_130 = arith.constant 0 : index
    %c0_131 = arith.constant 0 : index
    %c1_132 = arith.constant 1 : index
    %c0_133 = arith.constant 0 : index
    %49 = vector.load %arg8[%c0_130, %c0_131, %c1_132, %c0_133] : memref<3x8x8x4xf32, #tpu.memory_space<vmem>>, vector<3x7x7x4xf32>
    %c0_134 = arith.constant 0 : index
    %c1_135 = arith.constant 1 : index
    %c0_136 = arith.constant 0 : index
    %c8_137 = arith.constant 8 : index
    %50 = vector.load %arg9[%c0_134, %c1_135, %c0_136, %c8_137] : memref<3x8x8x36xf32, #tpu.memory_space<vmem>>, vector<3x7x7x4xf32>
    tpu.vector_store %arg9[%c0_134, %c1_135, %c0_136, %c8_137], %49 {strides = array<i32>} : memref<3x8x8x36xf32, #tpu.memory_space<vmem>>, vector<3x7x7x4xf32>,
    %c0_138 = arith.constant 0 : index
    %c0_139 = arith.constant 0 : index
    %c0_140 = arith.constant 0 : index
    %c0_141 = arith.constant 0 : index
    %51 = vector.load %arg8[%c0_138, %c0_139, %c0_140, %c0_141] : memref<3x8x8x4xf32, #tpu.memory_space<vmem>>, vector<3x8x7x4xf32>
    %c0_142 = arith.constant 0 : index
    %c0_143 = arith.constant 0 : index
    %c1_144 = arith.constant 1 : index
    %c12_145 = arith.constant 12 : index
    %52 = vector.load %arg9[%c0_142, %c0_143, %c1_144, %c12_145] : memref<3x8x8x36xf32, #tpu.memory_space<vmem>>, vector<3x8x7x4xf32>
    tpu.vector_store %arg9[%c0_142, %c0_143, %c1_144, %c12_145], %51 {strides = array<i32>} : memref<3x8x8x36xf32, #tpu.memory_space<vmem>>, vector<3x8x7x4xf32>,
    %c0_146 = arith.constant 0 : index
    %c0_147 = arith.constant 0 : index
    %c0_148 = arith.constant 0 : index
    %c0_149 = arith.constant 0 : index
    %53 = vector.load %arg8[%c0_146, %c0_147, %c0_148, %c0_149] : memref<3x8x8x4xf32, #tpu.memory_space<vmem>>, vector<3x8x8x4xf32>
    %c0_150 = arith.constant 0 : index
    %c0_151 = arith.constant 0 : index
    %c0_152 = arith.constant 0 : index
    %c16_153 = arith.constant 16 : index
    %54 = vector.load %arg9[%c0_150, %c0_151, %c0_152, %c16_153] : memref<3x8x8x36xf32, #tpu.memory_space<vmem>>, vector<3x8x8x4xf32>
    tpu.vector_store %arg9[%c0_150, %c0_151, %c0_152, %c16_153], %53 {strides = array<i32>} : memref<3x8x8x36xf32, #tpu.memory_space<vmem>>, vector<3x8x8x4xf32>,
    %c0_154 = arith.constant 0 : index
    %c0_155 = arith.constant 0 : index
    %c1_156 = arith.constant 1 : index
    %c0_157 = arith.constant 0 : index
    %55 = vector.load %arg8[%c0_154, %c0_155, %c1_156, %c0_157] : memref<3x8x8x4xf32, #tpu.memory_space<vmem>>, vector<3x8x7x4xf32>
    %c0_158 = arith.constant 0 : index
    %c0_159 = arith.constant 0 : index
    %c0_160 = arith.constant 0 : index
    %c20_161 = arith.constant 20 : index
    %56 = vector.load %arg9[%c0_158, %c0_159, %c0_160, %c20_161] : memref<3x8x8x36xf32, #tpu.memory_space<vmem>>, vector<3x8x7x4xf32>
    tpu.vector_store %arg9[%c0_158, %c0_159, %c0_160, %c20_161], %55 {strides = array<i32>} : memref<3x8x8x36xf32, #tpu.memory_space<vmem>>, vector<3x8x7x4xf32>,
    %c0_162 = arith.constant 0 : index
    %c1_163 = arith.constant 1 : index
    %c0_164 = arith.constant 0 : index
    %c0_165 = arith.constant 0 : index
    %57 = vector.load %arg8[%c0_162, %c1_163, %c0_164, %c0_165] : memref<3x8x8x4xf32, #tpu.memory_space<vmem>>, vector<3x7x7x4xf32>
    %c0_166 = arith.constant 0 : index
    %c0_167 = arith.constant 0 : index
    %c1_168 = arith.constant 1 : index
    %c24_169 = arith.constant 24 : index
    %58 = vector.load %arg9[%c0_166, %c0_167, %c1_168, %c24_169] : memref<3x8x8x36xf32, #tpu.memory_space<vmem>>, vector<3x7x7x4xf32>
    tpu.vector_store %arg9[%c0_166, %c0_167, %c1_168, %c24_169], %57 {strides = array<i32>} : memref<3x8x8x36xf32, #tpu.memory_space<vmem>>, vector<3x7x7x4xf32>,
    %c0_170 = arith.constant 0 : index
    %c1_171 = arith.constant 1 : index
    %c0_172 = arith.constant 0 : index
    %c0_173 = arith.constant 0 : index
    %59 = vector.load %arg8[%c0_170, %c1_171, %c0_172, %c0_173] : memref<3x8x8x4xf32, #tpu.memory_space<vmem>>, vector<3x7x8x4xf32>
    %c0_174 = arith.constant 0 : index
    %c0_175 = arith.constant 0 : index
    %c0_176 = arith.constant 0 : index
    %c28_177 = arith.constant 28 : index
    %60 = vector.load %arg9[%c0_174, %c0_175, %c0_176, %c28_177] : memref<3x8x8x36xf32, #tpu.memory_space<vmem>>, vector<3x7x8x4xf32>
    tpu.vector_store %arg9[%c0_174, %c0_175, %c0_176, %c28_177], %59 {strides = array<i32>} : memref<3x8x8x36xf32, #tpu.memory_space<vmem>>, vector<3x7x8x4xf32>,
    %c0_178 = arith.constant 0 : index
    %c1_179 = arith.constant 1 : index
    %c1_180 = arith.constant 1 : index
    %c0_181 = arith.constant 0 : index
    %61 = vector.load %arg8[%c0_178, %c1_179, %c1_180, %c0_181] : memref<3x8x8x4xf32, #tpu.memory_space<vmem>>, vector<3x7x7x4xf32>
    %c0_182 = arith.constant 0 : index
    %c0_183 = arith.constant 0 : index
    %c0_184 = arith.constant 0 : index
    %c32_185 = arith.constant 32 : index
    %62 = vector.load %arg9[%c0_182, %c0_183, %c0_184, %c32_185] : memref<3x8x8x36xf32, #tpu.memory_space<vmem>>, vector<3x7x7x4xf32>
    tpu.vector_store %arg9[%c0_182, %c0_183, %c0_184, %c32_185], %61 {strides = array<i32>} : memref<3x8x8x36xf32, #tpu.memory_space<vmem>>, vector<3x7x7x4xf32>,
    %c0_186 = arith.constant 0 : index
    %c0_187 = arith.constant 0 : index
    %c0_188 = arith.constant 0 : index
    %c0_189 = arith.constant 0 : index
    %63 = vector.load %arg9[%c0_186, %c0_187, %c0_188, %c0_189] : memref<3x8x8x36xf32, #tpu.memory_space<vmem>>, vector<3x8x8x36xf32>
    %64 = vector.shape_cast %63 : vector<3x8x8x36xf32> to vector<192x36xf32>
    %c0_190 = arith.constant 0 : index
    %c0_191 = arith.constant 0 : index
    %65 = vector.load %arg4[%c0_190, %c0_191] : memref<36x4xf32, #tpu.memory_space<vmem>>, vector<36x4xf32>
    %cst_192 = arith.constant dense<0.000000e+00> : vector<192x4xf32>
    %66 = tpu.matmul %64, %65, %cst_192 {dimension_numbers = #tpu.dot_dimension_numbers<[1], [0], [0], [1], [0, 0, 1, 1], [], []>} : vector<192x36xf32>, vector<36x4xf32>, vector<192x4xf32> -> vector<192x4xf32>
    %c0_193 = arith.constant 0 : index
    %c0_194 = arith.constant 0 : index
    %c0_195 = arith.constant 0 : index
    %c0_196 = arith.constant 0 : index
    %67 = vector.load %arg1[%c0_193, %c0_194, %c0_195, %c0_196] : memref<3x8x8x4xf32, #tpu.memory_space<vmem>>, vector<3x8x8x4xf32>
    %68 = vector.shape_cast %67 : vector<3x8x8x4xf32> to vector<192x4xf32>
    %c0_197 = arith.constant 0 : index
    %c0_198 = arith.constant 0 : index
    %69 = vector.load %arg5[%c0_197, %c0_198] : memref<1x4xf32, #tpu.memory_space<vmem>>, vector<1x4xf32>
    %70 = vector.broadcast %69 : vector<1x4xf32> to vector<192x4xf32>
    %71 = arith.addf %66, %70 : vector<192x4xf32>
    %72 = arith.addf %71, %68 : vector<192x4xf32>
    %cst_199 = arith.constant 0.000000e+00 : f32
    %73 = vector.broadcast %cst_199 : f32 to vector<192x4xf32>
    %74 = arith.maximumf %72, %73 : vector<192x4xf32>
    %75 = vector.shape_cast %74 : vector<192x4xf32> to vector<3x8x8x4xf32>
    %c0_200 = arith.constant 0 : index
    %c0_201 = arith.constant 0 : index
    %c0_202 = arith.constant 0 : index
    %c0_203 = arith.constant 0 : index
    %76 = vector.load %arg6[%c0_200, %c0_201, %c0_202, %c0_203] : memref<3x8x8x4xf32, #tpu.memory_space<vmem>>, vector<3x8x8x4xf32>
    tpu.vector_store %arg6[%c0_200, %c0_201, %c0_202, %c0_203], %75 {strides = array<i32>} : memref<3x8x8x4xf32, #tpu.memory_space<vmem>>, vector<3x8x8x4xf32>,
    return
  }
  func.func @transform_0(%arg0: i32) -> (i32, i32, i32, i32) {
    %c0_i32 = arith.constant 0 : i32
    %c0_i32_0 = arith.constant 0 : i32
    %c0_i32_1 = arith.constant 0 : i32
    %c0_i32_2 = arith.constant 0 : i32
    return %arg0, %c0_i32, %c0_i32_0, %c0_i32_1 : i32, i32, i32, i32
  }
  func.func @transform_1(%arg0: i32) -> (i32, i32) {
    %c0_i32 = arith.constant 0 : i32
    %c0_i32_0 = arith.constant 0 : i32
    %c0_i32_1 = arith.constant 0 : i32
    return %c0_i32, %c0_i32_0 : i32, i32
  }
  func.func @transform_2(%arg0: i32) -> (i32, i32) {
    %c0_i32 = arith.constant 0 : i32
    %c0_i32_0 = arith.constant 0 : i32
    %c0_i32_1 = arith.constant 0 : i32
    return %c0_i32, %c0_i32_0 : i32, i32
  }
  func.func @transform_3(%arg0: i32) -> (i32, i32) {
    %c0_i32 = arith.constant 0 : i32
    %c0_i32_0 = arith.constant 0 : i32
    %c0_i32_1 = arith.constant 0 : i32
    return %c0_i32, %c0_i32_0 : i32, i32
  }
  func.func @transform_4(%arg0: i32) -> (i32, i32) {
    %c0_i32 = arith.constant 0 : i32
    %c0_i32_0 = arith.constant 0 : i32
    %c0_i32_1 = arith.constant 0 : i32
    return %c0_i32, %c0_i32_0 : i32, i32
  }
  func.func @transform_5(%arg0: i32) -> (i32, i32, i32, i32) {
    %c0_i32 = arith.constant 0 : i32
    %c0_i32_0 = arith.constant 0 : i32
    %c0_i32_1 = arith.constant 0 : i32
    %c0_i32_2 = arith.constant 0 : i32
    return %arg0, %c0_i32, %c0_i32_0, %c0_i32_1 : i32, i32, i32, i32
  }
}

</mosaic_0001>

<bundles_post_ra>
// kernel: tpu_custom_call.1
= control target key start
LH: loop header
LB: loop body
LE: loop exit
PB: predicated region body
PF: predicated region fallthrough
CT: control target
= control target key end

     0   :  { %s3720_s18 = smov 0   ;;  %s5250_s0 = inlined_call_operand.vmem [shape: f32[6,8,8,4], index: 0, kind: input, shape index: {}]   ;;  %s5251_s1 = inlined_call_operand.vmem [shape: f32[36,4], index: 1, kind: input, shape index: {}]   ;;  %s5252_s2 = inlined_call_operand.vmem [shape: f32[1,4], index: 2, kind: input, shape index: {}]   ;;  %s5253_s3 = inlined_call_operand.vmem [shape: f32[36,4], index: 3, kind: input, shape index: {}]   ;;  %s5254_s4 = inlined_call_operand.vmem [shape: f32[1,4], index: 4, kind: input, shape index: {}]   ;;  %s5255_s5 = inlined_call_operand.vmem [shape: f32[6,8,8,4], index: 5, kind: output, shape index: {}]  }
   0x1 LB: > { %s3362_s19 = sadd.s32 4294967295, %s3679_s18   ;;  %p3366_p0 = scmp.ge.s32.totalorder %s3679_s18, 1  ;;  %s3679_s18 = sphi %s3720_s18, %s15_s18  }
   0x2   : > { %p189_p1 = scmp.lt.s32.totalorder %s3679_s18, 3 }
   0x4   : > { %p190_p2 = pnand %p3366_p0, %p189_p1 }
   0x5   : > { %s3728_s20 = smul.u32 (!%p190_p2), 3, %s3362_s19  ;;  %vm241_vm0 = vcmask (!%p190_p2), 286720   ;;  %v3681_v0 = vmov (!%p190_p2), 0.0   ;;  %vm233_vm1 = vcmask (!%p190_p2), 293888   ;;  %s3682_s25 = smov (!%p190_p2), 4   ;;  %vm312_vm2 = vcmask (!%p190_p2), 30720  }
   0x6   : > { %193 = sbr.rel (%p190_p2) target bundleno = 1249 (0x4e1), region = 40  ;;  %245 = vst.msk [vmem:[#allocation2 + $0x18] sm:$0x1] (!%p190_p2), %vm241_vm0, %v3681_v0  ;;  %269 = vst.msk [vmem:[#allocation2 + $0x1f] sm:$0x1] (!%p190_p2), %vm241_vm0, %v3681_v0  ;;  %s3683_s26 = smov (!%p190_p2), 8  }
   0x7   : > { %243 = vst.msk [vmem:[#allocation2 + $0x8] sm:$0x1] (!%p190_p2), %vm241_vm0, %v3681_v0  ;;  %244 = vst.msk [vmem:[#allocation2 + $0x10] sm:$0x1] (!%p190_p2), %vm241_vm0, %v3681_v0  ;;  %p220_p3 = scmp.lt.s32.totalorder (!%p190_p2), %s3728_s20, 5  ;;  %s3684_s27 = smov (!%p190_p2), 12  }
   0x8   : > { %246 = vst.msk [vmem:[#allocation2 + $0x20] sm:$0x1] (!%p190_p2), %vm241_vm0, %v3681_v0  ;;  %247 = vst.msk [vmem:[#allocation2 + $0x28] sm:$0x1] (!%p190_p2), %vm241_vm0, %v3681_v0  ;;  %s3685_s28 = smov (!%p190_p2), 16   ;;  %s3686_s29 = smov (!%p190_p2), 20  }
   0x9   : > { %248 = vst.msk [vmem:[#allocation2 + $0x30] sm:$0x1] (!%p190_p2), %vm241_vm0, %v3681_v0  ;;  %251 = vst.msk [vmem:[#allocation2 + $0x48] sm:$0x1] (!%p190_p2), %vm241_vm0, %v3681_v0  ;;  %s3687_s30 = smov (!%p190_p2), 24   ;;  %s3688_s10 = smov (!%p190_p2), 28  }
   0xa   : > { %252 = vst.msk [vmem:[#allocation2 + $0x50] sm:$0x1] (!%p190_p2), %vm241_vm0, %v3681_v0  ;;  %253 = vst.msk [vmem:[#allocation2 + $0x58] sm:$0x1] (!%p190_p2), %vm241_vm0, %v3681_v0  ;;  %vm1513_vm3 = vcmask (!%p190_p2), 1043456   ;;  %s3689_s17 = smov (!%p190_p2), 32  }
   0xb   : > { %254 = vst.msk [vmem:[#allocation2 + $0x60] sm:$0x1] (!%p190_p2), %vm241_vm0, %v3681_v0  ;;  %255 = vst.msk [vmem:[#allocation2 + $0x68] sm:$0x1] (!%p190_p2), %vm241_vm0, %v3681_v0  ;;  %vm439_vm4 = vcmask (!%p190_p2), 64544   ;;  %vm566_vm5 = vcmask (!%p190_p2), 96320  }
   0xc   : > { %256 = vst.msk [vmem:[#allocation2 + $0x70] sm:$0x1] (!%p190_p2), %vm241_vm0, %v3681_v0  ;;  %259 = vst.msk [vmem:[#allocation2 + $0x88] sm:$0x1] (!%p190_p2), %vm241_vm0, %v3681_v0  ;;  %vm708_vm6 = vcmask (!%p190_p2), 129120   ;;  %vm853_vm7 = vcmask (!%p190_p2), 162944  }
   0xd   : > { %260 = vst.msk [vmem:[#allocation2 + $0x90] sm:$0x1] %vm241_vm0, %v3681_v0  ;;  %261 = vst.msk [vmem:[#allocation2 + $0x98] sm:$0x1] %vm241_vm0, %v3681_v0  ;;  %s5257_s20 = smov (!%p220_p3, %s3728_s20), 5  ;;  %vm998_vm8 = vcmask 194720  }
   0xe   : > { %262 = vst.msk [vmem:[#allocation2 + $0xa0] sm:$0x1] %vm241_vm0, %v3681_v0  ;;  %263 = vst.msk [vmem:[#allocation2 + $0xa8] sm:$0x1] %vm241_vm0, %v3681_v0  ;;  %s3488_s21 = sshll.u32 %s5257_s20, 6  ;;  %vm1129_vm9 = vcmask 227520  }
   0xf   : > { %264 = vst.msk [vmem:[#allocation2 + $0xb0] sm:$0x1] %vm241_vm0, %v3681_v0  ;;  %267 = vst.msk [vmem:[#allocation2 + $0xf] sm:$0x1] %vm241_vm0, %v3681_v0  ;;  %s3884_s24 = scalar_lea.vmem %s5250_s0, %s3488_s21  ;;  %vm1256_vm10 = vcmask 261344   ;;  %vm1383_vm11 = vcmask 293120  }
  0x10   : > { %268 = vst.msk [vmem:[#allocation2 + $0x17] sm:$0x1] %vm241_vm0, %v3681_v0  ;;  %270 = vst.msk [vmem:[#allocation2 + $0x27] sm:$0x1] %vm241_vm0, %v3681_v0  ;;  %v3887_v1 = vld [vmem:[%s3884_s24 + $0x10] sm:$0xff]  ;;  %v3890_v2 = vld [vmem:[%s3884_s24] sm:$0xff] }
  0x11   : > { %271 = vst.msk [vmem:[#allocation2 + $0x2f] sm:$0x1] %vm241_vm0, %v3681_v0  ;;  %272 = vst.msk [vmem:[#allocation2 + $0x37] sm:$0x1] %vm241_vm0, %v3681_v0  ;;  %380 = vrot.lane.b32.xlu1 %v3887_v1, %s3682_s25  ;;  %376 = vrot.lane.b32.xlu0 %v3890_v2, %s3682_s25  ;;  %v3969_v3 = vld [vmem:[%s3884_s24 + $0x18] sm:$0xff]  ;;  %v3972_v4 = vld [vmem:[%s3884_s24 + $0x8] sm:$0xff] }
  0x12   : > { %275 = vst.msk [vmem:[#allocation2 + $0x4f] sm:$0x1] %vm241_vm0, %v3681_v0  ;;  %276 = vst.msk [vmem:[#allocation2 + $0x57] sm:$0x1] %vm241_vm0, %v3681_v0  ;;  %v3979_v5 = vld [vmem:[%s3884_s24 + $0x28] sm:$0xff]  ;;  %v3982_v6 = vld [vmem:[%s3884_s24 + $0x20] sm:$0xff] }
  0x13   : > { %277 = vst.msk [vmem:[#allocation2 + $0x5f] sm:$0x1] %vm241_vm0, %v3681_v0  ;;  %278 = vst.msk [vmem:[#allocation2 + $0x67] sm:$0x1] %vm241_vm0, %v3681_v0  ;;  %v3989_v7 = vld [vmem:[%s3884_s24 + $0x40] sm:$0xff]  ;;  %v3992_v8 = vld [vmem:[%s3884_s24 + $0x30] sm:$0xff] }
  0x14   : > { %279 = vst.msk [vmem:[#allocation2 + $0x6f] sm:$0x1] %vm241_vm0, %v3681_v0  ;;  %280 = vst.msk [vmem:[#allocation2 + $0x77] sm:$0x1] %vm241_vm0, %v3681_v0  ;;  %v3999_v9 = vld [vmem:[%s3884_s24 + $0x50] sm:$0xff]  ;;  %v4002_v10 = vld [vmem:[%s3884_s24 + $0x48] sm:$0xff] }
  0x15   : > { %283 = vst.msk [vmem:[#allocation2 + $0x8f] sm:$0x1] %vm241_vm0, %v3681_v0  ;;  %284 = vst.msk [vmem:[#allocation2 + $0x97] sm:$0x1] %vm241_vm0, %v3681_v0  ;;  %382 = vrot.lane.b32.xlu1 %v3969_v3, %s3682_s25  ;;  %378 = vrot.lane.b32.xlu0 %v3972_v4, %s3682_s25  ;;  %v4009_v11 = vld [vmem:[%s3884_s24 + $0x60] sm:$0xff]  ;;  %v4012_v12 = vld [vmem:[%s3884_s24 + $0x58] sm:$0xff] }
  0x16   : > { %285 = vst.msk [vmem:[#allocation2 + $0x9f] sm:$0x1] %vm241_vm0, %v3681_v0  ;;  %286 = vst.msk [vmem:[#allocation2 + $0xa7] sm:$0x1] %vm241_vm0, %v3681_v0  ;;  %v292_v13 = vld [vmem:[%s3884_s24 + $0x10] sm:$0x7f] }
  0x17   : > { %287 = vst.msk [vmem:[#allocation2 + $0xaf] sm:$0x1] %vm241_vm0, %v3681_v0  ;;  %288 = vst.msk [vmem:[#allocation2 + $0xb7] sm:$0x1] %vm241_vm0, %v3681_v0  ;;  %v290_v14 = vld [vmem:[%s3884_s24] sm:$0x7f] }
  0x18   : > { %1759 = vst.msk [vmem:[#allocation4 + $0x8] sm:$0x1] %vm241_vm0, %v3681_v0  ;;  %1760 = vst.msk [vmem:[#allocation4 + $0x10] sm:$0x1] %vm241_vm0, %v3681_v0  ;;  %v347_v15 = vld [vmem:[%s3884_s24 + $0x70] sm:$0xff]  ;;  %v4030_v20 = vld [vmem:[%s3884_s24 + $0x68] sm:$0xff] }
  0x19   : > { %1761 = vst.msk [vmem:[#allocation4 + $0x18] sm:$0x1] %vm241_vm0, %v3681_v0  ;;  %1762 = vst.msk [vmem:[#allocation4 + $0x20] sm:$0x1] %vm241_vm0, %v3681_v0  ;;  %386 = vrot.lane.b32.xlu1 %v3979_v5, %s3682_s25  ;;  %384 = vrot.lane.b32.xlu0 %v3982_v6, %s3682_s25  ;;  %v293_v16 = vld [vmem:[%s3884_s24 + $0x18] sm:$0x7f] }
  0x1a   : > { %1763 = vst.msk [vmem:[#allocation4 + $0x28] sm:$0x1] %vm241_vm0, %v3681_v0  ;;  %1764 = vst.msk [vmem:[#allocation4 + $0x30] sm:$0x1] %vm241_vm0, %v3681_v0  ;;  %v291_v17 = vld [vmem:[%s3884_s24 + $0x8] sm:$0x7f] }
  0x1b   : > { %1767 = vst.msk [vmem:[#allocation4 + $0x48] sm:$0x1] %vm241_vm0, %v3681_v0  ;;  %1768 = vst.msk [vmem:[#allocation4 + $0x50] sm:$0x1] %vm241_vm0, %v3681_v0  ;;  %v295_v18 = vld [vmem:[%s3884_s24 + $0x28] sm:$0x7f] }
  0x1c   : > { %1769 = vst.msk [vmem:[#allocation4 + $0x58] sm:$0x1] %vm241_vm0, %v3681_v0  ;;  %1770 = vst.msk [vmem:[#allocation4 + $0x60] sm:$0x1] %vm241_vm0, %v3681_v0  ;;  %v294_v19 = vld [vmem:[%s3884_s24 + $0x20] sm:$0x7f] }
  0x1d   : > { %1771 = vst.msk [vmem:[#allocation4 + $0x68] sm:$0x1] %vm241_vm0, %v3681_v0  ;;  %1772 = vst.msk [vmem:[#allocation4 + $0x70] sm:$0x1] %vm241_vm0, %v3681_v0  ;;  %390 = vrot.lane.b32.xlu1 %v3989_v7, %s3682_s25  ;;  %388 = vrot.lane.b32.xlu0 %v3992_v8, %s3682_s25  ;;  %v297_v21 = vld [vmem:[%s3884_s24 + $0x40] sm:$0x7f] }
  0x1e   : > { %1775 = vst.msk [vmem:[#allocation4 + $0x88] sm:$0x1] %vm241_vm0, %v3681_v0  ;;  %1776 = vst.msk [vmem:[#allocation4 + $0x90] sm:$0x1] %vm241_vm0, %v3681_v0  ;;  %v296_v22 = vld [vmem:[%s3884_s24 + $0x30] sm:$0x7f] }
  0x1f   : > { %1777 = vst.msk [vmem:[#allocation4 + $0x98] sm:$0x1] %vm241_vm0, %v3681_v0  ;;  %1778 = vst.msk [vmem:[#allocation4 + $0xa0] sm:$0x1] %vm241_vm0, %v3681_v0  ;;  %v299_v23 = vld [vmem:[%s3884_s24 + $0x50] sm:$0x7f] }
  0x20   : > { %1779 = vst.msk [vmem:[#allocation4 + $0xa8] sm:$0x1] %vm241_vm0, %v3681_v0  ;;  %1780 = vst.msk [vmem:[#allocation4 + $0xb0] sm:$0x1] %vm241_vm0, %v3681_v0  ;;  %v298_v24 = vld [vmem:[%s3884_s24 + $0x48] sm:$0x7f] }
  0x21   : > { %1783 = vst.msk [vmem:[#allocation4 + $0xf] sm:$0x1] %vm241_vm0, %v3681_v0  ;;  %1784 = vst.msk [vmem:[#allocation4 + $0x17] sm:$0x1] %vm241_vm0, %v3681_v0  ;;  %394 = vrot.lane.b32.xlu1 %v3999_v9, %s3682_s25  ;;  %392 = vrot.lane.b32.xlu0 %v4002_v10, %s3682_s25  ;;  %v301_v25 = vld [vmem:[%s3884_s24 + $0x60] sm:$0x7f] }
  0x22   : > { %1785 = vst.msk [vmem:[#allocation4 + $0x1f] sm:$0x1] %vm241_vm0, %v3681_v0  ;;  %1786 = vst.msk [vmem:[#allocation4 + $0x27] sm:$0x1] %vm241_vm0, %v3681_v0  ;;  %v349_v26 = vld [vmem:[%s3884_s24 + $0x88] sm:$0xff]  ;;  %v348_v28 = vld [vmem:[%s3884_s24 + $0x80] sm:$0xff] }
  0x23   : > { %1787 = vst.msk [vmem:[#allocation4 + $0x2f] sm:$0x1] %vm241_vm0, %v3681_v0  ;;  %1788 = vst.msk [vmem:[#allocation4 + $0x37] sm:$0x1] %vm241_vm0, %v3681_v0  ;;  %v300_v27 = vld [vmem:[%s3884_s24 + $0x58] sm:$0x7f] }
  0x24   : > { %1791 = vst.msk [vmem:[#allocation4 + $0x4f] sm:$0x1] %vm241_vm0, %v3681_v0  ;;  %1792 = vst.msk [vmem:[#allocation4 + $0x57] sm:$0x1] %vm241_vm0, %v3681_v0  ;;  %v303_v29 = vld [vmem:[%s3884_s24 + $0x70] sm:$0x7f] }
  0x25   : > { %1793 = vst.msk [vmem:[#allocation4 + $0x5f] sm:$0x1] %vm241_vm0, %v3681_v0  ;;  %1794 = vst.msk [vmem:[#allocation4 + $0x67] sm:$0x1] %vm241_vm0, %v3681_v0  ;;  %398 = vrot.lane.b32.xlu1 %v4009_v11, %s3682_s25  ;;  %396 = vrot.lane.b32.xlu0 %v4012_v12, %s3682_s25  ;;  %v302_v30 = vld [vmem:[%s3884_s24 + $0x68] sm:$0x7f] }
  0x26   : > { %1795 = vst.msk [vmem:[#allocation4 + $0x6f] sm:$0x1] %vm241_vm0, %v3681_v0  ;;  %1796 = vst.msk [vmem:[#allocation4 + $0x77] sm:$0x1] %vm241_vm0, %v3681_v0  ;;  %v305_v31 = vld [vmem:[%s3884_s24 + $0x88] sm:$0x7f] }
  0x27   : > { %1799 = vst.msk [vmem:[#allocation4 + $0x8f] sm:$0x1] %vm241_vm0, %v3681_v0  ;;  %1800 = vst.msk [vmem:[#allocation4 + $0x97] sm:$0x1] %vm241_vm0, %v3681_v0  ;;  %v304_v32 = vld [vmem:[%s3884_s24 + $0x80] sm:$0x7f] }
  0x28   : > { %1801 = vst.msk [vmem:[#allocation4 + $0x9f] sm:$0x1] %vm241_vm0, %v3681_v0  ;;  %1802 = vst.msk [vmem:[#allocation4 + $0xa7] sm:$0x1] %vm241_vm0, %v3681_v0  ;;  %v307_v33 = vld [vmem:[%s3884_s24 + $0x98] sm:$0x7f] }
  0x29   : > { %1803 = vst.msk [vmem:[#allocation4 + $0xaf] sm:$0x1] %vm241_vm0, %v3681_v0  ;;  %1804 = vst.msk [vmem:[#allocation4 + $0xb7] sm:$0x1] %vm241_vm0, %v3681_v0  ;;  %402 = vrot.lane.b32.xlu1 %v347_v15, %s3682_s25  ;;  %400 = vrot.lane.b32.xlu0 %v4030_v20, %s3682_s25  ;;  %v306_v34 = vld [vmem:[%s3884_s24 + $0x90] sm:$0x7f] }
  0x2a   : > { %238 = vst.msk [vmem:[#allocation2 + $0x38] sm:$0xff] %vm233_vm1, %v3681_v0  ;;  %234 = vst.msk [vmem:[#allocation2] sm:$0xff] %vm233_vm1, %v3681_v0  ;;  %v309_v35 = vld [vmem:[%s3884_s24 + $0xa8] sm:$0x7f]  ;;  %v351_v36 = vld [vmem:[%s3884_s24 + $0x98] sm:$0xff]  ;;  %vm1726_vm12 = vcmask 31744  }
  0x2b   : > { %235 = vst.msk [vmem:[#allocation2 + $0x40] sm:$0xff] %vm233_vm1, %v3681_v0  ;;  %236 = vst.msk [vmem:[#allocation2 + $0x80] sm:$0xff] %vm233_vm1, %v3681_v0  ;;  %v350_v37 = vld [vmem:[%s3884_s24 + $0x90] sm:$0xff]  ;;  %v308_v38 = vld [vmem:[%s3884_s24 + $0xa0] sm:$0x7f] }
  0x2c   : > { %239 = vst.msk [vmem:[#allocation2 + $0x78] sm:$0xff] %vm233_vm1, %v3681_v0  ;;  %240 = vst.msk [vmem:[#allocation2 + $0xb8] sm:$0xff] %vm233_vm1, %v3681_v0  ;;  %v310_v39 = vld [vmem:[%s3884_s24 + $0xb0] sm:$0x7f]  ;;  %v353_v40 = vld [vmem:[%s3884_s24 + $0xa8] sm:$0xff] }
  0x2d   : > { %1751 = vst.msk [vmem:[#allocation4] sm:$0xff] %vm233_vm1, %v3681_v0  ;;  %1752 = vst.msk [vmem:[#allocation4 + $0x40] sm:$0xff] %vm233_vm1, %v3681_v0  ;;  %406 = vrot.lane.b32.xlu1 %v349_v26, %s3682_s25  ;;  %404 = vrot.lane.b32.xlu0 %v348_v28, %s3682_s25  ;;  %v352_v41 = vld [vmem:[%s3884_s24 + $0xa0] sm:$0xff]  ;;  %v354_v43 = vld [vmem:[%s3884_s24 + $0xb0] sm:$0xff] }
  0x2e   : > { %1753 = vst.msk [vmem:[#allocation4 + $0x80] sm:$0xff] %vm233_vm1, %v3681_v0  ;;  %1755 = vst.msk [vmem:[#allocation4 + $0x38] sm:$0xff] %vm233_vm1, %v3681_v0  ;;  %v461_v42 = vld [vmem:[%s3884_s24 + $0x1] sm:$0x7f]  ;;  %v463_v44 = vld [vmem:[%s3884_s24 + $0x11] sm:$0x7f] }
  0x2f   : > { %1756 = vst.msk [vmem:[#allocation4 + $0x78] sm:$0xff] %vm233_vm1, %v3681_v0  ;;  %1757 = vst.msk [vmem:[#allocation4 + $0xb8] sm:$0xff] %vm233_vm1, %v3681_v0  ;;  %v462_v45 = vld [vmem:[%s3884_s24 + $0x9] sm:$0x7f]  ;;  %v465_v46 = vld [vmem:[%s3884_s24 + $0x21] sm:$0x7f] }
  0x30   : > { %249 = vst.msk [vmem:[#allocation2 + $0x38] sm:$0x1] %vm241_vm0, %v3681_v0  ;;  %273 = vst.msk [vmem:[#allocation2 + $0x3f] sm:$0x1] %vm241_vm0, %v3681_v0  ;;  %v464_v47 = vld [vmem:[%s3884_s24 + $0x19] sm:$0x7f] }
  0x31   : > { %242 = vst.msk [vmem:[#allocation2] sm:$0x1] %vm241_vm0, %v3681_v0  ;;  %250 = vst.msk [vmem:[#allocation2 + $0x40] sm:$0x1] %vm241_vm0, %v3681_v0  ;;  %410 = vrot.lane.b32.xlu1 %v351_v36, %s3682_s25  ;;  %408 = vrot.lane.b32.xlu0 %v350_v37, %s3682_s25  ;;  %v467_v48 = vld [vmem:[%s3884_s24 + $0x31] sm:$0x7f] }
  0x32   : > { %257 = vst.msk [vmem:[#allocation2 + $0x78] sm:$0x1] %vm241_vm0, %v3681_v0  ;;  %258 = vst.msk [vmem:[#allocation2 + $0x80] sm:$0x1] %vm241_vm0, %v3681_v0  ;;  %v466_v49 = vld [vmem:[%s3884_s24 + $0x29] sm:$0x7f] }
  0x33   : > { %265 = vst.msk [vmem:[#allocation2 + $0xb8] sm:$0x1] %vm241_vm0, %v3681_v0  ;;  %266 = vst.msk [vmem:[#allocation2 + $0x7] sm:$0x1] %vm241_vm0, %v3681_v0  ;;  %v469_v50 = vld [vmem:[%s3884_s24 + $0x49] sm:$0x7f] }
  0x34   : > { %274 = vst.msk [vmem:[#allocation2 + $0x47] sm:$0x1] %vm241_vm0, %v3681_v0  ;;  %281 = vst.msk [vmem:[#allocation2 + $0x7f] sm:$0x1] %vm241_vm0, %v3681_v0  ;;  %v468_v51 = vld [vmem:[%s3884_s24 + $0x41] sm:$0x7f] }
  0x35   : > { %282 = vst.msk [vmem:[#allocation2 + $0x87] sm:$0x1] %vm241_vm0, %v3681_v0  ;;  %289 = vst.msk [vmem:[#allocation2 + $0xbf] sm:$0x1] %vm241_vm0, %v3681_v0  ;;  %414 = vrot.lane.b32.xlu1 %v353_v40, %s3682_s25  ;;  %412 = vrot.lane.b32.xlu0 %v352_v41, %s3682_s25  ;;  %v471_v52 = vld [vmem:[%s3884_s24 + $0x59] sm:$0x7f] }
  0x36   : > { %1758 = vst.msk [vmem:[#allocation4] sm:$0x1] %vm241_vm0, %v3681_v0  ;;  %1765 = vst.msk [vmem:[#allocation4 + $0x38] sm:$0x1] %vm241_vm0, %v3681_v0  ;;  %v470_v53 = vld [vmem:[%s3884_s24 + $0x51] sm:$0x7f] }
  0x37   : > { %1766 = vst.msk [vmem:[#allocation4 + $0x40] sm:$0x1] %vm241_vm0, %v3681_v0  ;;  %1773 = vst.msk [vmem:[#allocation4 + $0x78] sm:$0x1] %vm241_vm0, %v3681_v0  ;;  %v473_v54 = vld [vmem:[%s3884_s24 + $0x69] sm:$0x7f] }
  0x38   : > { %1774 = vst.msk [vmem:[#allocation4 + $0x80] sm:$0x1] %vm241_vm0, %v3681_v0  ;;  %1781 = vst.msk [vmem:[#allocation4 + $0xb8] sm:$0x1] %vm241_vm0, %v3681_v0  ;;  %v472_v55 = vld [vmem:[%s3884_s24 + $0x61] sm:$0x7f] }
  0x39   : > { %1782 = vst.msk [vmem:[#allocation4 + $0x7] sm:$0x1] %vm241_vm0, %v3681_v0  ;;  %1789 = vst.msk [vmem:[#allocation4 + $0x3f] sm:$0x1] %vm241_vm0, %v3681_v0  ;;  %503 = vrot.lane.b32.xlu1 %v461_v42, %s3683_s26  ;;  %416 = vrot.lane.b32.xlu0 %v354_v43, %s3682_s25  ;;  %v475_v56 = vld [vmem:[%s3884_s24 + $0x81] sm:$0x7f] }
  0x3a   : > { %1790 = vst.msk [vmem:[#allocation4 + $0x47] sm:$0x1] %vm241_vm0, %v3681_v0  ;;  %1797 = vst.msk [vmem:[#allocation4 + $0x7f] sm:$0x1] %vm241_vm0, %v3681_v0  ;;  %v474_v57 = vld [vmem:[%s3884_s24 + $0x71] sm:$0x7f] }
  0x3b   : > { %1798 = vst.msk [vmem:[#allocation4 + $0x87] sm:$0x1] %vm241_vm0, %v3681_v0  ;;  %1805 = vst.msk [vmem:[#allocation4 + $0xbf] sm:$0x1] %vm241_vm0, %v3681_v0  ;;  %v477_v58 = vld [vmem:[%s3884_s24 + $0x91] sm:$0x7f] }
  0x3c   : > { %315 = vst.msk [vmem:[#allocation2 + $0x19] sm:$0x7f] %vm312_vm2, %v292_v13  ;;  %313 = vst.msk [vmem:[#allocation2 + $0x9] sm:$0x7f] %vm312_vm2, %v290_v14  ;;  %v476_v59 = vld [vmem:[%s3884_s24 + $0x89] sm:$0x7f] }
  0x3d   : > { %316 = vst.msk [vmem:[#allocation2 + $0x21] sm:$0x7f] %vm312_vm2, %v293_v16  ;;  %314 = vst.msk [vmem:[#allocation2 + $0x11] sm:$0x7f] %vm312_vm2, %v291_v17  ;;  %507 = vrot.lane.b32.xlu1 %v463_v44, %s3683_s26  ;;  %505 = vrot.lane.b32.xlu0 %v462_v45, %s3683_s26  ;;  %v589_v60 = vld [vmem:[%s3884_s24 + $0x8] sm:$0x7f] }
  0x3e   : > { %318 = vst.msk [vmem:[#allocation2 + $0x31] sm:$0x7f] %vm312_vm2, %v295_v18  ;;  %317 = vst.msk [vmem:[#allocation2 + $0x29] sm:$0x7f] %vm312_vm2, %v294_v19  ;;  %v588_v61 = vld [vmem:[%s3884_s24] sm:$0x7f] }
  0x3f   : > { %320 = vst.msk [vmem:[#allocation2 + $0x49] sm:$0x7f] %vm312_vm2, %v297_v21  ;;  %319 = vst.msk [vmem:[#allocation2 + $0x39] sm:$0x7f] %vm312_vm2, %v296_v22  ;;  %v879_v62 = vld [vmem:[%s3884_s24 + $0x9] sm:$0x7f] }
  0x40   : > { %322 = vst.msk [vmem:[#allocation2 + $0x59] sm:$0x7f] %vm312_vm2, %v299_v23  ;;  %321 = vst.msk [vmem:[#allocation2 + $0x51] sm:$0x7f] %vm312_vm2, %v298_v24  ;;  %v878_v63 = vld [vmem:[%s3884_s24 + $0x1] sm:$0x7f] }
  0x41   : > { %324 = vst.msk [vmem:[#allocation2 + $0x69] sm:$0x7f] %vm312_vm2, %v301_v25  ;;  %323 = vst.msk [vmem:[#allocation2 + $0x61] sm:$0x7f] %vm312_vm2, %v300_v27  ;;  %511 = vrot.lane.b32.xlu1 %v465_v46, %s3683_s26  ;;  %509 = vrot.lane.b32.xlu0 %v464_v47, %s3683_s26  ;;  %v590_v0 = vld [vmem:[%s3884_s24 + $0x10] sm:$0x7f] }
  0x42   : > { %326 = vst.msk [vmem:[#allocation2 + $0x79] sm:$0x7f] %vm312_vm2, %v303_v29  ;;  %325 = vst.msk [vmem:[#allocation2 + $0x71] sm:$0x7f] %vm312_vm2, %v302_v30  ;;  %v3371_v13 = vld [vmem:[%s3884_s24 + $0x8] sm:$0x7f] }
  0x43   : > { %328 = vst.msk [vmem:[#allocation2 + $0x91] sm:$0x7f] %vm312_vm2, %v305_v31  ;;  %327 = vst.msk [vmem:[#allocation2 + $0x89] sm:$0x7f] %vm312_vm2, %v304_v32  ;;  %v3372_v14 = vld [vmem:[%s3884_s24 + $0x10] sm:$0x7f] }
  0x44   : > { %330 = vst.msk [vmem:[#allocation2 + $0xa1] sm:$0x7f] %vm312_vm2, %v307_v33  ;;  %329 = vst.msk [vmem:[#allocation2 + $0x99] sm:$0x7f] %vm312_vm2, %v306_v34  ;;  %v1430_v15 = vld [vmem:[%s5251_s1 + $0x8] sm:$0xff]  ;;  %v1431_v18 = vld [vmem:[%s5251_s1 + $0x10] sm:$0xff] }
  0x45   : > { %332 = vst.msk [vmem:[#allocation2 + $0xb1] sm:$0x7f] %vm312_vm2, %v309_v35  ;;  %331 = vst.msk [vmem:[#allocation2 + $0xa9] sm:$0x7f] %vm312_vm2, %v308_v38  ;;  %515 = vrot.lane.b32.xlu1 %v467_v48, %s3683_s26  ;;  %513 = vrot.lane.b32.xlu0 %v466_v49, %s3683_s26  ;;  %v591_v17 = vld [vmem:[%s3884_s24 + $0x18] sm:$0x7f] }
  0x46   : > { %333 = vst.msk [vmem:[#allocation2 + $0xb9] sm:$0x7f] %vm312_vm2, %v310_v39  ;;  %v1432_v19 = vld [vmem:[%s5251_s1 + $0x18] sm:$0xff]  ;;  %v1433_v22 = vld [vmem:[%s5251_s1 + $0x20] sm:$0xf] }
  0x47   : > { %v3644_v21 = vpack.c.bf16 %v1432_v19, %v1431_v18  ;;  %v880_v23 = vld [vmem:[%s3884_s24 + $0x11] sm:$0x7f]  ;;  %v881_v24 = vld [vmem:[%s3884_s24 + $0x19] sm:$0x7f]  ;;  %v592_v26 = vld [vmem:[%s3884_s24 + $0x20] sm:$0x7f] }
  0x48   : > { %v3414_v25 = vld [vmem:[%s3884_s24 + $0x11] sm:$0x7f]  ;;  %v3373_v27 = vld [vmem:[%s3884_s24 + $0x18] sm:$0x7f]  ;;  %v593_v30 = vld [vmem:[%s3884_s24 + $0x28] sm:$0x7f] }
  0x49   : > { %519 = vrot.lane.b32.xlu1 %v469_v50, %s3683_s26  ;;  %517 = vrot.lane.b32.xlu0 %v468_v51, %s3683_s26  ;;  %v3415_v33 = vld [vmem:[%s3884_s24 + $0x19] sm:$0x7f]  ;;  %v882_v35 = vld [vmem:[%s3884_s24 + $0x21] sm:$0x7f] }
  0x4a   : > { %v883_v38 = vld [vmem:[%s3884_s24 + $0x29] sm:$0x7f]  ;;  %v3416_v39 = vld [vmem:[%s3884_s24 + $0x21] sm:$0x7f]  ;;  %v3376_v45 = vld [vmem:[%s3884_s24 + $0x30] sm:$0x7f] }
  0x4b   : > { %v3375_v42 = vld [vmem:[%s3884_s24 + $0x28] sm:$0x7f]  ;;  %v884_v50 = vld [vmem:[%s3884_s24 + $0x31] sm:$0x7f] }
  0x4c   : > { %v3417_v51 = vld [vmem:[%s3884_s24 + $0x29] sm:$0x7f] }
  0x4d   : > { %523 = vrot.lane.b32.xlu1 %v471_v52, %s3683_s26  ;;  %521 = vrot.lane.b32.xlu0 %v470_v53, %s3683_s26  ;;  %v3377_v53 = vld [vmem:[%s3884_s24 + $0x38] sm:$0x7f]  ;;  %v3378_v19 = vld [vmem:[%s3884_s24 + $0x48] sm:$0x7f] }
  0x51   : > { %527 = vrot.lane.b32.xlu1 %v473_v54, %s3683_s26  ;;  %525 = vrot.lane.b32.xlu0 %v472_v55, %s3683_s26  ;;  %v3418_v54 = vld [vmem:[%s3884_s24 + $0x31] sm:$0x7f] }
  0x55   : > { %531 = vrot.lane.b32.xlu1 %v475_v56, %s3683_s26  ;;  %529 = vrot.lane.b32.xlu0 %v474_v57, %s3683_s26  ;;  %v596_v56 = vld [vmem:[%s3884_s24 + $0x40] sm:$0x7f]  ;;  %v595_v57 = vld [vmem:[%s3884_s24 + $0x38] sm:$0x7f] }
  0x59   : > { %535 = vrot.lane.b32.xlu1 %v477_v58, %s3683_s26  ;;  %533 = vrot.lane.b32.xlu0 %v476_v59, %s3683_s26 }
  0x5d   : > { %638 = vrot.lane.b32.xlu1 %v589_v60, %s3684_s27  ;;  %636 = vrot.lane.b32.xlu0 %v588_v61, %s3684_s27  ;;  %v597_v60 = vld [vmem:[%s3884_s24 + $0x48] sm:$0x7f]  ;;  %v3398_v61 = vld [vmem:[%s3884_s24 + $0x38] sm:$0xff] }
  0x61   : > { %783 = vrot.lane.b32.xlu1 %v3972_v4, %s3685_s28  ;;  %781 = vrot.lane.b32.xlu0 %v3890_v2, %s3685_s28  ;;  %v1429_v2 = vld [vmem:[%s5251_s1] sm:$0xff] }
  0x62   : > { %v3640_v16 = vpack.c.bf16 %v1430_v15, %v1429_v2 }
  0x64   : > { %3641 = vmatprep.subr.bf16.mxu0 %v3640_v16 }
  0x65   : > { %928 = vrot.lane.b32.xlu1 %v879_v62, %s3686_s29  ;;  %926 = vrot.lane.b32.xlu0 %v878_v63, %s3686_s29 }
  0x66   : > { %3643 = vmatpush3.bf16.msra.mxu0 %v3640_v16  ;;  %v886_v16 = vld [vmem:[%s3884_s24 + $0x41] sm:$0x7f] }
  0x67   : > { %3645 = vmatprep.subr.bf16.mxu0 %v3644_v21 }
  0x69   : > { %640 = vrot.lane.b32.xlu1 %v590_v0, %s3684_s27  ;;  %1066 = vrot.lane.b32.xlu0 %v3371_v13, %s3687_s30 }
  0x6a   : > { %3647 = vmatpush3.bf16.msra.mxu0 %v3644_v21  ;;  %v887_v21 = vld [vmem:[%s3884_s24 + $0x49] sm:$0x7f] }
  0x6b   : > { %3556 = vmatprep.subr.msk.mxu0 %vm1513_vm3, %v1433_v22 }
  0x6d   : > { %1193 = vrot.lane.b32.xlu1 %v3972_v4, %s3688_s10  ;;  %1068 = vrot.lane.b32.xlu0 %v3372_v14, %s3687_s30  ;;  %v3413_v4 = vld [vmem:[%s3884_s24 + $0x9] sm:$0x7f]  ;;  %v3419_v14 = vld [vmem:[%s3884_s24 + $0x39] sm:$0x7f] }
  0x6e   : > { %3557 = vmatpush3.msk.msra.mxu0 %vm1513_vm3, %v1433_v22 }
  0x71   : > { %785 = vrot.lane.b32.xlu1 %v3887_v1, %s3685_s28  ;;  %642 = vrot.lane.b32.xlu0 %v591_v17, %s3684_s27  ;;  %v885_v17 = vld [vmem:[%s3884_s24 + $0x39] sm:$0x7f] }
  0x75   : > { %1320 = vrot.lane.b32.xlu1 %v3413_v4, %s3689_s17  ;;  %1195 = vrot.lane.b32.xlu0 %v3887_v1, %s3688_s10  ;;  %v3374_v1 = vld [vmem:[%s3884_s24 + $0x20] sm:$0x7f] }
  0x79   : > { %930 = vrot.lane.b32.xlu1 %v880_v23, %s3686_s29  ;;  %787 = vrot.lane.b32.xlu0 %v3969_v3, %s3685_s28  ;;  %v3379_v23 = vld [vmem:[%s3884_s24 + $0x50] sm:$0x7f] }
  0x7d   : > { %932 = vrot.lane.b32.xlu1 %v881_v24, %s3686_s29  ;;  %1322 = vrot.lane.b32.xlu0 %v3414_v25, %s3689_s17  ;;  %v598_v24 = vld [vmem:[%s3884_s24 + $0x50] sm:$0x7f] }
  0x81   : > { %644 = vrot.lane.b32.xlu1 %v592_v26, %s3684_s27  ;;  %1070 = vrot.lane.b32.xlu0 %v3373_v27, %s3687_s30  ;;  %v599_v27 = vld [vmem:[%s3884_s24 + $0x58] sm:$0x7f] }
  0x83   : > { %v381_v28 = vpop.permute.xlu1 %380  ;;  %v377_v29 = vpop.permute.xlu0 %376 }
  0x84   : > { %442 = vst.msk [vmem:[#allocation2 + $0x18] sm:$0xff] %vm439_vm4, %v381_v28  ;;  %440 = vst.msk [vmem:[#allocation2 + $0x8] sm:$0xff] %vm439_vm4, %v377_v29 }
  0x85   : > { %1197 = vrot.lane.b32.xlu1 %v3969_v3, %s3688_s10  ;;  %1072 = vrot.lane.b32.xlu0 %v3374_v1, %s3687_s30 }
  0x87   : > { %v383_v31 = vpop.permute.xlu1 %382  ;;  %v379_v32 = vpop.permute.xlu0 %378 }
  0x88   : > { %443 = vst.msk [vmem:[#allocation2 + $0x20] sm:$0xff] %vm439_vm4, %v383_v31  ;;  %441 = vst.msk [vmem:[#allocation2 + $0x10] sm:$0xff] %vm439_vm4, %v379_v32  ;;  %v3420_v31 = vld [vmem:[%s3884_s24 + $0x49] sm:$0x7f] }
  0x89   : > { %789 = vrot.lane.b32.xlu1 %v3982_v6, %s3685_s28  ;;  %646 = vrot.lane.b32.xlu0 %v593_v30, %s3684_s27 }
  0x8b   : > { %v387_v34 = vpop.permute.xlu1 %386  ;;  %v385_v3 = vpop.permute.xlu0 %384 }
  0x8c   : > { %445 = vst.msk [vmem:[#allocation2 + $0x30] sm:$0xff] %vm439_vm4, %v387_v34  ;;  %444 = vst.msk [vmem:[#allocation2 + $0x28] sm:$0xff] %vm439_vm4, %v385_v3  ;;  %v888_v34 = vld [vmem:[%s3884_s24 + $0x51] sm:$0x7f] }
  0x8d   : > { %1324 = vrot.lane.b32.xlu1 %v3415_v33, %s3689_s17  ;;  %1199 = vrot.lane.b32.xlu0 %v3982_v6, %s3688_s10  ;;  %v594_v6 = vld [vmem:[%s3884_s24 + $0x30] sm:$0x7f] }
  0x8f   : > { %v391_v36 = vpop.permute.xlu1 %390  ;;  %v389_v37 = vpop.permute.xlu0 %388 }
  0x90   : > { %447 = vst.msk [vmem:[#allocation2 + $0x48] sm:$0xff] %vm439_vm4, %v391_v36  ;;  %446 = vst.msk [vmem:[#allocation2 + $0x38] sm:$0xff] %vm439_vm4, %v389_v37  ;;  %v889_v36 = vld [vmem:[%s3884_s24 + $0x59] sm:$0x7f] }
  0x91   : > { %934 = vrot.lane.b32.xlu1 %v882_v35, %s3686_s29  ;;  %791 = vrot.lane.b32.xlu0 %v3979_v5, %s3685_s28  ;;  %v3380_v35 = vld [vmem:[%s3884_s24 + $0x58] sm:$0x7f] }
  0x93   : > { %v395_v40 = vpop.permute.xlu1 %394  ;;  %v393_v41 = vpop.permute.xlu0 %392 }
  0x94   : > { %449 = vst.msk [vmem:[#allocation2 + $0x58] sm:$0xff] %vm439_vm4, %v395_v40  ;;  %448 = vst.msk [vmem:[#allocation2 + $0x50] sm:$0xff] %vm439_vm4, %v393_v41  ;;  %v600_v40 = vld [vmem:[%s3884_s24 + $0x60] sm:$0x7f] }
  0x95   : > { %936 = vrot.lane.b32.xlu1 %v883_v38, %s3686_s29  ;;  %1326 = vrot.lane.b32.xlu0 %v3416_v39, %s3689_s17  ;;  %v3381_v39 = vld [vmem:[%s3884_s24 + $0x60] sm:$0x7f] }
  0x97   : > { %v399_v43 = vpop.permute.xlu1 %398  ;;  %v397_v44 = vpop.permute.xlu0 %396 }
  0x98   : > { %451 = vst.msk [vmem:[#allocation2 + $0x68] sm:$0xff] %vm439_vm4, %v399_v43  ;;  %450 = vst.msk [vmem:[#allocation2 + $0x60] sm:$0xff] %vm439_vm4, %v397_v44 }
  0x99   : > { %648 = vrot.lane.b32.xlu1 %v594_v6, %s3684_s27  ;;  %1074 = vrot.lane.b32.xlu0 %v3375_v42, %s3687_s30  ;;  %v601_v42 = vld [vmem:[%s3884_s24 + $0x68] sm:$0x7f] }
  0x9b   : > { %v403_v46 = vpop.permute.xlu1 %402  ;;  %v401_v47 = vpop.permute.xlu0 %400 }
  0x9c   : > { %453 = vst.msk [vmem:[#allocation2 + $0x78] sm:$0xff] %vm439_vm4, %v403_v46  ;;  %452 = vst.msk [vmem:[#allocation2 + $0x70] sm:$0xff] %vm439_vm4, %v401_v47  ;;  %v3422_v47 = vld [vmem:[%s3884_s24 + $0x59] sm:$0x7f] }
  0x9d   : > { %1201 = vrot.lane.b32.xlu1 %v3979_v5, %s3688_s10  ;;  %1076 = vrot.lane.b32.xlu0 %v3376_v45, %s3687_s30 }
  0x9f   : > { %v407_v48 = vpop.permute.xlu1 %406  ;;  %v405_v49 = vpop.permute.xlu0 %404 }
  0xa0   : > { %455 = vst.msk [vmem:[#allocation2 + $0x90] sm:$0xff] %vm439_vm4, %v407_v48  ;;  %454 = vst.msk [vmem:[#allocation2 + $0x88] sm:$0xff] %vm439_vm4, %v405_v49 }
  0xa1   : > { %1203 = vrot.lane.b32.xlu1 %v3992_v8, %s3688_s10  ;;  %793 = vrot.lane.b32.xlu0 %v3992_v8, %s3685_s28 }
  0xa3   : > { %v411_v5 = vpop.permute.xlu1 %410  ;;  %v409_v52 = vpop.permute.xlu0 %408 }
  0xa4   : > { %457 = vst.msk [vmem:[#allocation2 + $0xa0] sm:$0xff] %vm439_vm4, %v411_v5  ;;  %456 = vst.msk [vmem:[#allocation2 + $0x98] sm:$0xff] %vm439_vm4, %v409_v52  ;;  %v891_v5 = vld [vmem:[%s3884_s24 + $0x69] sm:$0x7f] }
  0xa5   : > { %938 = vrot.lane.b32.xlu1 %v884_v50, %s3686_s29  ;;  %1328 = vrot.lane.b32.xlu0 %v3417_v51, %s3689_s17  ;;  %v890_v50 = vld [vmem:[%s3884_s24 + $0x61] sm:$0x7f]  ;;  %v3382_v52 = vld [vmem:[%s3884_s24 + $0x68] sm:$0x7f] }
  0xa7   : > { %v415_v55 = vpop.permute.xlu1 %414  ;;  %v413_v8 = vpop.permute.xlu0 %412 }
  0xa8   : > { %459 = vst.msk [vmem:[#allocation2 + $0xb0] sm:$0xff] %vm439_vm4, %v415_v55  ;;  %458 = vst.msk [vmem:[#allocation2 + $0xa8] sm:$0xff] %vm439_vm4, %v413_v8  ;;  %v602_v55 = vld [vmem:[%s3884_s24 + $0x70] sm:$0x7f] }
  0xa9   : > { %1078 = vrot.lane.b32.xlu1 %v3377_v53, %s3687_s30  ;;  %1330 = vrot.lane.b32.xlu0 %v3418_v54, %s3689_s17  ;;  %v3383_v8 = vld [vmem:[%s3884_s24 + $0x70] sm:$0x7f] }
  0xab   : > { %v504_v58 = vpop.permute.xlu1 %503  ;;  %v417_v59 = vpop.permute.xlu0 %416 }
  0xac   : > { %567 = vst.msk [vmem:[#allocation2 + $0x8] sm:$0x7f] %vm566_vm5, %v504_v58  ;;  %v3403_v58 = vld [vmem:[%s3884_s24 + $0x68] sm:$0xff] }
  0xad   : > { %460 = vst.msk [vmem:[#allocation2 + $0xb8] sm:$0xff] %vm439_vm4, %v417_v59  ;;  %652 = vrot.lane.b32.xlu1 %v596_v56, %s3684_s27  ;;  %650 = vrot.lane.b32.xlu0 %v595_v57, %s3684_s27  ;;  %v747_v59 = vld [vmem:[%s3884_s24 + $0x70] sm:$0xff] }
  0xaf   : > { %v508_v62 = vpop.permute.xlu1 %507  ;;  %v506_v63 = vpop.permute.xlu0 %505 }
  0xb0   : > { %569 = vst.msk [vmem:[#allocation2 + $0x18] sm:$0x7f] %vm566_vm5, %v508_v62  ;;  %568 = vst.msk [vmem:[#allocation2 + $0x10] sm:$0x7f] %vm566_vm5, %v506_v63  ;;  %v3424_v63 = vld [vmem:[%s3884_s24 + $0x69] sm:$0x7f] }
  0xb1   : > { %654 = vrot.lane.b32.xlu1 %v597_v60, %s3684_s27  ;;  %1205 = vrot.lane.b32.xlu0 %v3398_v61, %s3688_s10 }
  0xb3   : > { %v512_v0 = vpop.permute.xlu1 %511  ;;  %v510_v13 = vpop.permute.xlu0 %509 }
  0xb4   : > { %571 = vst.msk [vmem:[#allocation2 + $0x28] sm:$0x7f] %vm566_vm5, %v512_v0  ;;  %570 = vst.msk [vmem:[#allocation2 + $0x20] sm:$0x7f] %vm566_vm5, %v510_v13 }
  0xb5   : > { %797 = vrot.lane.b32.xlu1 %v3989_v7, %s3685_s28  ;;  %795 = vrot.lane.b32.xlu0 %v3398_v61, %s3685_s28 }
  0xb7   : > { %v516_v2 = vpop.permute.xlu1 %515  ;;  %v514_v15 = vpop.permute.xlu0 %513 }
  0xb8   : > { %573 = vst.msk [vmem:[#allocation2 + $0x38] sm:$0x7f] %vm566_vm5, %v516_v2  ;;  %572 = vst.msk [vmem:[#allocation2 + $0x30] sm:$0x7f] %vm566_vm5, %v514_v15  ;;  %v3425_v2 = vld [vmem:[%s3884_s24 + $0x71] sm:$0x7f] }
  0xb9   : > { %799 = vrot.lane.b32.xlu1 %v4002_v10, %s3685_s28  ;;  %1332 = vrot.lane.b32.xlu0 %v3419_v14, %s3689_s17  ;;  %v892_v14 = vld [vmem:[%s3884_s24 + $0x71] sm:$0x7f] }
  0xbb   : > { %v520_v7 = vpop.permute.xlu1 %519  ;;  %v518_v18 = vpop.permute.xlu0 %517 }
  0xbc   : > { %575 = vst.msk [vmem:[#allocation2 + $0x50] sm:$0x7f] %vm566_vm5, %v520_v7  ;;  %574 = vst.msk [vmem:[#allocation2 + $0x48] sm:$0x7f] %vm566_vm5, %v518_v18  ;;  %v603_v7 = vld [vmem:[%s3884_s24 + $0x78] sm:$0x7f] }
  0xbd   : > { %942 = vrot.lane.b32.xlu1 %v886_v16, %s3686_s29  ;;  %940 = vrot.lane.b32.xlu0 %v885_v17, %s3686_s29  ;;  %v3384_v17 = vld [vmem:[%s3884_s24 + $0x78] sm:$0x7f] }
  0xbf   : > { %v524_v4 = vpop.permute.xlu1 %523  ;;  %v522_v22 = vpop.permute.xlu0 %521 }
  0xc0   : > { %577 = vst.msk [vmem:[#allocation2 + $0x60] sm:$0x7f] %vm566_vm5, %v524_v4  ;;  %576 = vst.msk [vmem:[#allocation2 + $0x58] sm:$0x7f] %vm566_vm5, %v522_v22  ;;  %v3405_v4 = vld [vmem:[%s3884_s24 + $0x78] sm:$0xff] }
  0xc1   : > { %1080 = vrot.lane.b32.xlu1 %v3378_v19, %s3687_s30  ;;  %944 = vrot.lane.b32.xlu0 %v887_v21, %s3686_s29  ;;  %v604_v21 = vld [vmem:[%s3884_s24 + $0x80] sm:$0x7f] }
  0xc3   : > { %v528_v25 = vpop.permute.xlu1 %527  ;;  %v526_v26 = vpop.permute.xlu0 %525 }
  0xc4   : > { %579 = vst.msk [vmem:[#allocation2 + $0x70] sm:$0x7f] %vm566_vm5, %v528_v25  ;;  %578 = vst.msk [vmem:[#allocation2 + $0x68] sm:$0x7f] %vm566_vm5, %v526_v26  ;;  %v605_v25 = vld [vmem:[%s3884_s24 + $0x88] sm:$0x7f] }
  0xc5   : > { %1082 = vrot.lane.b32.xlu1 %v3379_v23, %s3687_s30  ;;  %656 = vrot.lane.b32.xlu0 %v598_v24, %s3684_s27 }
  0xc7   : > { %v532_v1 = vpop.permute.xlu1 %531  ;;  %v530_v28 = vpop.permute.xlu0 %529 }
  0xc8   : > { %581 = vst.msk [vmem:[#allocation2 + $0x88] sm:$0x7f] %vm566_vm5, %v532_v1  ;;  %580 = vst.msk [vmem:[#allocation2 + $0x78] sm:$0x7f] %vm566_vm5, %v530_v28  ;;  %v749_v1 = vld [vmem:[%s3884_s24 + $0x80] sm:$0xff] }
  0xc9   : > { %658 = vrot.lane.b32.xlu1 %v599_v27, %s3684_s27  ;;  %1207 = vrot.lane.b32.xlu0 %v4002_v10, %s3688_s10  ;;  %v3421_v10 = vld [vmem:[%s3884_s24 + $0x51] sm:$0x7f]  ;;  %v3426_v28 = vld [vmem:[%s3884_s24 + $0x79] sm:$0x7f] }
  0xcb   : > { %v536_v29 = vpop.permute.xlu1 %535  ;;  %v534_v30 = vpop.permute.xlu0 %533 }
  0xcc   : > { %583 = vst.msk [vmem:[#allocation2 + $0x98] sm:$0x7f] %vm566_vm5, %v536_v29  ;;  %582 = vst.msk [vmem:[#allocation2 + $0x90] sm:$0x7f] %vm566_vm5, %v534_v30 }
  0xcd   : > { %1209 = vrot.lane.b32.xlu1 %v3999_v9, %s3688_s10  ;;  %801 = vrot.lane.b32.xlu0 %v3999_v9, %s3685_s28 }
  0xcf   : > { %v639_v32 = vpop.permute.xlu1 %638  ;;  %v637_v33 = vpop.permute.xlu0 %636 }
  0xd0   : > { %710 = vst.msk [vmem:[#allocation2 + $0x9] sm:$0x7f] %vm708_vm6, %v639_v32  ;;  %709 = vst.msk [vmem:[#allocation2 + $0x1] sm:$0x7f] %vm708_vm6, %v637_v33  ;;  %v750_v32 = vld [vmem:[%s3884_s24 + $0x88] sm:$0xff] }
  0xd1   : > { %803 = vrot.lane.b32.xlu1 %v4012_v12, %s3685_s28  ;;  %1334 = vrot.lane.b32.xlu0 %v3420_v31, %s3689_s17  ;;  %v893_v33 = vld [vmem:[%s3884_s24 + $0x79] sm:$0x7f] }
  0xd3   : > { %v784_v3 = vpop.permute.xlu1 %783  ;;  %v782_v9 = vpop.permute.xlu0 %781 }
  0xd4   : > { %855 = vst.msk [vmem:[#allocation2 + $0x8] sm:$0xff] %vm853_vm7, %v784_v3  ;;  %854 = vst.msk [vmem:[#allocation2] sm:$0xff] %vm853_vm7, %v782_v9  ;;  %v894_v3 = vld [vmem:[%s3884_s24 + $0x81] sm:$0x7f]  ;;  %v895_v9 = vld [vmem:[%s3884_s24 + $0x89] sm:$0x7f] }
  0xd5   : > { %1336 = vrot.lane.b32.xlu1 %v3421_v10, %s3689_s17  ;;  %946 = vrot.lane.b32.xlu0 %v888_v34, %s3686_s29 }
  0xd7   : > { %v929_v37 = vpop.permute.xlu1 %928  ;;  %v927_v38 = vpop.permute.xlu0 %926 }
  0xd8   : > { %1000 = vst.msk [vmem:[#allocation2 + $0x8] sm:$0x7f] %vm998_vm8, %v929_v37  ;;  %999 = vst.msk [vmem:[#allocation2] sm:$0x7f] %vm998_vm8, %v927_v38  ;;  %v3385_v37 = vld [vmem:[%s3884_s24 + $0x88] sm:$0x7f] }
  0xd9   : > { %1084 = vrot.lane.b32.xlu1 %v3380_v35, %s3687_s30  ;;  %948 = vrot.lane.b32.xlu0 %v889_v36, %s3686_s29  ;;  %v606_v38 = vld [vmem:[%s3884_s24 + $0x90] sm:$0x7f] }
  0xdb   : > { %v641_v41 = vpop.permute.xlu1 %640  ;;  %v1067_v6 = vpop.permute.xlu0 %1066 }
  0xdc   : > { %711 = vst.msk [vmem:[#allocation2 + $0x11] sm:$0x7f] %vm708_vm6, %v641_v41  ;;  %v3386_v41 = vld [vmem:[%s3884_s24 + $0x90] sm:$0x7f] }
  0xdd   : > { %1130 = vst.msk [vmem:[#allocation2 + $0x1] sm:$0x7f] %vm1129_vm9, %v1067_v6  ;;  %1086 = vrot.lane.b32.xlu1 %v3381_v39, %s3687_s30  ;;  %660 = vrot.lane.b32.xlu0 %v600_v40, %s3684_s27 }
  0xdf   : > { %v1194_v43 = vpop.permute.xlu1 %1193  ;;  %v1069_v44 = vpop.permute.xlu0 %1068 }
  0xe0   : > { %1257 = vst.msk [vmem:[#allocation2] sm:$0xff] %vm1256_vm10, %v1194_v43 }
  0xe1   : > { %1131 = vst.msk [vmem:[#allocation2 + $0x9] sm:$0x7f] %vm1129_vm9, %v1069_v44  ;;  %662 = vrot.lane.b32.xlu1 %v601_v42, %s3684_s27  ;;  %1211 = vrot.lane.b32.xlu0 %v4012_v12, %s3688_s10  ;;  %v3423_v12 = vld [vmem:[%s3884_s24 + $0x61] sm:$0x7f]  ;;  %v607_v44 = vld [vmem:[%s3884_s24 + $0x98] sm:$0x7f] }
  0xe3   : > { %v786_v45 = vpop.permute.xlu1 %785  ;;  %v643_v46 = vpop.permute.xlu0 %642 }
  0xe4   : > { %856 = vst.msk [vmem:[#allocation2 + $0x10] sm:$0xff] %vm853_vm7, %v786_v45  ;;  %v751_v45 = vld [vmem:[%s3884_s24 + $0x90] sm:$0xff] }
  0xe5   : > { %712 = vst.msk [vmem:[#allocation2 + $0x19] sm:$0x7f] %vm708_vm6, %v643_v46  ;;  %1213 = vrot.lane.b32.xlu1 %v4009_v11, %s3688_s10  ;;  %805 = vrot.lane.b32.xlu0 %v4009_v11, %s3685_s28 }
  0xe7   : > { %v1321_v48 = vpop.permute.xlu1 %1320  ;;  %v1196_v49 = vpop.permute.xlu0 %1195 }
  0xe8   : > { %1384 = vst.msk [vmem:[#allocation2] sm:$0x7f] %vm1383_vm11, %v1321_v48 }
  0xe9   : > { %1258 = vst.msk [vmem:[#allocation2 + $0x8] sm:$0xff] %vm1256_vm10, %v1196_v49  ;;  %807 = vrot.lane.b32.xlu1 %v4030_v20, %s3685_s28  ;;  %1338 = vrot.lane.b32.xlu0 %v3422_v47, %s3689_s17  ;;  %v3427_v49 = vld [vmem:[%s3884_s24 + $0x89] sm:$0x7f] }
  0xeb   : > { %v931_v51 = vpop.permute.xlu1 %930  ;;  %v788_v11 = vpop.permute.xlu0 %787 }
  0xec   : > { %1001 = vst.msk [vmem:[#allocation2 + $0x10] sm:$0x7f] %vm998_vm8, %v931_v51  ;;  %v752_v51 = vld [vmem:[%s3884_s24 + $0x98] sm:$0xff] }
  0xed   : > { %857 = vst.msk [vmem:[#allocation2 + $0x18] sm:$0xff] %vm853_vm7, %v788_v11  ;;  %1340 = vrot.lane.b32.xlu1 %v3423_v12, %s3689_s17  ;;  %950 = vrot.lane.b32.xlu0 %v890_v50, %s3686_s29  ;;  %v896_v11 = vld [vmem:[%s3884_s24 + $0x91] sm:$0x7f] }
  0xef   : > { %v933_v53 = vpop.permute.xlu1 %932  ;;  %v1323_v20 = vpop.permute.xlu0 %1322  ;;  %v1405_v54 = vld [vmem:[#allocation2] sm:$0xff] }
  0xf0   : > { %1002 = vst.msk [vmem:[#allocation2 + $0x18] sm:$0x7f] %vm998_vm8, %v933_v53  ;;  %3558 = vmatprep.mubr.msk.f32.mxu0 %vm233_vm1, %v1405_v54  ;;  %v3428_v53 = vld [vmem:[%s3884_s24 + $0x91] sm:$0x7f] }
  0xf1   : > { %1385 = vst.msk [vmem:[#allocation2 + $0x8] sm:$0x7f] %vm1383_vm11, %v1323_v20  ;;  %952 = vrot.lane.b32.xlu0 %v891_v5, %s3686_s29  ;;  %1088 = vrot.lane.b32.xlu1 %v3382_v52, %s3687_s30  ;;  %v478_v20 = vld [vmem:[%s3884_s24 + $0x99] sm:$0x7f] }
  0xf3   : > { %v645_v56 = vpop.permute.xlu1 %644  ;;  %v1071_v57 = vpop.permute.xlu0 %1070 }
  0xf4   : > { %713 = vst.msk [vmem:[#allocation2 + $0x21] sm:$0x7f] %vm708_vm6, %v645_v56  ;;  %v3387_v56 = vld [vmem:[%s3884_s24 + $0x98] sm:$0x7f] }
  0xf5   : > { %1132 = vst.msk [vmem:[#allocation2 + $0x11] sm:$0x7f] %vm1129_vm9, %v1071_v57  ;;  %664 = vrot.lane.b32.xlu0 %v602_v55, %s3684_s27  ;;  %1090 = vrot.lane.b32.xlu1 %v3383_v8, %s3687_s30  ;;  %v897_v8 = vld [vmem:[%s3884_s24 + $0x99] sm:$0x7f] }
  0xf7   : > { %v1198_v60 = vpop.permute.xlu1 %1197  ;;  %v1073_v61 = vpop.permute.xlu0 %1072 }
  0xf8   : > { %v1406_v62 = vld [vmem:[#allocation2 + $0x8] sm:$0xff]  ;;  %1259 = vst.msk [vmem:[#allocation2 + $0x10] sm:$0xff] %vm1256_vm10, %v1198_v60  ;;  %v479_v60 = vld [vmem:[%s3884_s24 + $0xa1] sm:$0x7f] }
  0xf9   : > { %1133 = vst.msk [vmem:[#allocation2 + $0x19] sm:$0x7f] %vm1129_vm9, %v1073_v61  ;;  %3559 = vmatmul.mubr.msk.f32.vlgmr.msra.gmra.mrb[0].mxu0 %vm233_vm1, %v1406_v62  ;;  %1215 = vrot.lane.b32.xlu0 %v3403_v58, %s3688_s10  ;;  %v608_v61 = vld [vmem:[%s3884_s24 + $0xa0] sm:$0x7f] }
  0xfa   : > { %809 = vrot.lane.b32.xlu1 %v747_v59, %s3685_s28 }
  0xfb   : > { %v790_v0 = vpop.permute.xlu1 %789  ;;  %v647_v13 = vpop.permute.xlu0 %646 }
  0xfc   : > { %858 = vst.msk [vmem:[#allocation2 + $0x20] sm:$0xff] %vm853_vm7, %v790_v0 }
  0xfd   : > { %714 = vst.msk [vmem:[#allocation2 + $0x29] sm:$0x7f] %vm708_vm6, %v647_v13  ;;  %1217 = vrot.lane.b32.xlu0 %v747_v59, %s3688_s10  ;;  %v3388_v13 = vld [vmem:[%s3884_s24 + $0xa0] sm:$0x7f] }
  0xfe   : > { %1342 = vrot.lane.b32.xlu1 %v3424_v63, %s3689_s17 }
  0xff   : > { %v1325_v15 = vpop.permute.xlu1 %1324  ;;  %v1200_v16 = vpop.permute.xlu0 %1199 }
 0x100   : > { %1386 = vst.msk [vmem:[#allocation2 + $0x10] sm:$0x7f] %vm1383_vm11, %v1325_v15  ;;  %v609_v15 = vld [vmem:[%s3884_s24 + $0xa8] sm:$0x7f] }
 0x101   : > { %1260 = vst.msk [vmem:[#allocation2 + $0x18] sm:$0xff] %vm1256_vm10, %v1200_v16  ;;  %954 = vrot.lane.b32.xlu0 %v892_v14, %s3686_s29  ;;  %v753_v16 = vld [vmem:[%s3884_s24 + $0xa0] sm:$0xff] }
 0x102   : > { %1344 = vrot.lane.b32.xlu1 %v3425_v2, %s3689_s17 }
 0x103   : > { %v935_v18 = vpop.permute.xlu1 %934  ;;  %v792_v19 = vpop.permute.xlu0 %791 }
 0x104   : > { %1003 = vst.msk [vmem:[#allocation2 + $0x20] sm:$0x7f] %vm998_vm8, %v935_v18  ;;  %v3429_v18 = vld [vmem:[%s3884_s24 + $0x99] sm:$0x7f] }
 0x105   : > { %859 = vst.msk [vmem:[#allocation2 + $0x28] sm:$0xff] %vm853_vm7, %v792_v19  ;;  %1092 = vrot.lane.b32.xlu0 %v3384_v17, %s3687_s30 }
 0x106   : > { %666 = vrot.lane.b32.xlu1 %v603_v7, %s3684_s27 }
 0x107   : > { %v937_v22 = vpop.permute.xlu1 %936  ;;  %v1327_v23 = vpop.permute.xlu0 %1326  ;;  %v1407_v24 = vld [vmem:[#allocation2 + $0x10] sm:$0xff] }
 0x108   : > { %1004 = vst.msk [vmem:[#allocation2 + $0x28] sm:$0x7f] %vm998_vm8, %v937_v22  ;;  %3561 = vmatprep.mubr.msk.f32.mxu0 %vm233_vm1, %v1407_v24  ;;  %v898_v22 = vld [vmem:[%s3884_s24 + $0xa1] sm:$0x7f] }
 0x109   : > { %1387 = vst.msk [vmem:[#allocation2 + $0x18] sm:$0x7f] %vm1383_vm11, %v1327_v23  ;;  %668 = vrot.lane.b32.xlu0 %v604_v21, %s3684_s27 }
 0x10a   : > { %1219 = vrot.lane.b32.xlu1 %v3405_v4, %s3688_s10 }
 0x10b   : > { %v649_v26 = vpop.permute.xlu1 %648  ;;  %v1075_v27 = vpop.permute.xlu0 %1074 }
 0x10c   : > { %715 = vst.msk [vmem:[#allocation2 + $0x31] sm:$0x7f] %vm708_vm6, %v649_v26  ;;  %v899_v26 = vld [vmem:[%s3884_s24 + $0xa9] sm:$0x7f] }
 0x10d   : > { %1134 = vst.msk [vmem:[#allocation2 + $0x21] sm:$0x7f] %vm1129_vm9, %v1075_v27  ;;  %670 = vrot.lane.b32.xlu0 %v605_v25, %s3684_s27  ;;  %v3430_v25 = vld [vmem:[%s3884_s24 + $0xa1] sm:$0x7f] }
 0x10e   : > { %811 = vrot.lane.b32.xlu1 %v3405_v4, %s3685_s28  ;;  %v754_v4 = vld [vmem:[%s3884_s24 + $0xa8] sm:$0xff] }
 0x10f   : > { %v1202_v29 = vpop.permute.xlu1 %1201  ;;  %v1077_v30 = vpop.permute.xlu0 %1076 }
 0x110   : > { %v1408_v31 = vld [vmem:[#allocation2 + $0x18] sm:$0xff]  ;;  %1261 = vst.msk [vmem:[#allocation2 + $0x20] sm:$0xff] %vm1256_vm10, %v1202_v29  ;;  %v3389_v29 = vld [vmem:[%s3884_s24 + $0xa8] sm:$0x7f] }
 0x111   : > { %1135 = vst.msk [vmem:[#allocation2 + $0x29] sm:$0x7f] %vm1129_vm9, %v1077_v30  ;;  %3562 = vmatmul.mubr.msk.f32.gmra.mrb[2].mxu0 %vm233_vm1, %v1408_v31  ;;  %813 = vrot.lane.b32.xlu0 %v749_v1, %s3685_s28  ;;  %v480_v30 = vld [vmem:[%s3884_s24 + $0xa9] sm:$0x7f] }
 0x112   : > { %1346 = vrot.lane.b32.xlu1 %v3426_v28, %s3689_s17 }
 0x113   : > { %v1204_v10 = vpop.permute.xlu1 %1203  ;;  %v794_v34 = vpop.permute.xlu0 %793 }
 0x114   : > { %1262 = vst.msk [vmem:[#allocation2 + $0x28] sm:$0xff] %vm1256_vm10, %v1204_v10  ;;  %v3390_v10 = vld [vmem:[%s3884_s24 + $0xb0] sm:$0x7f] }
 0x115   : > { %860 = vst.msk [vmem:[#allocation2 + $0x30] sm:$0xff] %vm853_vm7, %v794_v34  ;;  %815 = vrot.lane.b32.xlu0 %v750_v32, %s3685_s28 }
 0x116   : > { %956 = vrot.lane.b32.xlu1 %v893_v33, %s3686_s29 }
 0x117   : > { %v939_v35 = vpop.permute.xlu1 %938  ;;  %v1329_v36 = vpop.permute.xlu0 %1328 }
 0x118   : > { %1005 = vst.msk [vmem:[#allocation2 + $0x30] sm:$0x7f] %vm998_vm8, %v939_v35  ;;  %v3411_v35 = vld [vmem:[%s3884_s24 + $0xb0] sm:$0xff] }
 0x119   : > { %1388 = vst.msk [vmem:[#allocation2 + $0x20] sm:$0x7f] %vm1383_vm11, %v1329_v36  ;;  %958 = vrot.lane.b32.xlu0 %v894_v3, %s3686_s29 }
 0x11a   : > { %960 = vrot.lane.b32.xlu1 %v895_v9, %s3686_s29  ;;  %v610_v9 = vld [vmem:[%s3884_s24 + $0xb0] sm:$0x7f] }
 0x11b   : > { %v1079_v39 = vpop.permute.xlu1 %1078  ;;  %v1331_v40 = vpop.permute.xlu0 %1330 }
 0x11c   : > { %1136 = vst.msk [vmem:[#allocation2 + $0x31] sm:$0x7f] %vm1129_vm9, %v1079_v39 }
 0x11d   : > { %1389 = vst.msk [vmem:[#allocation2 + $0x28] sm:$0x7f] %vm1383_vm11, %v1331_v40  ;;  %1094 = vrot.lane.b32.xlu0 %v3385_v37, %s3687_s30 }
 0x11e   : > { %672 = vrot.lane.b32.xlu1 %v606_v38, %s3684_s27  ;;  %v3431_v38 = vld [vmem:[%s3884_s24 + $0xa9] sm:$0x7f] }
 0x11f   : > { %v653_v6 = vpop.permute.xlu1 %652  ;;  %v651_v42 = vpop.permute.xlu0 %650 }
 0x120   : > { %v1409_v43 = vld [vmem:[#allocation2 + $0x20] sm:$0xff]  ;;  %717 = vst.msk [vmem:[#allocation2 + $0x41] sm:$0x7f] %vm708_vm6, %v653_v6  ;;  %716 = vst.msk [vmem:[#allocation2 + $0x39] sm:$0x7f] %vm708_vm6, %v651_v42 }
 0x121   : > { %3564 = vmatprep.mubr.msk.f32.mxu0 %vm233_vm1, %v1409_v43  ;;  %1096 = vrot.lane.b32.xlu0 %v3386_v41, %s3687_s30  ;;  %v3432_v41 = vld [vmem:[%s3884_s24 + $0xb1] sm:$0x7f] }
 0x122   : > { %1221 = vrot.lane.b32.xlu1 %v750_v32, %s3688_s10  ;;  %v900_v6 = vld [vmem:[%s3884_s24 + $0xb1] sm:$0x7f] }
 0x123   : > { %v655_v46 = vpop.permute.xlu1 %654  ;;  %v1206_v47 = vpop.permute.xlu0 %1205 }
 0x124   : > { %v1410_v48 = vld [vmem:[#allocation2 + $0x28] sm:$0xff]  ;;  %718 = vst.msk [vmem:[#allocation2 + $0x49] sm:$0x7f] %vm708_vm6, %v655_v46 }
 0x125   : > { %1263 = vst.msk [vmem:[#allocation2 + $0x30] sm:$0xff] %vm1256_vm10, %v1206_v47  ;;  %3565 = vmatmul.mubr.msk.f32.gmra.mrb[4].mxu0 %vm233_vm1, %v1410_v48  ;;  %674 = vrot.lane.b32.xlu0 %v607_v44, %s3684_s27  ;;  %v481_v44 = vld [vmem:[%s3884_s24 + $0xb1] sm:$0x7f] }
 0x126   : > { %817 = vrot.lane.b32.xlu1 %v751_v45, %s3685_s28 }
 0x127   : > { %v798_v12 = vpop.permute.xlu1 %797  ;;  %v796_v50 = vpop.permute.xlu0 %795 }
 0x128   : > { %862 = vst.msk [vmem:[#allocation2 + $0x40] sm:$0xff] %vm853_vm7, %v798_v12  ;;  %861 = vst.msk [vmem:[#allocation2 + $0x38] sm:$0xff] %vm853_vm7, %v796_v50  ;;  %v3412_v12 = vld [vmem:[%s3884_s24 + $0xb8] sm:$0xff] }
 0x129   : > { %1223 = vrot.lane.b32.xlu0 %v751_v45, %s3688_s10  ;;  %v3391_v45 = vld [vmem:[%s3884_s24 + $0xb8] sm:$0x7f] }
 0x12a   : > { %1348 = vrot.lane.b32.xlu1 %v3427_v49, %s3689_s17  ;;  %v611_v49 = vld [vmem:[%s3884_s24 + $0xb8] sm:$0x7f] }
 0x12b   : > { %v800_v5 = vpop.permute.xlu1 %799  ;;  %v1333_v52 = vpop.permute.xlu0 %1332 }
 0x12c   : > { %863 = vst.msk [vmem:[#allocation2 + $0x48] sm:$0xff] %vm853_vm7, %v800_v5  ;;  %v3433_v5 = vld [vmem:[%s3884_s24 + $0xb9] sm:$0x7f] }
 0x12d   : > { %1390 = vst.msk [vmem:[#allocation2 + $0x30] sm:$0x7f] %vm1383_vm11, %v1333_v52  ;;  %819 = vrot.lane.b32.xlu0 %v752_v51, %s3685_s28 }
 0x12e   : > { %962 = vrot.lane.b32.xlu1 %v896_v11, %s3686_s29 }
 0x12f   : > { %v943_v54 = vpop.permute.xlu1 %942  ;;  %v941_v55 = vpop.permute.xlu0 %940 }
 0x130   : > { %1007 = vst.msk [vmem:[#allocation2 + $0x40] sm:$0x7f] %vm998_vm8, %v943_v54  ;;  %1006 = vst.msk [vmem:[#allocation2 + $0x38] sm:$0x7f] %vm998_vm8, %v941_v55 }
 0x131   : > { %1350 = vrot.lane.b32.xlu0 %v3428_v53, %s3689_s17 }
 0x132   : > { %537 = vrot.lane.b32.xlu1 %v478_v20, %s3683_s26  ;;  %v901_v20 = vld [vmem:[%s3884_s24 + $0xb9] sm:$0x7f] }
 0x133   : > { %v1081_v57 = vpop.permute.xlu1 %1080  ;;  %v945_v58 = vpop.permute.xlu0 %944 }
 0x134   : > { %v1411_v59 = vld [vmem:[#allocation2 + $0x30] sm:$0xff]  ;;  %1137 = vst.msk [vmem:[#allocation2 + $0x41] sm:$0x7f] %vm1129_vm9, %v1081_v57 }
 0x135   : > { %1008 = vst.msk [vmem:[#allocation2 + $0x48] sm:$0x7f] %vm998_vm8, %v945_v58  ;;  %3567 = vmatprep.mubr.msk.f32.mxu0 %vm233_vm1, %v1411_v59  ;;  %964 = vrot.lane.b32.xlu0 %v897_v8, %s3686_s29 }
 0x136   : > { %1098 = vrot.lane.b32.xlu1 %v3387_v56, %s3687_s30 }
 0x137   : > { %v1083_v62 = vpop.permute.xlu1 %1082  ;;  %v657_v63 = vpop.permute.xlu0 %656  ;;  %v1412_v0 = vld [vmem:[#allocation2 + $0x38] sm:$0xff] }
 0x138   : > { %1138 = vst.msk [vmem:[#allocation2 + $0x49] sm:$0x7f] %vm1129_vm9, %v1083_v62  ;;  %3568 = vmatmul.mubr.msk.f32.gmra.mrb[6].mxu0 %vm233_vm1, %v1412_v0 }
 0x139   : > { %719 = vst.msk [vmem:[#allocation2 + $0x51] sm:$0x7f] %vm708_vm6, %v657_v63  ;;  %539 = vrot.lane.b32.xlu0 %v479_v60, %s3683_s26 }
 0x13a   : > { %676 = vrot.lane.b32.xlu1 %v608_v61, %s3684_s27 }
 0x13b   : > { %v659_v14 = vpop.permute.xlu1 %658  ;;  %v1208_v2 = vpop.permute.xlu0 %1207 }
 0x13c   : > { %720 = vst.msk [vmem:[#allocation2 + $0x59] sm:$0x7f] %vm708_vm6, %v659_v14 }
 0x13d   : > { %1264 = vst.msk [vmem:[#allocation2 + $0x40] sm:$0xff] %vm1256_vm10, %v1208_v2  ;;  %1100 = vrot.lane.b32.xlu0 %v3388_v13, %s3687_s30 }
 0x13e   : > { %1225 = vrot.lane.b32.xlu1 %v752_v51, %s3688_s10 }
 0x13f   : > { %v1210_v17 = vpop.permute.xlu1 %1209  ;;  %v802_v7 = vpop.permute.xlu0 %801 }
 0x140   : > { %1265 = vst.msk [vmem:[#allocation2 + $0x48] sm:$0xff] %vm1256_vm10, %v1210_v17 }
 0x141   : > { %864 = vst.msk [vmem:[#allocation2 + $0x50] sm:$0xff] %vm853_vm7, %v802_v7  ;;  %678 = vrot.lane.b32.xlu0 %v609_v15, %s3684_s27 }
 0x142   : > { %821 = vrot.lane.b32.xlu1 %v753_v16, %s3685_s28 }
 0x143   : > { %v804_v19 = vpop.permute.xlu1 %803  ;;  %v1335_v21 = vpop.permute.xlu0 %1334 }
 0x144   : > { %865 = vst.msk [vmem:[#allocation2 + $0x58] sm:$0xff] %vm853_vm7, %v804_v19 }
 0x145   : > { %1391 = vst.msk [vmem:[#allocation2 + $0x40] sm:$0x7f] %vm1383_vm11, %v1335_v21  ;;  %1227 = vrot.lane.b32.xlu0 %v753_v16, %s3688_s10 }
 0x146   : > { %1352 = vrot.lane.b32.xlu1 %v3429_v18, %s3689_s17 }
 0x147   : > { %v1337_v23 = vpop.permute.xlu1 %1336  ;;  %v947_v24 = vpop.permute.xlu0 %946 }
 0x148   : > { %1392 = vst.msk [vmem:[#allocation2 + $0x48] sm:$0x7f] %vm1383_vm11, %v1337_v23 }
 0x149   : > { %1009 = vst.msk [vmem:[#allocation2 + $0x50] sm:$0x7f] %vm998_vm8, %v947_v24  ;;  %823 = vrot.lane.b32.xlu0 %v754_v4, %s3685_s28 }
 0x14a   : > { %966 = vrot.lane.b32.xlu1 %v898_v22, %s3686_s29 }
 0x14b   : > { %v1085_v27 = vpop.permute.xlu1 %1084  ;;  %v949_v1 = vpop.permute.xlu0 %948 }
 0x14c   : > { %v1413_v28 = vld [vmem:[#allocation2 + $0x40] sm:$0xff]  ;;  %1139 = vst.msk [vmem:[#allocation2 + $0x51] sm:$0x7f] %vm1129_vm9, %v1085_v27 }
 0x14d   : > { %1010 = vst.msk [vmem:[#allocation2 + $0x58] sm:$0x7f] %vm998_vm8, %v949_v1  ;;  %3570 = vmatprep.mubr.msk.f32.mxu0 %vm233_vm1, %v1413_v28  ;;  %1354 = vrot.lane.b32.xlu0 %v3430_v25, %s3689_s17 }
 0x14e   : > { %968 = vrot.lane.b32.xlu1 %v899_v26, %s3686_s29 }
 0x14f   : > { %v1087_v31 = vpop.permute.xlu1 %1086  ;;  %v661_v32 = vpop.permute.xlu0 %660  ;;  %v1414_v33 = vld [vmem:[#allocation2 + $0x48] sm:$0xff] }
 0x150   : > { %1140 = vst.msk [vmem:[#allocation2 + $0x59] sm:$0x7f] %vm1129_vm9, %v1087_v31  ;;  %3571 = vmatmul.mubr.msk.f32.gmra.mrb[8].mxu0 %vm233_vm1, %v1414_v33 }
 0x151   : > { %721 = vst.msk [vmem:[#allocation2 + $0x61] sm:$0x7f] %vm708_vm6, %v661_v32  ;;  %1102 = vrot.lane.b32.xlu0 %v3389_v29, %s3687_s30 }
 0x152   : > { %541 = vrot.lane.b32.xlu1 %v480_v30, %s3683_s26 }
 0x153   : > { %v663_v34 = vpop.permute.xlu1 %662  ;;  %v1212_v3 = vpop.permute.xlu0 %1211 }
 0x154   : > { %722 = vst.msk [vmem:[#allocation2 + $0x69] sm:$0x7f] %vm708_vm6, %v663_v34 }
 0x155   : > { %1266 = vst.msk [vmem:[#allocation2 + $0x50] sm:$0xff] %vm1256_vm10, %v1212_v3  ;;  %1104 = vrot.lane.b32.xlu0 %v3390_v10, %s3687_s30 }
 0x156   : > { %1229 = vrot.lane.b32.xlu1 %v754_v4, %s3688_s10 }
 0x157   : > { %v1214_v36 = vpop.permute.xlu1 %1213  ;;  %v806_v37 = vpop.permute.xlu0 %805 }
 0x158   : > { %1267 = vst.msk [vmem:[#allocation2 + $0x58] sm:$0xff] %vm1256_vm10, %v1214_v36 }
 0x159   : > { %866 = vst.msk [vmem:[#allocation2 + $0x60] sm:$0xff] %vm853_vm7, %v806_v37  ;;  %680 = vrot.lane.b32.xlu0 %v610_v9, %s3684_s27 }
 0x15a   : > { %1231 = vrot.lane.b32.xlu1 %v3411_v35, %s3688_s10 }
 0x15b   : > { %v808_v39 = vpop.permute.xlu1 %807  ;;  %v1339_v40 = vpop.permute.xlu0 %1338 }
 0x15c   : > { %867 = vst.msk [vmem:[#allocation2 + $0x68] sm:$0xff] %vm853_vm7, %v808_v39 }
 0x15d   : > { %1393 = vst.msk [vmem:[#allocation2 + $0x50] sm:$0x7f] %vm1383_vm11, %v1339_v40  ;;  %1356 = vrot.lane.b32.xlu0 %v3431_v38, %s3689_s17 }
 0x15e   : > { %825 = vrot.lane.b32.xlu1 %v3411_v35, %s3685_s28 }
 0x15f   : > { %v1341_v42 = vpop.permute.xlu1 %1340  ;;  %v951_v43 = vpop.permute.xlu0 %950 }
 0x160   : > { %1394 = vst.msk [vmem:[#allocation2 + $0x58] sm:$0x7f] %vm1383_vm11, %v1341_v42 }
 0x161   : > { %1011 = vst.msk [vmem:[#allocation2 + $0x60] sm:$0x7f] %vm998_vm8, %v951_v43  ;;  %1358 = vrot.lane.b32.xlu0 %v3432_v41, %s3689_s17 }
 0x162   : > { %970 = vrot.lane.b32.xlu1 %v900_v6, %s3686_s29 }
 0x163   : > { %v953_v47 = vpop.permute.xlu0 %952  ;;  %v1089_v48 = vpop.permute.xlu1 %1088 }
 0x164   : > { %v1415_v46 = vld [vmem:[#allocation2 + $0x50] sm:$0xff]  ;;  %1012 = vst.msk [vmem:[#allocation2 + $0x68] sm:$0x7f] %vm998_vm8, %v953_v47 }
 0x165   : > { %3573 = vmatprep.mubr.msk.f32.mxu0 %vm233_vm1, %v1415_v46  ;;  %1141 = vst.msk [vmem:[#allocation2 + $0x61] sm:$0x7f] %vm1129_vm9, %v1089_v48  ;;  %543 = vrot.lane.b32.xlu0 %v481_v44, %s3683_s26  ;;  %v4587_v48 = vld [vmem:[%s5252_s2] ss:$0 sm:$0xff] }
 0x166   : > { %1106 = vrot.lane.b32.xlu1 %v3391_v45, %s3687_s30 }
 0x167   : > { %v1416_v50 = vld [vmem:[#allocation2 + $0x58] sm:$0xff]  ;;  %v665_v51 = vpop.permute.xlu0 %664  ;;  %v1091_v11 = vpop.permute.xlu1 %1090 }
 0x168   : > { %3574 = vmatmul.mubr.msk.f32.gmra.mrb[10].mxu0 %vm233_vm1, %v1416_v50  ;;  %723 = vst.msk [vmem:[#allocation2 + $0x71] sm:$0x7f] %vm708_vm6, %v665_v51 }
 0x169   : > { %1142 = vst.msk [vmem:[#allocation2 + $0x69] sm:$0x7f] %vm1129_vm9, %v1091_v11  ;;  %682 = vrot.lane.b32.xlu0 %v611_v49, %s3684_s27 }
 0x16a   : > { %1233 = vrot.lane.b32.xlu1 %v3412_v12, %s3688_s10 }
 0x16b   : > { %v1216_v52 = vpop.permute.xlu0 %1215 }
 0x16c   : > { %v810_v53 = vpop.permute.xlu1 %809  ;;  %1268 = vst.msk [vmem:[#allocation2 + $0x60] sm:$0xff] %vm1256_vm10, %v1216_v52 }
 0x16d   : > { %868 = vst.msk [vmem:[#allocation2 + $0x70] sm:$0xff] %vm853_vm7, %v810_v53  ;;  %827 = vrot.lane.b32.xlu0 %v3412_v12, %s3685_s28 }
 0x16e   : > { %1360 = vrot.lane.b32.xlu1 %v3433_v5, %s3689_s17 }
 0x16f   : > { %v1218_v54 = vpop.permute.xlu0 %1217 }
 0x170   : > { %v1343_v55 = vpop.permute.xlu1 %1342  ;;  %1269 = vst.msk [vmem:[#allocation2 + $0x68] sm:$0xff] %vm1256_vm10, %v1218_v54 }
 0x171   : > { %1395 = vst.msk [vmem:[#allocation2 + $0x60] sm:$0x7f] %vm1383_vm11, %v1343_v55  ;;  %972 = vrot.lane.b32.xlu0 %v901_v20, %s3686_s29 }
 0x173   : > { %v955_v8 = vpop.permute.xlu0 %954 }
 0x174   : > { %v1345_v56 = vpop.permute.xlu1 %1344  ;;  %1013 = vst.msk [vmem:[#allocation2 + $0x70] sm:$0x7f] %vm998_vm8, %v955_v8 }
 0x175   : > { %1396 = vst.msk [vmem:[#allocation2 + $0x68] sm:$0x7f] %vm1383_vm11, %v1345_v56 }
 0x177   : > { %v1093_v57 = vpop.permute.xlu0 %1092 }
 0x178   : > { %v667_v58 = vpop.permute.xlu1 %666  ;;  %v1417_v59 = vld [vmem:[#allocation2 + $0x60] sm:$0xff]  ;;  %1143 = vst.msk [vmem:[#allocation2 + $0x71] sm:$0x7f] %vm1129_vm9, %v1093_v57 }
 0x179   : > { %724 = vst.msk [vmem:[#allocation2 + $0x79] sm:$0x7f] %vm708_vm6, %v667_v58  ;;  %3576 = vmatprep.mubr.msk.f32.mxu0 %vm233_vm1, %v1417_v59 }
 0x17b   : > { %v669_v60 = vpop.permute.xlu0 %668 }
 0x17c   : > { %v1220_v61 = vpop.permute.xlu1 %1219  ;;  %v1418_v62 = vld [vmem:[#allocation2 + $0x68] sm:$0xff]  ;;  %725 = vst.msk [vmem:[#allocation2 + $0x81] sm:$0x7f] %vm708_vm6, %v669_v60 }
 0x17d   : > { %1270 = vst.msk [vmem:[#allocation2 + $0x70] sm:$0xff] %vm1256_vm10, %v1220_v61  ;;  %3577 = vmatmul.mubr.msk.f32.gmra.mrb[12].mxu0 %vm233_vm1, %v1418_v62 }
 0x17f   : > { %v671_v63 = vpop.permute.xlu0 %670 }
 0x180   : > { %v812_v0 = vpop.permute.xlu1 %811  ;;  %726 = vst.msk [vmem:[#allocation2 + $0x89] sm:$0x7f] %vm708_vm6, %v671_v63 }
 0x181   : > { %869 = vst.msk [vmem:[#allocation2 + $0x78] sm:$0xff] %vm853_vm7, %v812_v0 }
 0x183   : > { %v814_v13 = vpop.permute.xlu0 %813 }
 0x184   : > { %v1347_v14 = vpop.permute.xlu1 %1346  ;;  %870 = vst.msk [vmem:[#allocation2 + $0x80] sm:$0xff] %vm853_vm7, %v814_v13 }
 0x185   : > { %1397 = vst.msk [vmem:[#allocation2 + $0x70] sm:$0x7f] %vm1383_vm11, %v1347_v14 }
 0x187   : > { %v816_v2 = vpop.permute.xlu0 %815 }
 0x188   : > { %v957_v15 = vpop.permute.xlu1 %956  ;;  %871 = vst.msk [vmem:[#allocation2 + $0x88] sm:$0xff] %vm853_vm7, %v816_v2 }
 0x189   : > { %1014 = vst.msk [vmem:[#allocation2 + $0x78] sm:$0x7f] %vm998_vm8, %v957_v15 }
 0x18b   : > { %v959_v16 = vpop.permute.xlu0 %958 }
 0x18c   : > { %v961_v17 = vpop.permute.xlu1 %960  ;;  %v1419_v7 = vld [vmem:[#allocation2 + $0x70] sm:$0xff]  ;;  %1015 = vst.msk [vmem:[#allocation2 + $0x80] sm:$0x7f] %vm998_vm8, %v959_v16 }
 0x18d   : > { %1016 = vst.msk [vmem:[#allocation2 + $0x88] sm:$0x7f] %vm998_vm8, %v961_v17  ;;  %3579 = vmatprep.mubr.msk.f32.mxu0 %vm233_vm1, %v1419_v7 }
 0x18f   : > { %v1095_v18 = vpop.permute.xlu0 %1094 }
 0x190   : > { %v673_v19 = vpop.permute.xlu1 %672  ;;  %v1420_v21 = vld [vmem:[#allocation2 + $0x78] sm:$0xff]  ;;  %1144 = vst.msk [vmem:[#allocation2 + $0x81] sm:$0x7f] %vm1129_vm9, %v1095_v18 }
 0x191   : > { %727 = vst.msk [vmem:[#allocation2 + $0x91] sm:$0x7f] %vm708_vm6, %v673_v19  ;;  %3580 = vmatmul.mubr.msk.f32.gmra.mrb[14].mxu0 %vm233_vm1, %v1420_v21 }
 0x193   : > { %v1097_v4 = vpop.permute.xlu0 %1096 }
 0x194   : > { %v1222_v22 = vpop.permute.xlu1 %1221  ;;  %1145 = vst.msk [vmem:[#allocation2 + $0x89] sm:$0x7f] %vm1129_vm9, %v1097_v4 }
 0x195   : > { %1271 = vst.msk [vmem:[#allocation2 + $0x80] sm:$0xff] %vm1256_vm10, %v1222_v22 }
 0x197   : > { %v675_v23 = vpop.permute.xlu0 %674 }
 0x198   : > { %v818_v24 = vpop.permute.xlu1 %817  ;;  %728 = vst.msk [vmem:[#allocation2 + $0x99] sm:$0x7f] %vm708_vm6, %v675_v23 }
 0x199   : > { %872 = vst.msk [vmem:[#allocation2 + $0x90] sm:$0xff] %vm853_vm7, %v818_v24 }
 0x19b   : > { %v1224_v25 = vpop.permute.xlu0 %1223 }
 0x19c   : > { %v1349_v26 = vpop.permute.xlu1 %1348  ;;  %1272 = vst.msk [vmem:[#allocation2 + $0x88] sm:$0xff] %vm1256_vm10, %v1224_v25 }
 0x19d   : > { %1398 = vst.msk [vmem:[#allocation2 + $0x80] sm:$0x7f] %vm1383_vm11, %v1349_v26 }
 0x19f   : > { %v820_v27 = vpop.permute.xlu0 %819 }
 0x1a0   : > { %v963_v1 = vpop.permute.xlu1 %962  ;;  %873 = vst.msk [vmem:[#allocation2 + $0x98] sm:$0xff] %vm853_vm7, %v820_v27 }
 0x1a1   : > { %1017 = vst.msk [vmem:[#allocation2 + $0x90] sm:$0x7f] %vm998_vm8, %v963_v1 }
 0x1a3   : > { %v1351_v28 = vpop.permute.xlu0 %1350 }
 0x1a4   : > { %v538_v29 = vpop.permute.xlu1 %537  ;;  %v1421_v30 = vld [vmem:[#allocation2 + $0x80] sm:$0xff]  ;;  %1399 = vst.msk [vmem:[#allocation2 + $0x88] sm:$0x7f] %vm1383_vm11, %v1351_v28 }
 0x1a5   : > { %584 = vst.msk [vmem:[#allocation2 + $0xa0] sm:$0x7f] %vm566_vm5, %v538_v29  ;;  %3582 = vmatprep.mubr.msk.f32.mxu0 %vm233_vm1, %v1421_v30 }
 0x1a7   : > { %v965_v31 = vpop.permute.xlu0 %964 }
 0x1a8   : > { %v1099_v32 = vpop.permute.xlu1 %1098  ;;  %1018 = vst.msk [vmem:[#allocation2 + $0x98] sm:$0x7f] %vm998_vm8, %v965_v31 }
 0x1a9   : > { %1146 = vst.msk [vmem:[#allocation2 + $0x91] sm:$0x7f] %vm1129_vm9, %v1099_v32 }
 0x1ab   : > { %v540_v33 = vpop.permute.xlu0 %539  ;;  %v1422_v34 = vld [vmem:[#allocation2 + $0x88] sm:$0xff] }
 0x1ac   : > { %v677_v10 = vpop.permute.xlu1 %676  ;;  %585 = vst.msk [vmem:[#allocation2 + $0xa8] sm:$0x7f] %vm566_vm5, %v540_v33  ;;  %3583 = vmatmul.mubr.msk.f32.gmra.mrb[16].mxu0 %vm233_vm1, %v1422_v34 }
 0x1ad   : > { %729 = vst.msk [vmem:[#allocation2 + $0xa1] sm:$0x7f] %vm708_vm6, %v677_v10 }
 0x1af   : > { %v1101_v3 = vpop.permute.xlu0 %1100 }
 0x1b0   : > { %v1226_v9 = vpop.permute.xlu1 %1225  ;;  %1147 = vst.msk [vmem:[#allocation2 + $0x99] sm:$0x7f] %vm1129_vm9, %v1101_v3 }
 0x1b1   : > { %1273 = vst.msk [vmem:[#allocation2 + $0x90] sm:$0xff] %vm1256_vm10, %v1226_v9 }
 0x1b3   : > { %v679_v35 = vpop.permute.xlu0 %678 }
 0x1b4   : > { %v822_v36 = vpop.permute.xlu1 %821  ;;  %730 = vst.msk [vmem:[#allocation2 + $0xa9] sm:$0x7f] %vm708_vm6, %v679_v35 }
 0x1b5   : > { %874 = vst.msk [vmem:[#allocation2 + $0xa0] sm:$0xff] %vm853_vm7, %v822_v36 }
 0x1b7   : > { %v1228_v37 = vpop.permute.xlu0 %1227 }
 0x1b8   : > { %v1353_v38 = vpop.permute.xlu1 %1352  ;;  %1274 = vst.msk [vmem:[#allocation2 + $0x98] sm:$0xff] %vm1256_vm10, %v1228_v37 }
 0x1b9   : > { %1400 = vst.msk [vmem:[#allocation2 + $0x90] sm:$0x7f] %vm1383_vm11, %v1353_v38 }
 0x1bb   : > { %v824_v39 = vpop.permute.xlu0 %823 }
 0x1bc   : > { %v967_v40 = vpop.permute.xlu1 %966  ;;  %875 = vst.msk [vmem:[#allocation2 + $0xa8] sm:$0xff] %vm853_vm7, %v824_v39 }
 0x1bd   : > { %1019 = vst.msk [vmem:[#allocation2 + $0xa0] sm:$0x7f] %vm998_vm8, %v967_v40 }
 0x1bf   : > { %v1355_v41 = vpop.permute.xlu0 %1354 }
 0x1c0   : > { %v969_v6 = vpop.permute.xlu1 %968  ;;  %v1423_v42 = vld [vmem:[#allocation2 + $0x90] sm:$0xff]  ;;  %1401 = vst.msk [vmem:[#allocation2 + $0x98] sm:$0x7f] %vm1383_vm11, %v1355_v41 }
 0x1c1   : > { %1020 = vst.msk [vmem:[#allocation2 + $0xa8] sm:$0x7f] %vm998_vm8, %v969_v6  ;;  %3585 = vmatprep.mubr.msk.f32.mxu0 %vm233_vm1, %v1423_v42 }
 0x1c3   : > { %v1103_v43 = vpop.permute.xlu0 %1102 }
 0x1c4   : > { %v542_v44 = vpop.permute.xlu1 %541  ;;  %1148 = vst.msk [vmem:[#allocation2 + $0xa1] sm:$0x7f] %vm1129_vm9, %v1103_v43 }
 0x1c5   : > { %586 = vst.msk [vmem:[#allocation2 + $0xb0] sm:$0x7f] %vm566_vm5, %v542_v44 }
 0x1c7   : > { %v1105_v45 = vpop.permute.xlu0 %1104  ;;  %v1424_v47 = vld [vmem:[#allocation2 + $0x98] sm:$0xff] }
 0x1c8   : > { %v1230_v46 = vpop.permute.xlu1 %1229  ;;  %1149 = vst.msk [vmem:[#allocation2 + $0xa9] sm:$0x7f] %vm1129_vm9, %v1105_v45  ;;  %3586 = vmatmul.mubr.msk.f32.gmra.mrb[18].mxu0 %vm233_vm1, %v1424_v47 }
 0x1c9   : > { %1275 = vst.msk [vmem:[#allocation2 + $0xa0] sm:$0xff] %vm1256_vm10, %v1230_v46 }
 0x1cb   : > { %v681_v12 = vpop.permute.xlu0 %680 }
 0x1cc   : > { %v3560_v49 = vpop.f32.mrb[0].mxu0  ;;  %731 = vst.msk [vmem:[#allocation2 + $0xb1] sm:$0x7f] %vm708_vm6, %v681_v12  ;;  %v1232_v11 = vpop.permute.xlu1 %1231 }
 0x1cd   : > { %v1589_v50 = vadd.f32 %v3560_v49, %v4587_v48  ;;  %v1583_v51 = vpop.f32.mrb[1].mxu0  ;;  %1276 = vst.msk [vmem:[#allocation2 + $0xa8] sm:$0xff] %vm1256_vm10, %v1232_v11 }
 0x1ce   : > { %v1584_v5 = vadd.f32 %v4587_v48, %v1583_v51 }
 0x1cf   : > { %v1703_v52 = vmax.f32 %v1589_v50, 0.0  ;;  %v1357_v20 = vpop.permute.xlu0 %1356 }
 0x1d0   : > { %v1702_v53 = vmax.f32 %v1584_v5, 0.0  ;;  %1402 = vst.msk [vmem:[#allocation2 + $0xa0] sm:$0x7f] %vm1383_vm11, %v1357_v20  ;;  %v826_v54 = vpop.permute.xlu1 %825 }
 0x1d1   : > { %1728 = vst.msk [vmem:[#allocation3 + $0x8] sm:$0xff] %vm1726_vm12, %v1703_v52 }
 0x1d2   : > { %1727 = vst.msk [vmem:[#allocation3] sm:$0xff] %vm1726_vm12, %v1702_v53 }
 0x1d3   : > { %876 = vst.msk [vmem:[#allocation2 + $0xb0] sm:$0xff] %vm853_vm7, %v826_v54  ;;  %v1359_v55 = vpop.permute.xlu0 %1358 }
 0x1d4   : > { %1403 = vst.msk [vmem:[#allocation2 + $0xa8] sm:$0x7f] %vm1383_vm11, %v1359_v55  ;;  %v971_v8 = vpop.permute.xlu1 %970 }
 0x1d5   : > { %1021 = vst.msk [vmem:[#allocation2 + $0xb0] sm:$0x7f] %vm998_vm8, %v971_v8 }
 0x1d7   : > { %v544_v58 = vpop.permute.xlu0 %543  ;;  %v1425_v13 = vld [vmem:[#allocation2 + $0xa0] sm:$0xff] }
 0x1d8   : > { %v2102_v56 = vld [vmem:[#allocation3 + $0x8] sm:$0x7f]  ;;  %587 = vst.msk [vmem:[#allocation2 + $0xb8] sm:$0x7f] %vm566_vm5, %v544_v58  ;;  %v1107_v59 = vpop.permute.xlu1 %1106  ;;  %3588 = vmatprep.mubr.msk.f32.mxu0 %vm233_vm1, %v1425_v13 }
 0x1d9   : > { %v4599_v57 = vld [vmem:[#allocation3 + $0x8] sm:$0xff]  ;;  %2151 = vrot.lane.b32.xlu1 %v2102_v56, %s3684_s27  ;;  %1150 = vst.msk [vmem:[#allocation2 + $0xb1] sm:$0x7f] %vm1129_vm9, %v1107_v59  ;;  %v2101_v61 = vld [vmem:[#allocation3] sm:$0x7f] }
 0x1da   : > { %1893 = vrot.lane.b32.xlu0 %v4599_v57, %s3682_s25  ;;  %v1807_v60 = vld [vmem:[#allocation3 + $0x8] sm:$0x7f]  ;;  %v1806_v62 = vld [vmem:[#allocation3] sm:$0x7f] }
 0x1db   : > { %1829 = vst.msk [vmem:[#allocation4 + $0x11] sm:$0x7f] %vm312_vm2, %v1807_v60  ;;  %v1849_v63 = vld [vmem:[#allocation3] sm:$0xff]  ;;  %v683_v0 = vpop.permute.xlu0 %682  ;;  %1828 = vst.msk [vmem:[#allocation4 + $0x9] sm:$0x7f] %vm312_vm2, %v1806_v62  ;;  %v1426_v14 = vld [vmem:[#allocation2 + $0xa8] sm:$0xff] }
 0x1dc   : > { %732 = vst.msk [vmem:[#allocation2 + $0xb9] sm:$0x7f] %vm708_vm6, %v683_v0  ;;  %v1234_v2 = vpop.permute.xlu1 %1233  ;;  %3589 = vmatmul.mubr.msk.f32.gmra.mrb[20].mxu0 %vm233_vm1, %v1426_v14  ;;  %v1975_v15 = vld [vmem:[#allocation3 + $0x1] sm:$0x7f]  ;;  %v1976_v52 = vld [vmem:[#allocation3 + $0x9] sm:$0x7f] }
 0x1dd   : > { %1891 = vrot.lane.b32.xlu1 %v1849_v63, %s3682_s25  ;;  %1277 = vst.msk [vmem:[#allocation2 + $0xb0] sm:$0xff] %vm1256_vm10, %v1234_v2  ;;  %v2389_v37 = vld [vmem:[#allocation3 + $0x1] sm:$0x7f]  ;;  %v2534_v20 = vld [vmem:[#allocation3 + $0x8] sm:$0x7f] }
 0x1de   : > { %2149 = vrot.lane.b32.xlu0 %v2101_v61, %s3684_s27  ;;  %v2786_v0 = vld [vmem:[#allocation3 + $0x9] sm:$0x7f] }
 0x1df   : > { %v828_v16 = vpop.permute.xlu0 %827 }
 0x1e0   : > { %877 = vst.msk [vmem:[#allocation2 + $0xb8] sm:$0xff] %vm853_vm7, %v828_v16  ;;  %v1361_v17 = vpop.permute.xlu1 %1360 }
 0x1e1   : > { %2017 = vrot.lane.b32.xlu1 %v1975_v15, %s3683_s26  ;;  %1404 = vst.msk [vmem:[#allocation2 + $0xb0] sm:$0x7f] %vm1383_vm11, %v1361_v17 }
 0x1e3   : > { %v973_v18 = vpop.permute.xlu0 %972 }
 0x1e4   : > { %v3563_v7 = vpop.f32.mrb[2].mxu0  ;;  %1022 = vst.msk [vmem:[#allocation2 + $0xb8] sm:$0x7f] %vm998_vm8, %v973_v18 }
 0x1e5   : > { %v1599_v19 = vadd.f32 %v3563_v7, %v4587_v48  ;;  %v1593_v21 = vpop.f32.mrb[3].mxu0 }
 0x1e6   : > { %v1594_v4 = vadd.f32 %v4587_v48, %v1593_v21 }
 0x1e7   : > { %v1705_v22 = vmax.f32 %v1599_v19, 0.0 }
 0x1e8   : > { %v1704_v23 = vmax.f32 %v1594_v4, 0.0  ;;  %v1427_v31 = vld [vmem:[#allocation2 + $0xb0] sm:$0xff] }
 0x1e9   : > { %1730 = vst.msk [vmem:[#allocation3 + $0x18] sm:$0xff] %vm1726_vm12, %v1705_v22  ;;  %3591 = vmatprep.mubr.msk.f32.mxu0 %vm233_vm1, %v1427_v31  ;;  %v2938_v31 = vld [vmem:[%s5253_s3 + $0x10] sm:$0xff] }
 0x1ea   : > { %1729 = vst.msk [vmem:[#allocation3 + $0x10] sm:$0xff] %vm1726_vm12, %v1704_v23 }
 0x1eb   : > { %v1428_v10 = vld [vmem:[#allocation2 + $0xb8] sm:$0xff] }
 0x1ec   : > { %3592 = vmatmul.mubr.msk.f32.gmra.mrb[22].mxu0 %vm233_vm1, %v1428_v10 }
 0x1f0   : > { %v4622_v24 = vld [vmem:[#allocation3 + $0x18] sm:$0xff] }
 0x1f1   : > { %1897 = vrot.lane.b32.xlu0 %v4622_v24, %s3682_s25  ;;  %v4626_v25 = vld [vmem:[#allocation3 + $0x10] sm:$0xff]  ;;  %v1809_v26 = vld [vmem:[#allocation3 + $0x18] sm:$0x7f] }
 0x1f2   : > { %1895 = vrot.lane.b32.xlu1 %v4626_v25, %s3682_s25  ;;  %v1808_v27 = vld [vmem:[#allocation3 + $0x10] sm:$0x7f]  ;;  %1831 = vst.msk [vmem:[#allocation4 + $0x21] sm:$0x7f] %vm312_vm2, %v1809_v26  ;;  %v1978_v22 = vld [vmem:[#allocation3 + $0x19] sm:$0x7f] }
 0x1f3   : > { %1830 = vst.msk [vmem:[#allocation4 + $0x19] sm:$0x7f] %vm312_vm2, %v1808_v27  ;;  %v2103_v59 = vld [vmem:[#allocation3 + $0x10] sm:$0x7f]  ;;  %v2936_v27 = vld [vmem:[%s5253_s3] sm:$0xff] }
 0x1f4   : > { %v2391_v15 = vld [vmem:[#allocation3 + $0x11] sm:$0x7f] }
 0x1f5   : > { %v1977_v17 = vld [vmem:[#allocation3 + $0x11] sm:$0x7f] }
 0x1f6   : > { %v2535_v26 = vld [vmem:[#allocation3 + $0x10] sm:$0x7f] }
 0x1f8   : > { %v3566_v1 = vpop.f32.mrb[4].mxu0 }
 0x1f9   : > { %v1609_v28 = vadd.f32 %v3566_v1, %v4587_v48  ;;  %v1603_v29 = vpop.f32.mrb[5].mxu0  ;;  %v2937_v1 = vld [vmem:[%s5253_s3 + $0x8] sm:$0xff] }
 0x1fa   : > { %v1604_v30 = vadd.f32 %v4587_v48, %v1603_v29  ;;  %v2536_v29 = vld [vmem:[#allocation3 + $0x18] sm:$0x7f] }
 0x1fb   : > { %v1707_v32 = vmax.f32 %v1609_v28, 0.0  ;;  %v3648_v28 = vpack.c.bf16 %v2937_v1, %v2936_v27 }
 0x1fc   : > { %v1706_v33 = vmax.f32 %v1604_v30, 0.0  ;;  %v2104_v30 = vld [vmem:[#allocation3 + $0x18] sm:$0x7f] }
 0x1fd   : > { %1732 = vst.msk [vmem:[#allocation3 + $0x28] sm:$0xff] %vm1726_vm12, %v1707_v32  ;;  %3649 = vmatprep.subr.bf16.mxu1 %v3648_v28  ;;  %v2939_v32 = vld [vmem:[%s5253_s3 + $0x18] sm:$0xff] }
 0x1fe   : > { %1731 = vst.msk [vmem:[#allocation3 + $0x20] sm:$0xff] %vm1726_vm12, %v1706_v33  ;;  %3651 = vmatpush3.bf16.msra.mxu1 %v3648_v28  ;;  %v3652_v33 = vpack.c.bf16 %v2939_v32, %v2938_v31 }
 0x200   : > { %3653 = vmatprep.subr.bf16.mxu1 %v3652_v33 }
 0x202   : > { %3655 = vmatpush3.bf16.msra.mxu1 %v3652_v33 }
 0x204   : > { %v4638_v34 = vld [vmem:[#allocation3 + $0x28] sm:$0xff] }
 0x205   : > { %1901 = vrot.lane.b32.xlu0 %v4638_v34, %s3682_s25  ;;  %v4642_v3 = vld [vmem:[#allocation3 + $0x20] sm:$0xff]  ;;  %v1811_v9 = vld [vmem:[#allocation3 + $0x28] sm:$0x7f] }
 0x206   : > { %1899 = vrot.lane.b32.xlu1 %v4642_v3, %s3682_s25  ;;  %v1810_v35 = vld [vmem:[#allocation3 + $0x20] sm:$0x7f]  ;;  %1833 = vst.msk [vmem:[#allocation4 + $0x31] sm:$0x7f] %vm312_vm2, %v1811_v9 }
 0x207   : > { %1832 = vst.msk [vmem:[#allocation4 + $0x29] sm:$0x7f] %vm312_vm2, %v1810_v35  ;;  %v2105_v10 = vld [vmem:[#allocation3 + $0x20] sm:$0x7f] }
 0x208   : > { %v2940_v9 = vld [vmem:[%s5253_s3 + $0x20] sm:$0xf] }
 0x209   : > { %2293 = vrot.lane.b32.xlu0 %v1849_v63, %s3685_s28  ;;  %3602 = vmatprep.subr.msk.mxu1 %vm1513_vm3, %v2940_v9 }
 0x20a   : > { %3603 = vmatpush3.msk.msra.mxu1 %vm1513_vm3, %v2940_v9 }
 0x20b   : > { %v3569_v36 = vpop.f32.mrb[6].mxu0 }
 0x20c   : > { %v1619_v38 = vadd.f32 %v3569_v36, %v4587_v48  ;;  %v1613_v39 = vpop.f32.mrb[7].mxu0 }
 0x20d   : > { %2437 = vrot.lane.b32.xlu0 %v2389_v37, %s3686_s29  ;;  %v1614_v40 = vadd.f32 %v4587_v48, %v1613_v39  ;;  %v2787_v39 = vld [vmem:[#allocation3 + $0x11] sm:$0x7f] }
 0x20e   : > { %v1709_v41 = vmax.f32 %v1619_v38, 0.0 }
 0x20f   : > { %v1708_v6 = vmax.f32 %v1614_v40, 0.0 }
 0x210   : > { %1734 = vst.msk [vmem:[#allocation3 + $0x38] sm:$0xff] %vm1726_vm12, %v1709_v41 }
 0x211   : > { %1733 = vst.msk [vmem:[#allocation3 + $0x30] sm:$0xff] %vm1726_vm12, %v1708_v6 }
 0x218   : > { %v4654_v42 = vld [vmem:[#allocation3 + $0x30] sm:$0xff] }
 0x219   : > { %1903 = vrot.lane.b32.xlu1 %v4654_v42, %s3682_s25  ;;  %v1812_v43 = vld [vmem:[#allocation3 + $0x30] sm:$0x7f] }
 0x21a   : > { %1834 = vst.msk [vmem:[#allocation4 + $0x39] sm:$0x7f] %vm312_vm2, %v1812_v43  ;;  %v2788_v43 = vld [vmem:[#allocation3 + $0x19] sm:$0x7f] }
 0x223   : > { %v3572_v44 = vpop.f32.mrb[8].mxu0 }
 0x224   : > { %v1629_v45 = vadd.f32 %v3572_v44, %v4587_v48  ;;  %v1623_v46 = vpop.f32.mrb[9].mxu0 }
 0x225   : > { %v1624_v47 = vadd.f32 %v4587_v48, %v1623_v46  ;;  %v2393_v46 = vld [vmem:[#allocation3 + $0x21] sm:$0x7f] }
 0x226   : > { %v1711_v49 = vmax.f32 %v1629_v45, 0.0  ;;  %v2392_v45 = vld [vmem:[#allocation3 + $0x19] sm:$0x7f] }
 0x227   : > { %v1710_v12 = vmax.f32 %v1624_v47, 0.0  ;;  %v1979_v47 = vld [vmem:[#allocation3 + $0x21] sm:$0x7f] }
 0x228   : > { %1736 = vst.msk [vmem:[#allocation3 + $0x48] sm:$0xff] %vm1726_vm12, %v1711_v49  ;;  %v1980_v49 = vld [vmem:[#allocation3 + $0x29] sm:$0x7f] }
 0x229   : > { %1735 = vst.msk [vmem:[#allocation3 + $0x40] sm:$0xff] %vm1726_vm12, %v1710_v12  ;;  %v2537_v12 = vld [vmem:[#allocation3 + $0x20] sm:$0x7f] }
 0x22f   : > { %v4663_v50 = vld [vmem:[#allocation3 + $0x48] sm:$0xff] }
 0x230   : > { %v1814_v51 = vld [vmem:[#allocation3 + $0x48] sm:$0x7f]  ;;  %1907 = vrot.lane.b32.xlu1 %v4663_v50, %s3682_s25  ;;  %v4667_v11 = vld [vmem:[#allocation3 + $0x40] sm:$0xff] }
 0x231   : > { %1836 = vst.msk [vmem:[#allocation4 + $0x51] sm:$0x7f] %vm312_vm2, %v1814_v51  ;;  %1905 = vrot.lane.b32.xlu0 %v4667_v11, %s3682_s25  ;;  %v1813_v5 = vld [vmem:[#allocation3 + $0x40] sm:$0x7f]  ;;  %v1983_v28 = vld [vmem:[#allocation3 + $0x49] sm:$0x7f] }
 0x232   : > { %1835 = vst.msk [vmem:[#allocation4 + $0x49] sm:$0x7f] %vm312_vm2, %v1813_v5  ;;  %v2538_v5 = vld [vmem:[#allocation3 + $0x28] sm:$0x7f] }
 0x233   : > { %v2541_v33 = vld [vmem:[#allocation3 + $0x48] sm:$0x7f] }
 0x234   : > { %2295 = vrot.lane.b32.xlu1 %v4599_v57, %s3685_s28 }
 0x238   : > { %2019 = vrot.lane.b32.xlu1 %v1976_v52, %s3683_s26  ;;  %v2106_v52 = vld [vmem:[#allocation3 + $0x28] sm:$0x7f] }
 0x23b   : > { %v3575_v53 = vpop.f32.mrb[10].mxu0 }
 0x23c   : > { %v1639_v54 = vadd.f32 %v3575_v53, %v4587_v48  ;;  %v1633_v55 = vpop.f32.mrb[11].mxu0  ;;  %2576 = vrot.lane.b32.xlu1 %v2534_v20, %s3687_s30 }
 0x23d   : > { %v1634_v8 = vadd.f32 %v4587_v48, %v1633_v55 }
 0x23e   : > { %v1713_v56 = vmax.f32 %v1639_v54, 0.0  ;;  %v2539_v54 = vld [vmem:[#allocation3 + $0x30] sm:$0x7f] }
 0x23f   : > { %v1712_v58 = vmax.f32 %v1634_v8, 0.0 }
 0x240   : > { %1738 = vst.msk [vmem:[#allocation3 + $0x58] sm:$0xff] %vm1726_vm12, %v1713_v56  ;;  %2153 = vrot.lane.b32.xlu1 %v2103_v59, %s3684_s27  ;;  %v2790_v56 = vld [vmem:[#allocation3 + $0x29] sm:$0x7f]  ;;  %v2789_v59 = vld [vmem:[#allocation3 + $0x21] sm:$0x7f] }
 0x241   : > { %1737 = vst.msk [vmem:[#allocation3 + $0x50] sm:$0xff] %vm1726_vm12, %v1712_v58 }
 0x244   : > { %2702 = vrot.lane.b32.xlu1 %v4599_v57, %s3688_s10  ;;  %v2390_v57 = vld [vmem:[#allocation3 + $0x9] sm:$0x7f] }
 0x247   : > { %v1816_v13 = vld [vmem:[#allocation3 + $0x58] sm:$0x7f] }
 0x248   : > { %2297 = vrot.lane.b32.xlu1 %v4626_v25, %s3685_s28  ;;  %v4686_v60 = vld [vmem:[#allocation3 + $0x50] sm:$0xff]  ;;  %1838 = vst.msk [vmem:[#allocation4 + $0x61] sm:$0x7f] %vm312_vm2, %v1816_v13 }
 0x249   : > { %1909 = vrot.lane.b32.xlu0 %v4686_v60, %s3682_s25  ;;  %v1815_v61 = vld [vmem:[#allocation3 + $0x50] sm:$0x7f] }
 0x24a   : > { %1837 = vst.msk [vmem:[#allocation4 + $0x59] sm:$0x7f] %vm312_vm2, %v1815_v61 }
 0x24b   : > { %v2152_v62 = vpop.permute.xlu1 %2151 }
 0x24c   : > { %v1894_v63 = vpop.permute.xlu0 %1893  ;;  %2828 = vrot.lane.b32.xlu1 %v2786_v0, %s3689_s17  ;;  %v2791_v0 = vld [vmem:[#allocation3 + $0x31] sm:$0x7f] }
 0x24d   : > { %1955 = vst.msk [vmem:[#allocation4 + $0x10] sm:$0xff] %vm439_vm4, %v1894_v63  ;;  %2439 = vrot.lane.b32.xlu0 %v2390_v57, %s3686_s29  ;;  %v2394_v57 = vld [vmem:[#allocation3 + $0x29] sm:$0x7f] }
 0x24f   : > { %v1892_v2 = vpop.permute.xlu1 %1891 }
 0x250   : > { %v2150_v14 = vpop.permute.xlu0 %2149  ;;  %1954 = vst.msk [vmem:[#allocation4 + $0x8] sm:$0xff] %vm439_vm4, %v1892_v2  ;;  %v3578_v16 = vpop.f32.mrb[12].mxu0  ;;  %2441 = vrot.lane.b32.xlu1 %v2391_v15, %s3686_s29  ;;  %v2107_v2 = vld [vmem:[#allocation3 + $0x30] sm:$0x7f] }
 0x251   : > { %2221 = vst.msk [vmem:[#allocation4 + $0x1] sm:$0x7f] %vm708_vm6, %v2150_v14  ;;  %v1649_v7 = vadd.f32 %v3578_v16, %v4587_v48  ;;  %v1643_v18 = vpop.f32.mrb[13].mxu0  ;;  %2021 = vrot.lane.b32.xlu0 %v1977_v17, %s3683_s26  ;;  %v2540_v14 = vld [vmem:[#allocation3 + $0x38] sm:$0x7f] }
 0x252   : > { %v1644_v19 = vadd.f32 %v4587_v48, %v1643_v18  ;;  %v2108_v16 = vld [vmem:[#allocation3 + $0x38] sm:$0x7f] }
 0x253   : > { %v2018_v21 = vpop.permute.xlu1 %2017  ;;  %v1715_v4 = vmax.f32 %v1649_v7, 0.0  ;;  %v2666_v18 = vld [vmem:[#allocation3 + $0x38] sm:$0xff] }
 0x254   : > { %2080 = vst.msk [vmem:[#allocation4 + $0x8] sm:$0x7f] %vm566_vm5, %v2018_v21  ;;  %v1714_v23 = vmax.f32 %v1644_v19, 0.0  ;;  %2023 = vrot.lane.b32.xlu1 %v1978_v22, %s3683_s26  ;;  %v2395_v19 = vld [vmem:[#allocation3 + $0x31] sm:$0x7f] }
 0x255   : > { %2222 = vst.msk [vmem:[#allocation4 + $0x9] sm:$0x7f] %vm708_vm6, %v2152_v62  ;;  %2578 = vrot.lane.b32.xlu0 %v2535_v26, %s3687_s30  ;;  %v2792_v21 = vld [vmem:[#allocation3 + $0x39] sm:$0x7f] }
 0x256   : > { %1740 = vst.msk [vmem:[#allocation3 + $0x68] sm:$0xff] %vm1726_vm12, %v1715_v4  ;;  %1739 = vst.msk [vmem:[#allocation3 + $0x60] sm:$0xff] %vm1726_vm12, %v1714_v23  ;;  %v2396_v4 = vld [vmem:[#allocation3 + $0x39] sm:$0x7f]  ;;  %v1982_v23 = vld [vmem:[#allocation3 + $0x41] sm:$0x7f] }
 0x258   : > { %2580 = vrot.lane.b32.xlu1 %v2536_v29, %s3687_s30 }
 0x259   : > { %2155 = vrot.lane.b32.xlu0 %v2104_v30, %s3684_s27  ;;  %v2109_v30 = vld [vmem:[#allocation3 + $0x40] sm:$0x7f] }
 0x25c   : > { %2157 = vrot.lane.b32.xlu1 %v2105_v10, %s3684_s27  ;;  %v2110_v10 = vld [vmem:[#allocation3 + $0x48] sm:$0x7f] }
 0x25d   : > { %2704 = vrot.lane.b32.xlu0 %v4626_v25, %s3688_s10  ;;  %v1817_v35 = vld [vmem:[#allocation3 + $0x60] sm:$0x7f]  ;;  %v1818_v36 = vld [vmem:[#allocation3 + $0x68] sm:$0x7f] }
 0x25e   : > { %1839 = vst.msk [vmem:[#allocation4 + $0x69] sm:$0x7f] %vm312_vm2, %v1817_v35  ;;  %1840 = vst.msk [vmem:[#allocation4 + $0x71] sm:$0x7f] %vm312_vm2, %v1818_v36  ;;  %v2111_v35 = vld [vmem:[#allocation3 + $0x50] sm:$0x7f] }
 0x260   : > { %2706 = vrot.lane.b32.xlu1 %v4622_v24, %s3688_s10 }
 0x261   : > { %2299 = vrot.lane.b32.xlu0 %v4622_v24, %s3685_s28 }
 0x263   : > { %v1898_v25 = vpop.permute.xlu0 %1897 }
 0x264   : > { %1957 = vst.msk [vmem:[#allocation4 + $0x20] sm:$0xff] %vm439_vm4, %v1898_v25  ;;  %v1896_v37 = vpop.permute.xlu1 %1895  ;;  %v3581_v38 = vpop.f32.mrb[14].mxu0  ;;  %2301 = vrot.lane.b32.xlu1 %v4642_v3, %s3685_s28 }
 0x265   : > { %1956 = vst.msk [vmem:[#allocation4 + $0x18] sm:$0xff] %vm439_vm4, %v1896_v37  ;;  %v1659_v40 = vadd.f32 %v3581_v38, %v4587_v48  ;;  %v1653_v41 = vpop.f32.mrb[15].mxu0  ;;  %2830 = vrot.lane.b32.xlu0 %v2787_v39, %s3689_s17 }
 0x266   : > { %v1654_v24 = vadd.f32 %v4587_v48, %v1653_v41 }
 0x267   : > { %v1717_v6 = vmax.f32 %v1659_v40, 0.0 }
 0x268   : > { %v1716_v44 = vmax.f32 %v1654_v24, 0.0  ;;  %2832 = vrot.lane.b32.xlu1 %v2788_v43, %s3689_s17 }
 0x269   : > { %1742 = vst.msk [vmem:[#allocation3 + $0x78] sm:$0xff] %vm1726_vm12, %v1717_v6  ;;  %2443 = vrot.lane.b32.xlu0 %v2392_v45, %s3686_s29  ;;  %v2793_v6 = vld [vmem:[#allocation3 + $0x49] sm:$0x7f] }
 0x26a   : > { %1741 = vst.msk [vmem:[#allocation3 + $0x70] sm:$0xff] %vm1726_vm12, %v1716_v44 }
 0x26c   : > { %2445 = vrot.lane.b32.xlu1 %v2393_v46, %s3686_s29 }
 0x26d   : > { %2025 = vrot.lane.b32.xlu0 %v1979_v47, %s3683_s26  ;;  %v2256_v47 = vld [vmem:[#allocation3 + $0x58] sm:$0xff] }
 0x270   : > { %2027 = vrot.lane.b32.xlu1 %v1980_v49, %s3683_s26  ;;  %v1984_v49 = vld [vmem:[#allocation3 + $0x51] sm:$0x7f] }
 0x271   : > { %2582 = vrot.lane.b32.xlu0 %v2537_v12, %s3687_s30  ;;  %v1819_v51 = vld [vmem:[#allocation3 + $0x70] sm:$0x7f] }
 0x272   : > { %1841 = vst.msk [vmem:[#allocation4 + $0x79] sm:$0x7f] %vm312_vm2, %v1819_v51 }
 0x274   : > { %2584 = vrot.lane.b32.xlu1 %v2538_v5, %s3687_s30  ;;  %v2794_v5 = vld [vmem:[#allocation3 + $0x51] sm:$0x7f] }
 0x275   : > { %2159 = vrot.lane.b32.xlu0 %v2106_v52, %s3684_s27  ;;  %v2542_v52 = vld [vmem:[#allocation3 + $0x50] sm:$0x7f] }
 0x277   : > { %v1902_v53 = vpop.permute.xlu0 %1901 }
 0x278   : > { %1959 = vst.msk [vmem:[#allocation4 + $0x30] sm:$0xff] %vm439_vm4, %v1902_v53  ;;  %v1900_v20 = vpop.permute.xlu1 %1899  ;;  %2586 = vrot.lane.b32.xlu1 %v2539_v54, %s3687_s30  ;;  %v1985_v54 = vld [vmem:[#allocation3 + $0x59] sm:$0x7f] }
 0x279   : > { %1958 = vst.msk [vmem:[#allocation4 + $0x28] sm:$0xff] %vm439_vm4, %v1900_v20  ;;  %2708 = vrot.lane.b32.xlu0 %v4642_v3, %s3688_s10 }
 0x27b   : > { %v2294_v55 = vpop.permute.xlu0 %2293 }
 0x27c   : > { %2365 = vst.msk [vmem:[#allocation4] sm:$0xff] %vm853_vm7, %v2294_v55  ;;  %2305 = vrot.lane.b32.xlu1 %v4654_v42, %s3685_s28  ;;  %v2112_v55 = vld [vmem:[#allocation3 + $0x58] sm:$0x7f] }
 0x27d   : > { %2303 = vrot.lane.b32.xlu0 %v4638_v34, %s3685_s28 }
 0x27f   : > { %v2438_v8 = vpop.permute.xlu0 %2437  ;;  %v3584_v58 = vpop.f32.mrb[16].mxu0 }
 0x280   : > { %2509 = vst.msk [vmem:[#allocation4] sm:$0x7f] %vm998_vm8, %v2438_v8  ;;  %2836 = vrot.lane.b32.xlu1 %v2790_v56, %s3689_s17  ;;  %v1669_v61 = vadd.f32 %v3584_v58, %v4587_v48  ;;  %v1663_v3 = vpop.f32.mrb[17].mxu0  ;;  %v2543_v58 = vld [vmem:[#allocation3 + $0x58] sm:$0x7f] }
 0x281   : > { %2834 = vrot.lane.b32.xlu0 %v2789_v59, %s3689_s17  ;;  %v1664_v62 = vadd.f32 %v4587_v48, %v1663_v3  ;;  %v2113_v59 = vld [vmem:[#allocation3 + $0x60] sm:$0x7f] }
 0x282   : > { %v1719_v63 = vmax.f32 %v1669_v61, 0.0 }
 0x283   : > { %v1718_v13 = vmax.f32 %v1664_v62, 0.0 }
 0x284   : > { %2838 = vrot.lane.b32.xlu1 %v2791_v0, %s3689_s17  ;;  %1744 = vst.msk [vmem:[#allocation3 + $0x88] sm:$0xff] %vm1726_vm12, %v1719_v63 }
 0x285   : > { %2447 = vrot.lane.b32.xlu0 %v2394_v57, %s3686_s29  ;;  %1743 = vst.msk [vmem:[#allocation3 + $0x80] sm:$0xff] %vm1726_vm12, %v1718_v13  ;;  %v2399_v57 = vld [vmem:[#allocation3 + $0x51] sm:$0x7f] }
 0x288   : > { %2588 = vrot.lane.b32.xlu1 %v2540_v14, %s3687_s30  ;;  %v2257_v14 = vld [vmem:[#allocation3 + $0x60] sm:$0xff] }
 0x289   : > { %2161 = vrot.lane.b32.xlu0 %v2107_v2, %s3684_s27 }
 0x28b   : > { %v1904_v15 = vpop.permute.xlu1 %1903  ;;  %v1821_v7 = vld [vmem:[#allocation3 + $0x88] sm:$0x7f] }
 0x28c   : > { %1960 = vst.msk [vmem:[#allocation4 + $0x38] sm:$0xff] %vm439_vm4, %v1904_v15  ;;  %2163 = vrot.lane.b32.xlu1 %v2108_v16, %s3684_s27  ;;  %v1820_v17 = vld [vmem:[#allocation3 + $0x80] sm:$0x7f] }
 0x28d   : > { %2710 = vrot.lane.b32.xlu0 %v4638_v34, %s3688_s10  ;;  %1842 = vst.msk [vmem:[#allocation4 + $0x89] sm:$0x7f] %vm312_vm2, %v1820_v17  ;;  %1843 = vst.msk [vmem:[#allocation4 + $0x91] sm:$0x7f] %vm312_vm2, %v1821_v7  ;;  %v1981_v34 = vld [vmem:[#allocation3 + $0x31] sm:$0x7f] }
 0x290   : > { %2714 = vrot.lane.b32.xlu1 %v2666_v18, %s3688_s10 }
 0x291   : > { %2712 = vrot.lane.b32.xlu0 %v4654_v42, %s3688_s10 }
 0x294   : > { %2307 = vrot.lane.b32.xlu1 %v2666_v18, %s3685_s28 }
 0x295   : > { %2449 = vrot.lane.b32.xlu0 %v2395_v19, %s3686_s29 }
 0x298   : > { %2840 = vrot.lane.b32.xlu1 %v2792_v21, %s3689_s17 }
 0x299   : > { %2029 = vrot.lane.b32.xlu0 %v1981_v34, %s3683_s26 }
 0x29b   : > { %v3587_v22 = vpop.f32.mrb[18].mxu0 }
 0x29c   : > { %2451 = vrot.lane.b32.xlu1 %v2396_v4, %s3686_s29  ;;  %v1679_v26 = vadd.f32 %v3587_v22, %v4587_v48  ;;  %v1673_v27 = vpop.f32.mrb[19].mxu0  ;;  %v2795_v4 = vld [vmem:[#allocation3 + $0x59] sm:$0x7f] }
 0x29d   : > { %2031 = vrot.lane.b32.xlu0 %v1982_v23, %s3683_s26  ;;  %v1674_v42 = vadd.f32 %v4587_v48, %v1673_v27  ;;  %v2400_v23 = vld [vmem:[#allocation3 + $0x59] sm:$0x7f]  ;;  %v2258_v27 = vld [vmem:[#allocation3 + $0x68] sm:$0xff] }
 0x29e   : > { %v1721_v1 = vmax.f32 %v1679_v26, 0.0 }
 0x29f   : > { %v1720_v29 = vmax.f32 %v1674_v42, 0.0  ;;  %v1986_v42 = vld [vmem:[#allocation3 + $0x61] sm:$0x7f] }
 0x2a0   : > { %2033 = vrot.lane.b32.xlu1 %v1983_v28, %s3683_s26  ;;  %1746 = vst.msk [vmem:[#allocation3 + $0x98] sm:$0xff] %vm1726_vm12, %v1721_v1 }
 0x2a1   : > { %2165 = vrot.lane.b32.xlu0 %v2109_v30, %s3684_s27  ;;  %1745 = vst.msk [vmem:[#allocation3 + $0x90] sm:$0xff] %vm1726_vm12, %v1720_v29  ;;  %v2796_v29 = vld [vmem:[#allocation3 + $0x61] sm:$0x7f] }
 0x2a2   : > { %v1908_v31 = vpop.permute.xlu1 %1907  ;;  %v2544_v30 = vld [vmem:[#allocation3 + $0x60] sm:$0x7f] }
 0x2a3   : > { %1962 = vst.msk [vmem:[#allocation4 + $0x50] sm:$0xff] %vm439_vm4, %v1908_v31  ;;  %v1906_v32 = vpop.permute.xlu0 %1905 }
 0x2a4   : > { %1961 = vst.msk [vmem:[#allocation4 + $0x48] sm:$0xff] %vm439_vm4, %v1906_v32  ;;  %2590 = vrot.lane.b32.xlu1 %v2541_v33, %s3687_s30  ;;  %v2402_v33 = vld [vmem:[#allocation3 + $0x69] sm:$0x7f] }
 0x2a5   : > { %2167 = vrot.lane.b32.xlu0 %v2110_v10, %s3684_s27 }
 0x2a6   : > { %v2296_v9 = vpop.permute.xlu1 %2295 }
 0x2a7   : > { %2366 = vst.msk [vmem:[#allocation4 + $0x8] sm:$0xff] %vm853_vm7, %v2296_v9  ;;  %v1823_v37 = vld [vmem:[#allocation3 + $0x98] sm:$0x7f]  ;;  %v2114_v9 = vld [vmem:[#allocation3 + $0x68] sm:$0x7f] }
 0x2a8   : > { %2169 = vrot.lane.b32.xlu1 %v2111_v35, %s3684_s27  ;;  %v1822_v25 = vld [vmem:[#allocation3 + $0x90] sm:$0x7f]  ;;  %1845 = vst.msk [vmem:[#allocation4 + $0xa1] sm:$0x7f] %vm312_vm2, %v1823_v37 }
 0x2a9   : > { %2309 = vrot.lane.b32.xlu0 %v4667_v11, %s3685_s28  ;;  %1844 = vst.msk [vmem:[#allocation4 + $0x99] sm:$0x7f] %vm312_vm2, %v1822_v25  ;;  %v2397_v11 = vld [vmem:[#allocation3 + $0x41] sm:$0x7f]  ;;  %v2115_v35 = vld [vmem:[#allocation3 + $0x70] sm:$0x7f] }
 0x2aa   : > { %v2020_v36 = vpop.permute.xlu1 %2019 }
 0x2ab   : > { %2081 = vst.msk [vmem:[#allocation4 + $0x10] sm:$0x7f] %vm566_vm5, %v2020_v36 }
 0x2ac   : > { %2716 = vrot.lane.b32.xlu1 %v4663_v50, %s3688_s10 }
 0x2ad   : > { %2311 = vrot.lane.b32.xlu0 %v4663_v50, %s3685_s28  ;;  %v2398_v50 = vld [vmem:[#allocation3 + $0x49] sm:$0x7f] }
 0x2ae   : > { %v2577_v38 = vpop.permute.xlu1 %2576 }
 0x2af   : > { %2639 = vst.msk [vmem:[#allocation4 + $0x1] sm:$0x7f] %vm1129_vm9, %v2577_v38  ;;  %v3590_v39 = vpop.f32.mrb[20].mxu0 }
 0x2b0   : > { %2313 = vrot.lane.b32.xlu1 %v4686_v60, %s3685_s28  ;;  %v1689_v41 = vadd.f32 %v3590_v39, %v4587_v48  ;;  %v1683_v24 = vpop.f32.mrb[21].mxu0  ;;  %v2672_v39 = vld [vmem:[#allocation3 + $0x70] sm:$0xff] }
 0x2b1   : > { %2453 = vrot.lane.b32.xlu0 %v2397_v11, %s3686_s29  ;;  %v1684_v43 = vadd.f32 %v4587_v48, %v1683_v24  ;;  %v2401_v24 = vld [vmem:[#allocation3 + $0x61] sm:$0x7f] }
 0x2b2   : > { %v2154_v40 = vpop.permute.xlu1 %2153  ;;  %v1723_v44 = vmax.f32 %v1689_v41, 0.0 }
 0x2b3   : > { %2223 = vst.msk [vmem:[#allocation4 + $0x11] sm:$0x7f] %vm708_vm6, %v2154_v40  ;;  %v1722_v45 = vmax.f32 %v1684_v43, 0.0 }
 0x2b4   : > { %2842 = vrot.lane.b32.xlu1 %v2793_v6, %s3689_s17  ;;  %1748 = vst.msk [vmem:[#allocation3 + $0xa8] sm:$0xff] %vm1726_vm12, %v1723_v44  ;;  %v1987_v44 = vld [vmem:[#allocation3 + $0x69] sm:$0x7f] }
 0x2b5   : > { %2455 = vrot.lane.b32.xlu0 %v2398_v50, %s3686_s29  ;;  %1747 = vst.msk [vmem:[#allocation3 + $0xa0] sm:$0xff] %vm1726_vm12, %v1722_v45 }
 0x2b6   : > { %v2703_v46 = vpop.permute.xlu1 %2702 }
 0x2b7   : > { %2765 = vst.msk [vmem:[#allocation4] sm:$0xff] %vm1256_vm10, %v2703_v46 }
 0x2b8   : > { %2315 = vrot.lane.b32.xlu1 %v2256_v47, %s3685_s28 }
 0x2b9   : > { %2035 = vrot.lane.b32.xlu0 %v1984_v49, %s3683_s26  ;;  %v2545_v49 = vld [vmem:[#allocation3 + $0x68] sm:$0x7f] }
 0x2ba   : > { %v2298_v12 = vpop.permute.xlu1 %2297 }
 0x2bb   : > { %2367 = vst.msk [vmem:[#allocation4 + $0x10] sm:$0xff] %vm853_vm7, %v2298_v12  ;;  %v1910_v51 = vpop.permute.xlu0 %1909  ;;  %v1825_v13 = vld [vmem:[#allocation3 + $0xa8] sm:$0x7f] }
 0x2bc   : > { %1963 = vst.msk [vmem:[#allocation4 + $0x58] sm:$0xff] %vm439_vm4, %v1910_v51  ;;  %2844 = vrot.lane.b32.xlu1 %v2794_v5, %s3689_s17  ;;  %v1824_v63 = vld [vmem:[#allocation3 + $0xa0] sm:$0x7f]  ;;  %v1988_v5 = vld [vmem:[#allocation3 + $0x71] sm:$0x7f] }
 0x2bd   : > { %2592 = vrot.lane.b32.xlu0 %v2542_v52, %s3687_s30  ;;  %1846 = vst.msk [vmem:[#allocation4 + $0xa9] sm:$0x7f] %vm312_vm2, %v1824_v63  ;;  %1847 = vst.msk [vmem:[#allocation4 + $0xb1] sm:$0x7f] %vm312_vm2, %v1825_v13  ;;  %v2546_v52 = vld [vmem:[#allocation3 + $0x70] sm:$0x7f] }
 0x2be   : > { %v2829_v53 = vpop.permute.xlu1 %2828  ;;  %v2403_v63 = vld [vmem:[#allocation3 + $0x71] sm:$0x7f] }
 0x2bf   : > { %2891 = vst.msk [vmem:[#allocation4] sm:$0x7f] %vm1383_vm11, %v2829_v53  ;;  %v2440_v20 = vpop.permute.xlu0 %2439  ;;  %v3593_v16 = vpop.f32.mrb[22].mxu0  ;;  %v1989_v53 = vld [vmem:[#allocation3 + $0x81] sm:$0x7f] }
 0x2c0   : > { %2510 = vst.msk [vmem:[#allocation4 + $0x8] sm:$0x7f] %vm998_vm8, %v2440_v20  ;;  %2037 = vrot.lane.b32.xlu1 %v1985_v54, %s3683_s26  ;;  %v1699_v17 = vadd.f32 %v3593_v16, %v4587_v48  ;;  %v1693_v7 = vpop.f32.mrb[23].mxu0  ;;  %v2547_v16 = vld [vmem:[#allocation3 + $0x78] sm:$0x7f] }
 0x2c1   : > { %2171 = vrot.lane.b32.xlu0 %v2112_v55, %s3684_s27  ;;  %v1694_v18 = vadd.f32 %v4587_v48, %v1693_v7 }
 0x2c2   : > { %v2442_v8 = vpop.permute.xlu1 %2441  ;;  %v1725_v21 = vmax.f32 %v1699_v17, 0.0 }
 0x2c3   : > { %2511 = vst.msk [vmem:[#allocation4 + $0x10] sm:$0x7f] %vm998_vm8, %v2442_v8  ;;  %v2022_v56 = vpop.permute.xlu0 %2021  ;;  %v1724_v22 = vmax.f32 %v1694_v18, 0.0  ;;  %v2117_v8 = vld [vmem:[#allocation3 + $0x80] sm:$0x7f] }
 0x2c4   : > { %2082 = vst.msk [vmem:[#allocation4 + $0x18] sm:$0x7f] %vm566_vm5, %v2022_v56  ;;  %2594 = vrot.lane.b32.xlu1 %v2543_v58, %s3687_s30 }
 0x2c5   : > { %2718 = vrot.lane.b32.xlu0 %v4686_v60, %s3688_s10  ;;  %1750 = vst.msk [vmem:[#allocation3 + $0xb8] sm:$0xff] %vm1726_vm12, %v1725_v21  ;;  %1749 = vst.msk [vmem:[#allocation3 + $0xb0] sm:$0xff] %vm1726_vm12, %v1724_v22  ;;  %v2116_v21 = vld [vmem:[#allocation3 + $0x78] sm:$0x7f] }
 0x2c6   : > { %v2024_v61 = vpop.permute.xlu1 %2023  ;;  %v2912_v3 = vld [vmem:[#allocation4] sm:$0xff] }
 0x2c7   : > { %2083 = vst.msk [vmem:[#allocation4 + $0x20] sm:$0x7f] %vm566_vm5, %v2024_v61  ;;  %v2579_v62 = vpop.permute.xlu0 %2578  ;;  %3604 = vmatprep.mubr.msk.f32.mxu1 %vm233_vm1, %v2912_v3 }
 0x2c8   : > { %2640 = vst.msk [vmem:[#allocation4 + $0x9] sm:$0x7f] %vm1129_vm9, %v2579_v62  ;;  %2173 = vrot.lane.b32.xlu1 %v2113_v59, %s3684_s27  ;;  %v2797_v59 = vld [vmem:[#allocation3 + $0x69] sm:$0x7f] }
 0x2c9   : > { %1911 = vrot.lane.b32.xlu0 %v2256_v47, %s3682_s25  ;;  %v2118_v62 = vld [vmem:[#allocation3 + $0x88] sm:$0x7f] }
 0x2ca   : > { %v2581_v0 = vpop.permute.xlu1 %2580 }
 0x2cb   : > { %2641 = vst.msk [vmem:[#allocation4 + $0x11] sm:$0x7f] %vm1129_vm9, %v2581_v0  ;;  %v2156_v60 = vpop.permute.xlu0 %2155 }
 0x2cc   : > { %2224 = vst.msk [vmem:[#allocation4 + $0x19] sm:$0x7f] %vm708_vm6, %v2156_v60  ;;  %2720 = vrot.lane.b32.xlu1 %v2256_v47, %s3688_s10  ;;  %v1826_v6 = vld [vmem:[#allocation3 + $0xb0] sm:$0x7f]  ;;  %v2261_v60 = vld [vmem:[#allocation3 + $0x80] sm:$0xff] }
 0x2cd   : > { %2457 = vrot.lane.b32.xlu0 %v2399_v57, %s3686_s29  ;;  %1848 = vst.msk [vmem:[#allocation4 + $0xb9] sm:$0x7f] %vm312_vm2, %v1826_v6  ;;  %v2798_v47 = vld [vmem:[#allocation3 + $0x71] sm:$0x7f] }
 0x2ce   : > { %v2158_v2 = vpop.permute.xlu1 %2157 }
 0x2cf   : > { %2225 = vst.msk [vmem:[#allocation4 + $0x21] sm:$0x7f] %vm708_vm6, %v2158_v2  ;;  %v2705_v15 = vpop.permute.xlu0 %2704 }
 0x2d0   : > { %2766 = vst.msk [vmem:[#allocation4 + $0x8] sm:$0xff] %vm1256_vm10, %v2705_v15  ;;  %2317 = vrot.lane.b32.xlu1 %v2257_v14, %s3685_s28  ;;  %v4916_v15 = vld [vmem:[#allocation3 + $0x88] sm:$0xff] }
 0x2d1   : > { %1913 = vrot.lane.b32.xlu0 %v2257_v14, %s3682_s25 }
 0x2d2   : > { %v2707_v19 = vpop.permute.xlu1 %2706 }
 0x2d3   : > { %2767 = vst.msk [vmem:[#allocation4 + $0x10] sm:$0xff] %vm1256_vm10, %v2707_v19  ;;  %v2300_v34 = vpop.permute.xlu0 %2299  ;;  %v2404_v19 = vld [vmem:[#allocation3 + $0x79] sm:$0x7f] }
 0x2d4   : > { %2368 = vst.msk [vmem:[#allocation4 + $0x18] sm:$0xff] %vm853_vm7, %v2300_v34  ;;  %2846 = vrot.lane.b32.xlu1 %v2795_v4, %s3689_s17  ;;  %v4929_v34 = vld [vmem:[#allocation3 + $0x90] sm:$0xff] }
 0x2d5   : > { %2459 = vrot.lane.b32.xlu0 %v2400_v23, %s3686_s29 }
 0x2d6   : > { %v2302_v26 = vpop.permute.xlu1 %2301 }
 0x2d7   : > { %2369 = vst.msk [vmem:[#allocation4 + $0x20] sm:$0xff] %vm853_vm7, %v2302_v26  ;;  %v2831_v48 = vpop.permute.xlu0 %2830  ;;  %v2673_v26 = vld [vmem:[#allocation3 + $0x78] sm:$0xff] }
 0x2d8   : > { %2892 = vst.msk [vmem:[#allocation4 + $0x8] sm:$0x7f] %vm1383_vm11, %v2831_v48  ;;  %2319 = vrot.lane.b32.xlu1 %v2258_v27, %s3685_s28 }
 0x2d9   : > { %2039 = vrot.lane.b32.xlu0 %v1986_v42, %s3683_s26 }
 0x2da   : > { %v2833_v1 = vpop.permute.xlu1 %2832 }
 0x2db   : > { %2893 = vst.msk [vmem:[#allocation4 + $0x10] sm:$0x7f] %vm1383_vm11, %v2833_v1  ;;  %v2444_v28 = vpop.permute.xlu0 %2443  ;;  %v2406_v1 = vld [vmem:[#allocation3 + $0x89] sm:$0x7f] }
 0x2dc   : > { %2512 = vst.msk [vmem:[#allocation4 + $0x18] sm:$0x7f] %vm998_vm8, %v2444_v28  ;;  %2848 = vrot.lane.b32.xlu1 %v2796_v29, %s3689_s17  ;;  %v1991_v28 = vld [vmem:[#allocation3 + $0x91] sm:$0x7f] }
 0x2dd   : > { %2596 = vrot.lane.b32.xlu0 %v2544_v30, %s3687_s30 }
 0x2de   : > { %v2446_v31 = vpop.permute.xlu1 %2445 }
 0x2df   : > { %2513 = vst.msk [vmem:[#allocation4 + $0x20] sm:$0x7f] %vm998_vm8, %v2446_v31  ;;  %v2026_v32 = vpop.permute.xlu0 %2025  ;;  %v2913_v10 = vld [vmem:[#allocation4 + $0x8] sm:$0xff]  ;;  %v2799_v31 = vld [vmem:[#allocation3 + $0x79] sm:$0x7f] }
 0x2e0   : > { %2084 = vst.msk [vmem:[#allocation4 + $0x28] sm:$0x7f] %vm566_vm5, %v2026_v32  ;;  %2463 = vrot.lane.b32.xlu1 %v2402_v33, %s3686_s29  ;;  %3605 = vmatmul.mubr.msk.f32.vlgmr.msra.gmra.mrb[0].mxu1 %vm233_vm1, %v2913_v10  ;;  %v2549_v10 = vld [vmem:[#allocation3 + $0x90] sm:$0x7f] }
 0x2e1   : > { %2175 = vrot.lane.b32.xlu0 %v2114_v9, %s3684_s27 }
 0x2e2   : > { %v2028_v36 = vpop.permute.xlu1 %2027  ;;  %v2914_v25 = vld [vmem:[#allocation4 + $0x10] sm:$0xff] }
 0x2e3   : > { %2085 = vst.msk [vmem:[#allocation4 + $0x30] sm:$0x7f] %vm566_vm5, %v2028_v36  ;;  %v2583_v37 = vpop.permute.xlu0 %2582  ;;  %3607 = vmatprep.mubr.msk.f32.mxu1 %vm233_vm1, %v2914_v25  ;;  %v2120_v36 = vld [vmem:[#allocation3 + $0x98] sm:$0x7f]  ;;  %v2405_v25 = vld [vmem:[#allocation3 + $0x81] sm:$0x7f] }
 0x2e4   : > { %2642 = vst.msk [vmem:[#allocation4 + $0x19] sm:$0x7f] %vm1129_vm9, %v2583_v37  ;;  %2177 = vrot.lane.b32.xlu1 %v2115_v35, %s3684_s27 }
 0x2e5   : > { %2722 = vrot.lane.b32.xlu0 %v2257_v14, %s3688_s10 }
 0x2e6   : > { %v2585_v38 = vpop.permute.xlu1 %2584 }
 0x2e7   : > { %2643 = vst.msk [vmem:[#allocation4 + $0x21] sm:$0x7f] %vm1129_vm9, %v2585_v38  ;;  %v2160_v11 = vpop.permute.xlu0 %2159 }
 0x2e8   : > { %2226 = vst.msk [vmem:[#allocation4 + $0x29] sm:$0x7f] %vm708_vm6, %v2160_v11  ;;  %2724 = vrot.lane.b32.xlu1 %v2258_v27, %s3688_s10  ;;  %v1990_v11 = vld [vmem:[#allocation3 + $0x89] sm:$0x7f] }
 0x2e9   : > { %1915 = vrot.lane.b32.xlu0 %v2258_v27, %s3682_s25 }
 0x2ea   : > { %v2587_v40 = vpop.permute.xlu1 %2586 }
 0x2eb   : > { %v2709_v41 = vpop.permute.xlu0 %2708 }
 0x2ec   : > { %2768 = vst.msk [vmem:[#allocation4 + $0x18] sm:$0xff] %vm1256_vm10, %v2709_v41  ;;  %2726 = vrot.lane.b32.xlu1 %v2672_v39, %s3688_s10  ;;  %v4960_v41 = vld [vmem:[#allocation3 + $0x98] sm:$0xff] }
 0x2ed   : > { %2461 = vrot.lane.b32.xlu0 %v2401_v24, %s3686_s29  ;;  %v2548_v24 = vld [vmem:[#allocation3 + $0x88] sm:$0x7f] }
 0x2ee   : > { %v2306_v43 = vpop.permute.xlu1 %2305 }
 0x2ef   : > { %v2304_v50 = vpop.permute.xlu0 %2303 }
 0x2f0   : > { %2370 = vst.msk [vmem:[#allocation4 + $0x28] sm:$0xff] %vm853_vm7, %v2304_v50  ;;  %1917 = vrot.lane.b32.xlu1 %v2672_v39, %s3682_s25 }
 0x2f1   : > { %2041 = vrot.lane.b32.xlu0 %v1987_v44, %s3683_s26  ;;  %v2407_v44 = vld [vmem:[#allocation3 + $0x91] sm:$0x7f] }
 0x2f2   : > { %v2837_v45 = vpop.permute.xlu1 %2836 }
 0x2f3   : > { %v2835_v46 = vpop.permute.xlu0 %2834 }
 0x2f4   : > { %2894 = vst.msk [vmem:[#allocation4 + $0x18] sm:$0x7f] %vm1383_vm11, %v2835_v46  ;;  %2852 = vrot.lane.b32.xlu1 %v2798_v47, %s3689_s17  ;;  %v4970_v46 = vld [vmem:[#allocation3 + $0xa0] sm:$0xff] }
 0x2f5   : > { %2598 = vrot.lane.b32.xlu0 %v2545_v49, %s3687_s30 }
 0x2f6   : > { %v2839_v12 = vpop.permute.xlu1 %2838 }
 0x2f7   : > { %v2448_v51 = vpop.permute.xlu0 %2447 }
 0x2f8   : > { %2514 = vst.msk [vmem:[#allocation4 + $0x28] sm:$0x7f] %vm998_vm8, %v2448_v51  ;;  %2043 = vrot.lane.b32.xlu1 %v1988_v5, %s3683_s26  ;;  %v2408_v5 = vld [vmem:[#allocation3 + $0x99] sm:$0x7f] }
 0x2f9   : > { %2644 = vst.msk [vmem:[#allocation4 + $0x29] sm:$0x7f] %vm1129_vm9, %v2587_v40  ;;  %2600 = vrot.lane.b32.xlu0 %v2546_v52, %s3687_s30  ;;  %v1993_v52 = vld [vmem:[#allocation3 + $0xa1] sm:$0x7f] }
 0x2fa   : > { %v2589_v20 = vpop.permute.xlu1 %2588 }
 0x2fb   : > { %v2162_v54 = vpop.permute.xlu0 %2161  ;;  %v2915_v55 = vld [vmem:[#allocation4 + $0x18] sm:$0xff] }
 0x2fc   : > { %2227 = vst.msk [vmem:[#allocation4 + $0x31] sm:$0x7f] %vm708_vm6, %v2162_v54  ;;  %2045 = vrot.lane.b32.xlu1 %v1989_v53, %s3683_s26  ;;  %3608 = vmatmul.mubr.msk.f32.gmra.mrb[2].mxu1 %vm233_vm1, %v2915_v55  ;;  %v2800_v54 = vld [vmem:[#allocation3 + $0x89] sm:$0x7f]  ;;  %v2551_v55 = vld [vmem:[#allocation3 + $0xa0] sm:$0x7f] }
 0x2fd   : > { %2371 = vst.msk [vmem:[#allocation4 + $0x30] sm:$0xff] %vm853_vm7, %v2306_v43  ;;  %2321 = vrot.lane.b32.xlu0 %v2672_v39, %s3685_s28 }
 0x2fe   : > { %v2164_v56 = vpop.permute.xlu1 %2163 }
 0x2ff   : > { %v2711_v58 = vpop.permute.xlu0 %2710 }
 0x300   : > { %2769 = vst.msk [vmem:[#allocation4 + $0x20] sm:$0xff] %vm1256_vm10, %v2711_v58  ;;  %2181 = vrot.lane.b32.xlu1 %v2117_v8, %s3684_s27 }
 0x301   : > { %2895 = vst.msk [vmem:[#allocation4 + $0x20] sm:$0x7f] %vm1383_vm11, %v2837_v45  ;;  %2850 = vrot.lane.b32.xlu0 %v2797_v59, %s3689_s17  ;;  %v2119_v45 = vld [vmem:[#allocation3 + $0x90] sm:$0x7f]  ;;  %v2122_v59 = vld [vmem:[#allocation3 + $0xa8] sm:$0x7f] }
 0x302   : > { %v2715_v61 = vpop.permute.xlu1 %2714 }
 0x303   : > { %v2713_v3 = vpop.permute.xlu0 %2712 }
 0x304   : > { %2770 = vst.msk [vmem:[#allocation4 + $0x28] sm:$0xff] %vm1256_vm10, %v2713_v3  ;;  %2183 = vrot.lane.b32.xlu1 %v2118_v62, %s3684_s27  ;;  %v2801_v62 = vld [vmem:[#allocation3 + $0x91] sm:$0x7f] }
 0x305   : > { %2896 = vst.msk [vmem:[#allocation4 + $0x28] sm:$0x7f] %vm1383_vm11, %v2839_v12  ;;  %2465 = vrot.lane.b32.xlu0 %v2403_v63, %s3686_s29 }
 0x306   : > { %v2308_v0 = vpop.permute.xlu1 %2307 }
 0x307   : > { %v2450_v13 = vpop.permute.xlu0 %2449 }
 0x308   : > { %2515 = vst.msk [vmem:[#allocation4 + $0x30] sm:$0x7f] %vm998_vm8, %v2450_v13  ;;  %2325 = vrot.lane.b32.xlu1 %v2261_v60, %s3685_s28  ;;  %v2916_v57 = vld [vmem:[#allocation4 + $0x20] sm:$0xff]  ;;  %v1992_v13 = vld [vmem:[#allocation3 + $0x99] sm:$0x7f] }
 0x309   : > { %2645 = vst.msk [vmem:[#allocation4 + $0x31] sm:$0x7f] %vm1129_vm9, %v2589_v20  ;;  %1919 = vrot.lane.b32.xlu0 %v2261_v60, %s3682_s25  ;;  %3610 = vmatprep.mubr.msk.f32.mxu1 %vm233_vm1, %v2916_v57 }
 0x30a   : > { %2771 = vst.msk [vmem:[#allocation4 + $0x30] sm:$0xff] %vm1256_vm10, %v2715_v61  ;;  %v2841_v14 = vpop.permute.xlu1 %2840 }
 0x30b   : > { %2897 = vst.msk [vmem:[#allocation4 + $0x30] sm:$0x7f] %vm1383_vm11, %v2841_v14  ;;  %v2030_v2 = vpop.permute.xlu0 %2029  ;;  %v5004_v14 = vld [vmem:[#allocation3 + $0xa8] sm:$0xff] }
 0x30c   : > { %2086 = vst.msk [vmem:[#allocation4 + $0x38] sm:$0x7f] %vm566_vm5, %v2030_v2  ;;  %1921 = vrot.lane.b32.xlu1 %v4916_v15, %s3682_s25  ;;  %v2917_v17 = vld [vmem:[#allocation4 + $0x28] sm:$0xff]  ;;  %v2550_v2 = vld [vmem:[#allocation3 + $0x98] sm:$0x7f] }
 0x30d   : > { %2228 = vst.msk [vmem:[#allocation4 + $0x39] sm:$0x7f] %vm708_vm6, %v2164_v56  ;;  %2602 = vrot.lane.b32.xlu0 %v2547_v16, %s3687_s30  ;;  %3611 = vmatmul.mubr.msk.f32.gmra.mrb[4].mxu1 %vm233_vm1, %v2917_v17 }
 0x30e   : > { %2372 = vst.msk [vmem:[#allocation4 + $0x38] sm:$0xff] %vm853_vm7, %v2308_v0  ;;  %v2452_v7 = vpop.permute.xlu1 %2451 }
 0x30f   : > { %2516 = vst.msk [vmem:[#allocation4 + $0x38] sm:$0x7f] %vm998_vm8, %v2452_v7  ;;  %v2032_v18 = vpop.permute.xlu0 %2031  ;;  %v2409_v7 = vld [vmem:[#allocation3 + $0xa1] sm:$0x7f] }
 0x310   : > { %2087 = vst.msk [vmem:[#allocation4 + $0x48] sm:$0x7f] %vm566_vm5, %v2032_v18  ;;  %2467 = vrot.lane.b32.xlu1 %v2404_v19, %s3686_s29  ;;  %v2121_v18 = vld [vmem:[#allocation3 + $0xa0] sm:$0x7f] }
 0x311   : > { %2179 = vrot.lane.b32.xlu0 %v2116_v21, %s3684_s27 }
 0x312   : > { %v2034_v4 = vpop.permute.xlu1 %2033  ;;  %v2918_v22 = vld [vmem:[#allocation4 + $0x30] sm:$0xff] }
 0x313   : > { %2088 = vst.msk [vmem:[#allocation4 + $0x50] sm:$0x7f] %vm566_vm5, %v2034_v4  ;;  %v2166_v23 = vpop.permute.xlu0 %2165  ;;  %3613 = vmatprep.mubr.msk.f32.mxu1 %vm233_vm1, %v2918_v22 }
 0x314   : > { %2229 = vst.msk [vmem:[#allocation4 + $0x41] sm:$0x7f] %vm708_vm6, %v2166_v23  ;;  %1923 = vrot.lane.b32.xlu1 %v4929_v34, %s3682_s25  ;;  %v2552_v23 = vld [vmem:[#allocation3 + $0xa8] sm:$0x7f] }
 0x315   : > { %2728 = vrot.lane.b32.xlu0 %v2673_v26, %s3688_s10 }
 0x316   : > { %v2591_v48 = vpop.permute.xlu1 %2590  ;;  %v2919_v27 = vld [vmem:[#allocation4 + $0x38] sm:$0xff] }
 0x317   : > { %v2168_v42 = vpop.permute.xlu0 %2167  ;;  %3614 = vmatmul.mubr.msk.f32.gmra.mrb[6].mxu1 %vm233_vm1, %v2919_v27 }
 0x318   : > { %2230 = vst.msk [vmem:[#allocation4 + $0x49] sm:$0x7f] %vm708_vm6, %v2168_v42  ;;  %2471 = vrot.lane.b32.xlu1 %v2406_v1, %s3686_s29  ;;  %v2802_v42 = vld [vmem:[#allocation3 + $0x99] sm:$0x7f]  ;;  %v2267_v1 = vld [vmem:[#allocation3 + $0xb0] sm:$0xff] }
 0x319   : > { %2323 = vrot.lane.b32.xlu0 %v2673_v26, %s3685_s28  ;;  %v2553_v26 = vld [vmem:[#allocation3 + $0xb0] sm:$0x7f] }
 0x31a   : > { %v2170_v29 = vpop.permute.xlu1 %2169 }
 0x31b   : > { %2231 = vst.msk [vmem:[#allocation4 + $0x51] sm:$0x7f] %vm708_vm6, %v2170_v29  ;;  %v2310_v30 = vpop.permute.xlu0 %2309 }
 0x31c   : > { %2373 = vst.msk [vmem:[#allocation4 + $0x40] sm:$0xff] %vm853_vm7, %v2310_v30  ;;  %2049 = vrot.lane.b32.xlu1 %v1991_v28, %s3683_s26 }
 0x31d   : > { %2854 = vrot.lane.b32.xlu0 %v2799_v31, %s3689_s17 }
 0x31e   : > { %v2717_v32 = vpop.permute.xlu1 %2716 }
 0x31f   : > { %v2312_v33 = vpop.permute.xlu0 %2311 }
 0x320   : > { %2374 = vst.msk [vmem:[#allocation4 + $0x48] sm:$0xff] %vm853_vm7, %v2312_v33  ;;  %2606 = vrot.lane.b32.xlu1 %v2549_v10, %s3687_s30  ;;  %v2804_v33 = vld [vmem:[#allocation3 + $0xa9] sm:$0x7f]  ;;  %v2803_v10 = vld [vmem:[#allocation3 + $0xa1] sm:$0x7f] }
 0x321   : > { %2327 = vrot.lane.b32.xlu0 %v4916_v15, %s3685_s28 }
 0x322   : > { %v2314_v9 = vpop.permute.xlu1 %2313 }
 0x323   : > { %2375 = vst.msk [vmem:[#allocation4 + $0x50] sm:$0xff] %vm853_vm7, %v2314_v9  ;;  %v2454_v35 = vpop.permute.xlu0 %2453  ;;  %v2411_v9 = vld [vmem:[#allocation3 + $0xb1] sm:$0x7f] }
 0x324   : > { %2517 = vst.msk [vmem:[#allocation4 + $0x40] sm:$0x7f] %vm998_vm8, %v2454_v35  ;;  %2187 = vrot.lane.b32.xlu1 %v2120_v36, %s3684_s27 }
 0x325   : > { %2646 = vst.msk [vmem:[#allocation4 + $0x41] sm:$0x7f] %vm1129_vm9, %v2591_v48  ;;  %2469 = vrot.lane.b32.xlu0 %v2405_v25, %s3686_s29  ;;  %v2410_v25 = vld [vmem:[#allocation3 + $0xa9] sm:$0x7f] }
 0x326   : > { %2772 = vst.msk [vmem:[#allocation4 + $0x40] sm:$0xff] %vm1256_vm10, %v2717_v32  ;;  %v2843_v37 = vpop.permute.xlu1 %2842 }
 0x327   : > { %2898 = vst.msk [vmem:[#allocation4 + $0x40] sm:$0x7f] %vm1383_vm11, %v2843_v37  ;;  %v2456_v38 = vpop.permute.xlu0 %2455 }
 0x328   : > { %2518 = vst.msk [vmem:[#allocation4 + $0x48] sm:$0x7f] %vm998_vm8, %v2456_v38  ;;  %2732 = vrot.lane.b32.xlu1 %v4929_v34, %s3688_s10 }
 0x329   : > { %2047 = vrot.lane.b32.xlu0 %v1990_v11, %s3683_s26  ;;  %v1995_v11 = vld [vmem:[#allocation3 + $0xb1] sm:$0x7f] }
 0x32a   : > { %v2316_v39 = vpop.permute.xlu1 %2315 }
 0x32b   : > { %v2036_v40 = vpop.permute.xlu0 %2035 }
 0x32c   : > { %2089 = vst.msk [vmem:[#allocation4 + $0x58] sm:$0x7f] %vm566_vm5, %v2036_v40  ;;  %1925 = vrot.lane.b32.xlu1 %v4960_v41, %s3682_s25 }
 0x32d   : > { %2604 = vrot.lane.b32.xlu0 %v2548_v24, %s3687_s30  ;;  %v2124_v24 = vld [vmem:[#allocation3 + $0xb8] sm:$0x7f] }
 0x32e   : > { %v2845_v6 = vpop.permute.xlu1 %2844  ;;  %v2920_v43 = vld [vmem:[#allocation4 + $0x40] sm:$0xff] }
 0x32f   : > { %v2593_v50 = vpop.permute.xlu0 %2592  ;;  %3616 = vmatprep.mubr.msk.f32.mxu1 %vm233_vm1, %v2920_v43 }
 0x330   : > { %2647 = vst.msk [vmem:[#allocation4 + $0x49] sm:$0x7f] %vm1129_vm9, %v2593_v50  ;;  %2473 = vrot.lane.b32.xlu1 %v2407_v44, %s3686_s29  ;;  %v2268_v50 = vld [vmem:[#allocation3 + $0xb8] sm:$0xff] }
 0x331   : > { %2185 = vrot.lane.b32.xlu0 %v2119_v45, %s3684_s27 }
 0x332   : > { %v2038_v47 = vpop.permute.xlu1 %2037 }
 0x333   : > { %v2172_v49 = vpop.permute.xlu0 %2171 }
 0x334   : > { %2232 = vst.msk [vmem:[#allocation4 + $0x59] sm:$0x7f] %vm708_vm6, %v2172_v49  ;;  %1927 = vrot.lane.b32.xlu1 %v4970_v46, %s3682_s25 }
 0x335   : > { %2376 = vst.msk [vmem:[#allocation4 + $0x58] sm:$0xff] %vm853_vm7, %v2316_v39  ;;  %2730 = vrot.lane.b32.xlu0 %v4916_v15, %s3688_s10  ;;  %v2123_v39 = vld [vmem:[#allocation3 + $0xb0] sm:$0x7f] }
 0x336   : > { %v2595_v12 = vpop.permute.xlu1 %2594 }
 0x337   : > { %v2719_v51 = vpop.permute.xlu0 %2718 }
 0x338   : > { %2773 = vst.msk [vmem:[#allocation4 + $0x48] sm:$0xff] %vm1256_vm10, %v2719_v51  ;;  %2475 = vrot.lane.b32.xlu1 %v2408_v5, %s3686_s29  ;;  %v2805_v51 = vld [vmem:[#allocation3 + $0xb1] sm:$0x7f] }
 0x339   : > { %2899 = vst.msk [vmem:[#allocation4 + $0x48] sm:$0x7f] %vm1383_vm11, %v2845_v6  ;;  %2329 = vrot.lane.b32.xlu0 %v4929_v34, %s3685_s28  ;;  %v1994_v34 = vld [vmem:[#allocation3 + $0xa9] sm:$0x7f] }
 0x33a   : > { %v2174_v53 = vpop.permute.xlu1 %2173 }
 0x33b   : > { %v1912_v20 = vpop.permute.xlu0 %1911 }
 0x33c   : > { %1964 = vst.msk [vmem:[#allocation4 + $0x60] sm:$0xff] %vm439_vm4, %v1912_v20  ;;  %2053 = vrot.lane.b32.xlu1 %v1993_v52, %s3683_s26  ;;  %v2554_v20 = vld [vmem:[#allocation3 + $0xb8] sm:$0x7f] }
 0x33d   : > { %2090 = vst.msk [vmem:[#allocation4 + $0x60] sm:$0x7f] %vm566_vm5, %v2038_v47  ;;  %2856 = vrot.lane.b32.xlu0 %v2800_v54, %s3689_s17 }
 0x33e   : > { %2233 = vst.msk [vmem:[#allocation4 + $0x61] sm:$0x7f] %vm708_vm6, %v2174_v53  ;;  %v2721_v8 = vpop.permute.xlu1 %2720 }
 0x33f   : > { %v2458_v56 = vpop.permute.xlu0 %2457 }
 0x340   : > { %2519 = vst.msk [vmem:[#allocation4 + $0x50] sm:$0x7f] %vm998_vm8, %v2458_v56  ;;  %2610 = vrot.lane.b32.xlu1 %v2551_v55, %s3687_s30  ;;  %v2921_v58 = vld [vmem:[#allocation4 + $0x48] sm:$0xff] }
 0x341   : > { %2648 = vst.msk [vmem:[#allocation4 + $0x51] sm:$0x7f] %vm1129_vm9, %v2595_v12  ;;  %2331 = vrot.lane.b32.xlu0 %v4960_v41, %s3685_s28  ;;  %3617 = vmatmul.mubr.msk.f32.gmra.mrb[8].mxu1 %vm233_vm1, %v2921_v58  ;;  %v2806_v58 = vld [vmem:[#allocation3 + $0xb9] sm:$0x7f] }
 0x342   : > { %2774 = vst.msk [vmem:[#allocation4 + $0x50] sm:$0xff] %vm1256_vm10, %v2721_v8  ;;  %v2318_v61 = vpop.permute.xlu1 %2317 }
 0x343   : > { %2377 = vst.msk [vmem:[#allocation4 + $0x60] sm:$0xff] %vm853_vm7, %v2318_v61  ;;  %v1914_v3 = vpop.permute.xlu0 %1913 }
 0x344   : > { %1965 = vst.msk [vmem:[#allocation4 + $0x68] sm:$0xff] %vm439_vm4, %v1914_v3  ;;  %2191 = vrot.lane.b32.xlu1 %v2122_v59, %s3684_s27 }
 0x345   : > { %2858 = vrot.lane.b32.xlu0 %v2801_v62, %s3689_s17 }
 0x346   : > { %v2847_v63 = vpop.permute.xlu1 %2846 }
 0x347   : > { %2900 = vst.msk [vmem:[#allocation4 + $0x50] sm:$0x7f] %vm1383_vm11, %v2847_v63  ;;  %v2460_v0 = vpop.permute.xlu0 %2459 }
 0x348   : > { %2520 = vst.msk [vmem:[#allocation4 + $0x58] sm:$0x7f] %vm998_vm8, %v2460_v0  ;;  %2736 = vrot.lane.b32.xlu1 %v4970_v46, %s3688_s10 }
 0x349   : > { %2051 = vrot.lane.b32.xlu0 %v1992_v13, %s3683_s26 }
 0x34a   : > { %v2320_v60 = vpop.permute.xlu1 %2319 }
 0x34b   : > { %v2040_v57 = vpop.permute.xlu0 %2039 }
 0x34c   : > { %2091 = vst.msk [vmem:[#allocation4 + $0x68] sm:$0x7f] %vm566_vm5, %v2040_v57  ;;  %1929 = vrot.lane.b32.xlu1 %v5004_v14, %s3682_s25 }
 0x34d   : > { %2608 = vrot.lane.b32.xlu0 %v2550_v2, %s3687_s30 }
 0x34e   : > { %v2849_v15 = vpop.permute.xlu1 %2848  ;;  %v2922_v16 = vld [vmem:[#allocation4 + $0x50] sm:$0xff] }
 0x34f   : > { %v2597_v17 = vpop.permute.xlu0 %2596  ;;  %3619 = vmatprep.mubr.msk.f32.mxu1 %vm233_vm1, %v2922_v16 }
 0x350   : > { %2649 = vst.msk [vmem:[#allocation4 + $0x59] sm:$0x7f] %vm1129_vm9, %v2597_v17  ;;  %2477 = vrot.lane.b32.xlu1 %v2409_v7, %s3686_s29 }
 0x351   : > { %2189 = vrot.lane.b32.xlu0 %v2121_v18, %s3684_s27 }
 0x352   : > { %v2464_v19 = vpop.permute.xlu1 %2463 }
 0x353   : > { %v2176_v21 = vpop.permute.xlu0 %2175 }
 0x354   : > { %2234 = vst.msk [vmem:[#allocation4 + $0x69] sm:$0x7f] %vm708_vm6, %v2176_v21  ;;  %2055 = vrot.lane.b32.xlu1 %v1994_v34, %s3683_s26 }
 0x355   : > { %2378 = vst.msk [vmem:[#allocation4 + $0x68] sm:$0xff] %vm853_vm7, %v2320_v60  ;;  %2734 = vrot.lane.b32.xlu0 %v4960_v41, %s3688_s10 }
 0x356   : > { %2522 = vst.msk [vmem:[#allocation4 + $0x68] sm:$0x7f] %vm998_vm8, %v2464_v19  ;;  %v2178_v4 = vpop.permute.xlu1 %2177 }
 0x357   : > { %v2723_v22 = vpop.permute.xlu0 %2722 }
 0x358   : > { %2775 = vst.msk [vmem:[#allocation4 + $0x58] sm:$0xff] %vm1256_vm10, %v2723_v22  ;;  %2612 = vrot.lane.b32.xlu1 %v2552_v23, %s3687_s30 }
 0x359   : > { %2901 = vst.msk [vmem:[#allocation4 + $0x58] sm:$0x7f] %vm1383_vm11, %v2849_v15  ;;  %2333 = vrot.lane.b32.xlu0 %v4970_v46, %s3685_s28  ;;  %v2412_v46 = vld [vmem:[#allocation3 + $0xb9] sm:$0x7f] }
 0x35a   : > { %v2725_v48 = vpop.permute.xlu1 %2724 }
 0x35b   : > { %v1916_v27 = vpop.permute.xlu0 %1915 }
 0x35c   : > { %1966 = vst.msk [vmem:[#allocation4 + $0x70] sm:$0xff] %vm439_vm4, %v1916_v27  ;;  %2614 = vrot.lane.b32.xlu1 %v2553_v26, %s3687_s30  ;;  %v5099_v26 = vld [vmem:[%s5254_s4] ss:$0 sm:$0xff] }
 0x35d   : > { %2860 = vrot.lane.b32.xlu0 %v2802_v42, %s3689_s17  ;;  %v2942_v42 = vld [vmem:[%s3884_s24 + $0x8] sm:$0xff] }
 0x35e   : > { %v2727_v28 = vpop.permute.xlu1 %2726 }
 0x35f   : > { %v2462_v29 = vpop.permute.xlu0 %2461 }
 0x360   : > { %2521 = vst.msk [vmem:[#allocation4 + $0x60] sm:$0x7f] %vm998_vm8, %v2462_v29  ;;  %2337 = vrot.lane.b32.xlu1 %v2267_v1, %s3685_s28  ;;  %v2923_v30 = vld [vmem:[#allocation4 + $0x58] sm:$0xff]  ;;  %v2941_v29 = vld [vmem:[%s3884_s24] sm:$0xff] }
 0x361   : > { %2335 = vrot.lane.b32.xlu0 %v5004_v14, %s3685_s28  ;;  %3620 = vmatmul.mubr.msk.f32.gmra.mrb[10].mxu1 %vm233_vm1, %v2923_v30 }
 0x362   : > { %v1918_v31 = vpop.permute.xlu1 %1917 }
 0x363   : > { %1967 = vst.msk [vmem:[#allocation4 + $0x78] sm:$0xff] %vm439_vm4, %v1918_v31  ;;  %v2042_v32 = vpop.permute.xlu0 %2041 }
 0x364   : > { %2092 = vst.msk [vmem:[#allocation4 + $0x70] sm:$0x7f] %vm566_vm5, %v2042_v32  ;;  %2864 = vrot.lane.b32.xlu1 %v2804_v33, %s3689_s17 }
 0x365   : > { %2235 = vst.msk [vmem:[#allocation4 + $0x71] sm:$0x7f] %vm708_vm6, %v2178_v4  ;;  %2862 = vrot.lane.b32.xlu0 %v2803_v10, %s3689_s17 }
 0x366   : > { %v2853_v35 = vpop.permute.xlu1 %2852 }
 0x367   : > { %v2599_v36 = vpop.permute.xlu0 %2598 }
 0x368   : > { %2650 = vst.msk [vmem:[#allocation4 + $0x61] sm:$0x7f] %vm1129_vm9, %v2599_v36  ;;  %2481 = vrot.lane.b32.xlu1 %v2411_v9, %s3686_s29 }
 0x369   : > { %2776 = vst.msk [vmem:[#allocation4 + $0x60] sm:$0xff] %vm1256_vm10, %v2725_v48  ;;  %2479 = vrot.lane.b32.xlu0 %v2410_v25, %s3686_s29 }
 0x36a   : > { %v2044_v37 = vpop.permute.xlu1 %2043 }
 0x36b   : > { %2093 = vst.msk [vmem:[#allocation4 + $0x78] sm:$0x7f] %vm566_vm5, %v2044_v37  ;;  %v2601_v38 = vpop.permute.xlu0 %2600 }
 0x36c   : > { %2651 = vst.msk [vmem:[#allocation4 + $0x69] sm:$0x7f] %vm1129_vm9, %v2601_v38  ;;  %2057 = vrot.lane.b32.xlu1 %v1995_v11, %s3683_s26 }
 0x36d   : > { %2777 = vst.msk [vmem:[#allocation4 + $0x68] sm:$0xff] %vm1256_vm10, %v2727_v28  ;;  %2193 = vrot.lane.b32.xlu0 %v2123_v39, %s3684_s27 }
 0x36e   : > { %2903 = vst.msk [vmem:[#allocation4 + $0x68] sm:$0x7f] %vm1383_vm11, %v2853_v35  ;;  %v2046_v40 = vpop.permute.xlu1 %2045 }
 0x36f   : > { %v2322_v41 = vpop.permute.xlu0 %2321 }
 0x370   : > { %2379 = vst.msk [vmem:[#allocation4 + $0x70] sm:$0xff] %vm853_vm7, %v2322_v41  ;;  %2195 = vrot.lane.b32.xlu1 %v2124_v24, %s3684_s27 }
 0x371   : > { %2738 = vrot.lane.b32.xlu0 %v5004_v14, %s3688_s10 }
 0x372   : > { %v2182_v6 = vpop.permute.xlu1 %2181 }
 0x373   : > { %2237 = vst.msk [vmem:[#allocation4 + $0x81] sm:$0x7f] %vm708_vm6, %v2182_v6  ;;  %v2851_v43 = vpop.permute.xlu0 %2850 }
 0x374   : > { %2902 = vst.msk [vmem:[#allocation4 + $0x60] sm:$0x7f] %vm1383_vm11, %v2851_v43  ;;  %2339 = vrot.lane.b32.xlu1 %v2268_v50, %s3685_s28 }
 0x375   : > { %2740 = vrot.lane.b32.xlu0 %v2267_v1, %s3688_s10  ;;  %v2925_v5 = vld [vmem:[#allocation4 + $0x68] sm:$0xff] }
 0x376   : > { %v2184_v44 = vpop.permute.xlu1 %2183 }
 0x377   : > { %v2466_v45 = vpop.permute.xlu0 %2465 }
 0x378   : > { %2523 = vst.msk [vmem:[#allocation4 + $0x70] sm:$0x7f] %vm998_vm8, %v2466_v45  ;;  %2483 = vrot.lane.b32.xlu1 %v2412_v46, %s3686_s29  ;;  %s5113_s29 = scalar_lea.vmem %s5255_s5, %s3488_s21 }
 0x379   : > { %1931 = vrot.lane.b32.xlu0 %v2267_v1, %s3682_s25 }
 0x37a   : > { %v2326_v47 = vpop.permute.xlu1 %2325 }
 0x37b   : > { %2381 = vst.msk [vmem:[#allocation4 + $0x80] sm:$0xff] %vm853_vm7, %v2326_v47  ;;  %v1920_v49 = vpop.permute.xlu0 %1919  ;;  %v2924_v12 = vld [vmem:[#allocation4 + $0x60] sm:$0xff]  ;;  %v2944_v47 = vld [vmem:[%s3884_s24 + $0x18] sm:$0xff] }
 0x37c   : > { %1968 = vst.msk [vmem:[#allocation4 + $0x88] sm:$0xff] %vm439_vm4, %v1920_v49  ;;  %3622 = vmatprep.mubr.msk.f32.mxu1 %vm233_vm1, %v2924_v12 }
 0x37d   : > { %2094 = vst.msk [vmem:[#allocation4 + $0x88] sm:$0x7f] %vm566_vm5, %v2046_v40  ;;  %2866 = vrot.lane.b32.xlu0 %v2805_v51, %s3689_s17  ;;  %3623 = vmatmul.mubr.msk.f32.gmra.mrb[12].mxu1 %vm233_vm1, %v2925_v5  ;;  %v2943_v51 = vld [vmem:[%s3884_s24 + $0x10] sm:$0xff] }
 0x37e   : > { %2238 = vst.msk [vmem:[#allocation4 + $0x89] sm:$0x7f] %vm708_vm6, %v2184_v44  ;;  %v1922_v52 = vpop.permute.xlu1 %1921 }
 0x37f   : > { %1969 = vst.msk [vmem:[#allocation4 + $0x90] sm:$0xff] %vm439_vm4, %v1922_v52  ;;  %v2603_v53 = vpop.permute.xlu0 %2602 }
 0x380   : > { %2652 = vst.msk [vmem:[#allocation4 + $0x71] sm:$0x7f] %vm1129_vm9, %v2603_v53 }
 0x381   : > { %2616 = vrot.lane.b32.xlu0 %v2554_v20, %s3687_s30 }
 0x382   : > { %v2468_v54 = vpop.permute.xlu1 %2467 }
 0x383   : > { %v2180_v55 = vpop.permute.xlu0 %2179 }
 0x384   : > { %2236 = vst.msk [vmem:[#allocation4 + $0x79] sm:$0x7f] %vm708_vm6, %v2180_v55 }
 0x385   : > { %2742 = vrot.lane.b32.xlu0 %v2268_v50, %s3688_s10 }
 0x386   : > { %v1924_v8 = vpop.permute.xlu1 %1923 }
 0x387   : > { %1970 = vst.msk [vmem:[#allocation4 + $0x98] sm:$0xff] %vm439_vm4, %v1924_v8  ;;  %v2729_v56 = vpop.permute.xlu0 %2728 }
 0x388   : > { %2778 = vst.msk [vmem:[#allocation4 + $0x70] sm:$0xff] %vm1256_vm10, %v2729_v56 }
 0x389   : > { %2868 = vrot.lane.b32.xlu0 %v2806_v58, %s3689_s17 }
 0x38a   : > { %v2472_v59 = vpop.permute.xlu1 %2471 }
 0x38b   : > { %v2324_v61 = vpop.permute.xlu0 %2323 }
 0x38c   : > { %2380 = vst.msk [vmem:[#allocation4 + $0x78] sm:$0xff] %vm853_vm7, %v2324_v61 }
 0x38d   : > { %2524 = vst.msk [vmem:[#allocation4 + $0x78] sm:$0x7f] %vm998_vm8, %v2468_v54 }
 0x38e   : > { %v2050_v3 = vpop.permute.xlu1 %2049 }
 0x38f   : > { %2096 = vst.msk [vmem:[#allocation4 + $0x98] sm:$0x7f] %vm566_vm5, %v2050_v3  ;;  %v2855_v62 = vpop.permute.xlu0 %2854 }
 0x390   : > { %2904 = vst.msk [vmem:[#allocation4 + $0x70] sm:$0x7f] %vm1383_vm11, %v2855_v62 }
 0x392   : > { %v2607_v63 = vpop.permute.xlu1 %2606 }
 0x393   : > { %v2328_v0 = vpop.permute.xlu0 %2327 }
 0x394   : > { %2382 = vst.msk [vmem:[#allocation4 + $0x88] sm:$0xff] %vm853_vm7, %v2328_v0  ;;  %v2927_v14 = vld [vmem:[#allocation4 + $0x78] sm:$0xff] }
 0x395   : > { %2526 = vst.msk [vmem:[#allocation4 + $0x88] sm:$0x7f] %vm998_vm8, %v2472_v59 }
 0x396   : > { %2654 = vst.msk [vmem:[#allocation4 + $0x89] sm:$0x7f] %vm1129_vm9, %v2607_v63  ;;  %v2188_v13 = vpop.permute.xlu1 %2187 }
 0x397   : > { %2240 = vst.msk [vmem:[#allocation4 + $0x99] sm:$0x7f] %vm708_vm6, %v2188_v13  ;;  %v2470_v60 = vpop.permute.xlu0 %2469  ;;  %v2926_v57 = vld [vmem:[#allocation4 + $0x70] sm:$0xff] }
 0x398   : > { %2525 = vst.msk [vmem:[#allocation4 + $0x80] sm:$0x7f] %vm998_vm8, %v2470_v60  ;;  %3625 = vmatprep.mubr.msk.f32.mxu1 %vm233_vm1, %v2926_v57  ;;  %v2946_v60 = vld [vmem:[%s3884_s24 + $0x28] sm:$0xff] }
 0x399   : > { %3626 = vmatmul.mubr.msk.f32.gmra.mrb[14].mxu1 %vm233_vm1, %v2927_v14 }
 0x39a   : > { %v2733_v2 = vpop.permute.xlu1 %2732 }
 0x39b   : > { %2780 = vst.msk [vmem:[#allocation4 + $0x88] sm:$0xff] %vm1256_vm10, %v2733_v2  ;;  %v2048_v15 = vpop.permute.xlu0 %2047  ;;  %v2945_v2 = vld [vmem:[%s3884_s24 + $0x20] sm:$0xff] }
 0x39c   : > { %2095 = vst.msk [vmem:[#allocation4 + $0x90] sm:$0x7f] %vm566_vm5, %v2048_v15 }
 0x39e   : > { %v1926_v16 = vpop.permute.xlu1 %1925 }
 0x39f   : > { %1971 = vst.msk [vmem:[#allocation4 + $0xa0] sm:$0xff] %vm439_vm4, %v1926_v16  ;;  %v2605_v17 = vpop.permute.xlu0 %2604 }
 0x3a0   : > { %2653 = vst.msk [vmem:[#allocation4 + $0x81] sm:$0x7f] %vm1129_vm9, %v2605_v17 }
 0x3a2   : > { %v2474_v7 = vpop.permute.xlu1 %2473 }
 0x3a3   : > { %v2186_v18 = vpop.permute.xlu0 %2185 }
 0x3a4   : > { %2239 = vst.msk [vmem:[#allocation4 + $0x91] sm:$0x7f] %vm708_vm6, %v2186_v18 }
 0x3a6   : > { %v1928_v19 = vpop.permute.xlu1 %1927 }
 0x3a7   : > { %1972 = vst.msk [vmem:[#allocation4 + $0xa8] sm:$0xff] %vm439_vm4, %v1928_v19  ;;  %v2731_v21 = vpop.permute.xlu0 %2730 }
 0x3a8   : > { %2779 = vst.msk [vmem:[#allocation4 + $0x80] sm:$0xff] %vm1256_vm10, %v2731_v21 }
 0x3aa   : > { %v2476_v34 = vpop.permute.xlu1 %2475 }
 0x3ab   : > { %v2330_v4 = vpop.permute.xlu0 %2329 }
 0x3ac   : > { %2383 = vst.msk [vmem:[#allocation4 + $0x90] sm:$0xff] %vm853_vm7, %v2330_v4 }
 0x3ad   : > { %2527 = vst.msk [vmem:[#allocation4 + $0x90] sm:$0x7f] %vm998_vm8, %v2474_v7 }
 0x3ae   : > { %v2054_v22 = vpop.permute.xlu1 %2053 }
 0x3af   : > { %2098 = vst.msk [vmem:[#allocation4 + $0xa8] sm:$0x7f] %vm566_vm5, %v2054_v22  ;;  %v2857_v23 = vpop.permute.xlu0 %2856 }
 0x3b0   : > { %2905 = vst.msk [vmem:[#allocation4 + $0x80] sm:$0x7f] %vm1383_vm11, %v2857_v23  ;;  %v2948_v23 = vld [vmem:[%s3884_s24 + $0x38] sm:$0xff] }
 0x3b2   : > { %v2611_v48 = vpop.permute.xlu1 %2610 }
 0x3b3   : > { %v2332_v27 = vpop.permute.xlu0 %2331  ;;  %v3606_v1 = vpop.f32.mrb[0].mxu1 }
 0x3b4   : > { %2384 = vst.msk [vmem:[#allocation4 + $0x98] sm:$0xff] %vm853_vm7, %v2332_v27  ;;  %v3119_v28 = vadd.f32 %v3606_v1, %v5099_v26  ;;  %v3113_v30 = vpop.f32.mrb[1].mxu1  ;;  %v2947_v1 = vld [vmem:[%s3884_s24 + $0x30] sm:$0xff] }
 0x3b5   : > { %2528 = vst.msk [vmem:[#allocation4 + $0x98] sm:$0x7f] %vm998_vm8, %v2476_v34  ;;  %v3114_v31 = vadd.f32 %v5099_v26, %v3113_v30 }
 0x3b6   : > { %2656 = vst.msk [vmem:[#allocation4 + $0x99] sm:$0x7f] %vm1129_vm9, %v2611_v48  ;;  %v3233_v32 = vadd.f32 %v3119_v28, %v2942_v42  ;;  %v2192_v33 = vpop.permute.xlu1 %2191 }
 0x3b7   : > { %v3232_v10 = vadd.f32 %v3114_v31, %v2941_v29  ;;  %2242 = vst.msk [vmem:[#allocation4 + $0xa9] sm:$0x7f] %vm708_vm6, %v2192_v33  ;;  %v2859_v9 = vpop.permute.xlu0 %2858  ;;  %v2928_v35 = vld [vmem:[#allocation4 + $0x80] sm:$0xff] }
 0x3b8   : > { %v3257_v36 = vmax.f32 %v3233_v32, 0.0  ;;  %2906 = vst.msk [vmem:[#allocation4 + $0x88] sm:$0x7f] %vm1383_vm11, %v2859_v9  ;;  %3628 = vmatprep.mubr.msk.f32.mxu1 %vm233_vm1, %v2928_v35 }
 0x3b9   : > { %v3256_v25 = vmax.f32 %v3232_v10, 0.0 }
 0x3ba   : > { %3281 = vst.msk [vmem:[%s5113_s29 + $0x8] sm:$0xff] %vm1726_vm12, %v3257_v36  ;;  %v2737_v37 = vpop.permute.xlu1 %2736 }
 0x3bb   : > { %3280 = vst.msk [vmem:[%s5113_s29] sm:$0xff] %vm1726_vm12, %v3256_v25  ;;  %v2052_v38 = vpop.permute.xlu0 %2051 }
 0x3bc   : > { %2782 = vst.msk [vmem:[#allocation4 + $0x98] sm:$0xff] %vm1256_vm10, %v2737_v37 }
 0x3bd   : > { %2097 = vst.msk [vmem:[#allocation4 + $0xa0] sm:$0x7f] %vm566_vm5, %v2052_v38 }
 0x3be   : > { %v1930_v11 = vpop.permute.xlu1 %1929 }
 0x3bf   : > { %1973 = vst.msk [vmem:[#allocation4 + $0xb0] sm:$0xff] %vm439_vm4, %v1930_v11  ;;  %v2609_v39 = vpop.permute.xlu0 %2608  ;;  %v2929_v40 = vld [vmem:[#allocation4 + $0x88] sm:$0xff] }
 0x3c0   : > { %2655 = vst.msk [vmem:[#allocation4 + $0x91] sm:$0x7f] %vm1129_vm9, %v2609_v39  ;;  %3629 = vmatmul.mubr.msk.f32.gmra.mrb[16].mxu1 %vm233_vm1, %v2929_v40  ;;  %v2950_v40 = vld [vmem:[%s3884_s24 + $0x48] sm:$0xff] }
 0x3c2   : > { %v2478_v41 = vpop.permute.xlu1 %2477 }
 0x3c3   : > { %v2190_v24 = vpop.permute.xlu0 %2189 }
 0x3c4   : > { %2241 = vst.msk [vmem:[#allocation4 + $0xa1] sm:$0x7f] %vm708_vm6, %v2190_v24 }
 0x3c6   : > { %v2056_v6 = vpop.permute.xlu1 %2055 }
 0x3c7   : > { %2099 = vst.msk [vmem:[#allocation4 + $0xb0] sm:$0x7f] %vm566_vm5, %v2056_v6  ;;  %v2735_v43 = vpop.permute.xlu0 %2734  ;;  %v2949_v6 = vld [vmem:[%s3884_s24 + $0x40] sm:$0xff] }
 0x3c8   : > { %2781 = vst.msk [vmem:[#allocation4 + $0x90] sm:$0xff] %vm1256_vm10, %v2735_v43 }
 0x3ca   : > { %v2613_v50 = vpop.permute.xlu1 %2612 }
 0x3cb   : > { %v2334_v44 = vpop.permute.xlu0 %2333 }
 0x3cc   : > { %2385 = vst.msk [vmem:[#allocation4 + $0xa0] sm:$0xff] %vm853_vm7, %v2334_v44 }
 0x3cd   : > { %2529 = vst.msk [vmem:[#allocation4 + $0xa0] sm:$0x7f] %vm998_vm8, %v2478_v41 }
 0x3ce   : > { %2657 = vst.msk [vmem:[#allocation4 + $0xa1] sm:$0x7f] %vm1129_vm9, %v2613_v50  ;;  %v2615_v45 = vpop.permute.xlu1 %2614 }
 0x3cf   : > { %v2861_v46 = vpop.permute.xlu0 %2860  ;;  %v3609_v49 = vpop.f32.mrb[2].mxu1 }
 0x3d0   : > { %2907 = vst.msk [vmem:[#allocation4 + $0x90] sm:$0x7f] %vm1383_vm11, %v2861_v46  ;;  %v3129_v12 = vadd.f32 %v3609_v49, %v5099_v26  ;;  %v3123_v5 = vpop.f32.mrb[3].mxu1  ;;  %v2952_v49 = vld [vmem:[%s3884_s24 + $0x58] sm:$0xff] }
 0x3d1   : > { %v3124_v52 = vadd.f32 %v5099_v26, %v3123_v5  ;;  %v2951_v5 = vld [vmem:[%s3884_s24 + $0x50] sm:$0xff] }
 0x3d2   : > { %v3235_v53 = vadd.f32 %v3129_v12, %v2944_v47  ;;  %v2338_v20 = vpop.permute.xlu1 %2337 }
 0x3d3   : > { %v3234_v54 = vadd.f32 %v3124_v52, %v2943_v51  ;;  %v2336_v55 = vpop.permute.xlu0 %2335 }
 0x3d4   : > { %v3259_v8 = vmax.f32 %v3235_v53, 0.0  ;;  %2386 = vst.msk [vmem:[#allocation4 + $0xa8] sm:$0xff] %vm853_vm7, %v2336_v55 }
 0x3d5   : > { %v3258_v56 = vmax.f32 %v3234_v54, 0.0 }
 0x3d6   : > { %3283 = vst.msk [vmem:[%s5113_s29 + $0x18] sm:$0xff] %vm1726_vm12, %v3259_v8  ;;  %v2865_v58 = vpop.permute.xlu1 %2864 }
 0x3d7   : > { %3282 = vst.msk [vmem:[%s5113_s29 + $0x10] sm:$0xff] %vm1726_vm12, %v3258_v56  ;;  %v2863_v59 = vpop.permute.xlu0 %2862  ;;  %v2930_v61 = vld [vmem:[#allocation4 + $0x90] sm:$0xff]  ;;  %v2954_v56 = vld [vmem:[%s3884_s24 + $0x68] sm:$0xff] }
 0x3d8   : > { %2908 = vst.msk [vmem:[#allocation4 + $0x98] sm:$0x7f] %vm1383_vm11, %v2863_v59  ;;  %3631 = vmatprep.mubr.msk.f32.mxu1 %vm233_vm1, %v2930_v61  ;;  %v2953_v61 = vld [vmem:[%s3884_s24 + $0x60] sm:$0xff] }
 0x3da   : > { %v2482_v3 = vpop.permute.xlu1 %2481 }
 0x3db   : > { %v2480_v62 = vpop.permute.xlu0 %2479 }
 0x3dc   : > { %2530 = vst.msk [vmem:[#allocation4 + $0xa8] sm:$0x7f] %vm998_vm8, %v2480_v62 }
 0x3dd   : > { %2658 = vst.msk [vmem:[#allocation4 + $0xa9] sm:$0x7f] %vm1129_vm9, %v2615_v45 }
 0x3de   : > { %v2058_v63 = vpop.permute.xlu1 %2057 }
 0x3df   : > { %v2194_v0 = vpop.permute.xlu0 %2193  ;;  %v2931_v13 = vld [vmem:[#allocation4 + $0x98] sm:$0xff] }
 0x3e0   : > { %2243 = vst.msk [vmem:[#allocation4 + $0xb1] sm:$0x7f] %vm708_vm6, %v2194_v0  ;;  %v3612_v57 = vpop.f32.mrb[4].mxu1  ;;  %3632 = vmatmul.mubr.msk.f32.gmra.mrb[18].mxu1 %vm233_vm1, %v2931_v13 }
 0x3e1   : > { %2387 = vst.msk [vmem:[#allocation4 + $0xb0] sm:$0xff] %vm853_vm7, %v2338_v20  ;;  %v3139_v14 = vadd.f32 %v3612_v57, %v5099_v26  ;;  %v3133_v15 = vpop.f32.mrb[5].mxu1  ;;  %v2956_v57 = vld [vmem:[%s3884_s24 + $0x78] sm:$0xff] }
 0x3e2   : > { %2531 = vst.msk [vmem:[#allocation4 + $0xb0] sm:$0x7f] %vm998_vm8, %v2482_v3  ;;  %v3134_v16 = vadd.f32 %v5099_v26, %v3133_v15  ;;  %v2196_v7 = vpop.permute.xlu1 %2195  ;;  %v2955_v15 = vld [vmem:[%s3884_s24 + $0x70] sm:$0xff] }
 0x3e3   : > { %v3237_v17 = vadd.f32 %v3139_v14, %v2946_v60  ;;  %v2739_v18 = vpop.permute.xlu0 %2738 }
 0x3e4   : > { %v3236_v19 = vadd.f32 %v3134_v16, %v2945_v2  ;;  %2783 = vst.msk [vmem:[#allocation4 + $0xa0] sm:$0xff] %vm1256_vm10, %v2739_v18 }
 0x3e5   : > { %v3261_v21 = vmax.f32 %v3237_v17, 0.0  ;;  %2909 = vst.msk [vmem:[#allocation4 + $0xa0] sm:$0x7f] %vm1383_vm11, %v2865_v58 }
 0x3e6   : > { %v3260_v34 = vmax.f32 %v3236_v19, 0.0  ;;  %v2340_v22 = vpop.permute.xlu1 %2339 }
 0x3e7   : > { %3285 = vst.msk [vmem:[%s5113_s29 + $0x28] sm:$0xff] %vm1726_vm12, %v3261_v21  ;;  %v2741_v4 = vpop.permute.xlu0 %2740 }
 0x3e8   : > { %3284 = vst.msk [vmem:[%s5113_s29 + $0x20] sm:$0xff] %vm1726_vm12, %v3260_v34  ;;  %v2958_v34 = vld [vmem:[%s3884_s24 + $0x88] sm:$0xff] }
 0x3e9   : > { %2784 = vst.msk [vmem:[#allocation4 + $0xa8] sm:$0xff] %vm1256_vm10, %v2741_v4 }
 0x3ea   : > { %v3615_v48 = vpop.f32.mrb[6].mxu1  ;;  %v2484_v33 = vpop.permute.xlu1 %2483 }
 0x3eb   : > { %v3149_v27 = vadd.f32 %v3615_v48, %v5099_v26  ;;  %v1932_v42 = vpop.permute.xlu0 %1931  ;;  %v3143_v28 = vpop.f32.mrb[7].mxu1 }
 0x3ec   : > { %1974 = vst.msk [vmem:[#allocation4 + $0xb8] sm:$0xff] %vm439_vm4, %v1932_v42  ;;  %v3144_v29 = vadd.f32 %v5099_v26, %v3143_v28  ;;  %v2932_v30 = vld [vmem:[#allocation4 + $0xa0] sm:$0xff] }
 0x3ed   : > { %v3239_v31 = vadd.f32 %v3149_v27, %v2948_v23  ;;  %2100 = vst.msk [vmem:[#allocation4 + $0xb8] sm:$0x7f] %vm566_vm5, %v2058_v63  ;;  %3634 = vmatprep.mubr.msk.f32.mxu1 %vm233_vm1, %v2932_v30  ;;  %v2957_v23 = vld [vmem:[%s3884_s24 + $0x80] sm:$0xff]  ;;  %v2960_v30 = vld [vmem:[%s3884_s24 + $0x98] sm:$0xff] }
 0x3ee   : > { %2244 = vst.msk [vmem:[#allocation4 + $0xb9] sm:$0x7f] %vm708_vm6, %v2196_v7  ;;  %v3238_v32 = vadd.f32 %v3144_v29, %v2947_v1 }
 0x3ef   : > { %v3263_v10 = vmax.f32 %v3239_v31, 0.0  ;;  %2388 = vst.msk [vmem:[#allocation4 + $0xb8] sm:$0xff] %vm853_vm7, %v2340_v22  ;;  %v2867_v9 = vpop.permute.xlu0 %2866 }
 0x3f0   : > { %2532 = vst.msk [vmem:[#allocation4 + $0xb8] sm:$0x7f] %vm998_vm8, %v2484_v33  ;;  %v3262_v35 = vmax.f32 %v3238_v32, 0.0  ;;  %v2959_v33 = vld [vmem:[%s3884_s24 + $0x90] sm:$0xff] }
 0x3f1   : > { %2910 = vst.msk [vmem:[#allocation4 + $0xa8] sm:$0x7f] %vm1383_vm11, %v2867_v9 }
 0x3f2   : > { %3287 = vst.msk [vmem:[%s5113_s29 + $0x38] sm:$0xff] %vm1726_vm12, %v3263_v10  ;;  %3286 = vst.msk [vmem:[%s5113_s29 + $0x30] sm:$0xff] %vm1726_vm12, %v3262_v35 }
 0x3f3   : > { %v2617_v36 = vpop.permute.xlu0 %2616 }
 0x3f4   : > { %2659 = vst.msk [vmem:[#allocation4 + $0xb1] sm:$0x7f] %vm1129_vm9, %v2617_v36 }
 0x3f7   : > { %v2743_v25 = vpop.permute.xlu0 %2742  ;;  %v2935_v39 = vld [vmem:[#allocation4 + $0xb8] sm:$0xff] }
 0x3f8   : > { %v2933_v37 = vld [vmem:[#allocation4 + $0xa8] sm:$0xff]  ;;  %2785 = vst.msk [vmem:[#allocation4 + $0xb0] sm:$0xff] %vm1256_vm10, %v2743_v25 }
 0x3f9   : > { %3635 = vmatmul.mubr.msk.f32.gmra.mrb[20].mxu1 %vm233_vm1, %v2933_v37 }
 0x3fb   : > { %v2869_v38 = vpop.permute.xlu0 %2868 }
 0x3fc   : > { %2911 = vst.msk [vmem:[#allocation4 + $0xb0] sm:$0x7f] %vm1383_vm11, %v2869_v38  ;;  %v2962_v38 = vld [vmem:[%s3884_s24 + $0xa8] sm:$0xff] }
 0x403   : > { %v2934_v11 = vld [vmem:[#allocation4 + $0xb0] sm:$0xff] }
 0x404   : > { %3637 = vmatprep.mubr.msk.f32.mxu1 %vm233_vm1, %v2934_v11 }
 0x405   : > { %3638 = vmatmul.mubr.msk.f32.gmra.mrb[22].mxu1 %vm233_vm1, %v2935_v39 }
 0x414   : > { %v3618_v41 = vpop.f32.mrb[8].mxu1 }
 0x415   : > { %v3159_v24 = vadd.f32 %v3618_v41, %v5099_v26  ;;  %v3153_v43 = vpop.f32.mrb[9].mxu1 }
 0x416   : > { %v3154_v50 = vadd.f32 %v5099_v26, %v3153_v43 }
 0x417   : > { %v3241_v44 = vadd.f32 %v3159_v24, %v2950_v40  ;;  %v2961_v40 = vld [vmem:[%s3884_s24 + $0xa0] sm:$0xff] }
 0x418   : > { %v3240_v45 = vadd.f32 %v3154_v50, %v2949_v6 }
 0x419   : > { %v3265_v46 = vmax.f32 %v3241_v44, 0.0 }
 0x41a   : > { %v3264_v47 = vmax.f32 %v3240_v45, 0.0  ;;  %v2964_v45 = vld [vmem:[%s3884_s24 + $0xb8] sm:$0xff] }
 0x41b   : > { %3289 = vst.msk [vmem:[%s5113_s29 + $0x48] sm:$0xff] %vm1726_vm12, %v3265_v46 }
 0x41c   : > { %3288 = vst.msk [vmem:[%s5113_s29 + $0x40] sm:$0xff] %vm1726_vm12, %v3264_v47 }
 0x434   : > { %v3621_v12 = vpop.f32.mrb[10].mxu1 }
 0x435   : > { %v3169_v51 = vadd.f32 %v3621_v12, %v5099_v26  ;;  %v3163_v52 = vpop.f32.mrb[11].mxu1 }
 0x436   : > { %v3164_v53 = vadd.f32 %v5099_v26, %v3163_v52 }
 0x437   : > { %v3243_v20 = vadd.f32 %v3169_v51, %v2952_v49  ;;  %v2963_v49 = vld [vmem:[%s3884_s24 + $0xb0] sm:$0xff] }
 0x438   : > { %v3242_v54 = vadd.f32 %v3164_v53, %v2951_v5 }
 0x439   : > { %v3267_v55 = vmax.f32 %v3243_v20, 0.0 }
 0x43a   : > { %v3266_v8 = vmax.f32 %v3242_v54, 0.0 }
 0x43b   : > { %3291 = vst.msk [vmem:[%s5113_s29 + $0x58] sm:$0xff] %vm1726_vm12, %v3267_v55 }
 0x43c   : > { %3290 = vst.msk [vmem:[%s5113_s29 + $0x50] sm:$0xff] %vm1726_vm12, %v3266_v8 }
 0x450   : > { %v3624_v58 = vpop.f32.mrb[12].mxu1 }
 0x451   : > { %v3179_v59 = vadd.f32 %v3624_v58, %v5099_v26  ;;  %v3173_v3 = vpop.f32.mrb[13].mxu1 }
 0x452   : > { %v3174_v62 = vadd.f32 %v5099_v26, %v3173_v3 }
 0x453   : > { %v3245_v63 = vadd.f32 %v3179_v59, %v2954_v56 }
 0x454   : > { %v3244_v0 = vadd.f32 %v3174_v62, %v2953_v61 }
 0x455   : > { %v3269_v13 = vmax.f32 %v3245_v63, 0.0 }
 0x456   : > { %v3268_v60 = vmax.f32 %v3244_v0, 0.0 }
 0x457   : > { %3293 = vst.msk [vmem:[%s5113_s29 + $0x68] sm:$0xff] %vm1726_vm12, %v3269_v13 }
 0x458   : > { %3292 = vst.msk [vmem:[%s5113_s29 + $0x60] sm:$0xff] %vm1726_vm12, %v3268_v60 }
 0x46c   : > { %v3627_v14 = vpop.f32.mrb[14].mxu1 }
 0x46d   : > { %v3189_v2 = vadd.f32 %v3627_v14, %v5099_v26  ;;  %v3183_v16 = vpop.f32.mrb[15].mxu1 }
 0x46e   : > { %v3184_v17 = vadd.f32 %v5099_v26, %v3183_v16 }
 0x46f   : > { %v3247_v7 = vadd.f32 %v3189_v2, %v2956_v57 }
 0x470   : > { %v3246_v18 = vadd.f32 %v3184_v17, %v2955_v15 }
 0x471   : > { %v3271_v19 = vmax.f32 %v3247_v7, 0.0 }
 0x472   : > { %v3270_v21 = vmax.f32 %v3246_v18, 0.0 }
 0x473   : > { %3295 = vst.msk [vmem:[%s5113_s29 + $0x78] sm:$0xff] %vm1726_vm12, %v3271_v19 }
 0x474   : > { %3294 = vst.msk [vmem:[%s5113_s29 + $0x70] sm:$0xff] %vm1726_vm12, %v3270_v21 }
 0x493   : > { %v3630_v4 = vpop.f32.mrb[16].mxu1 }
 0x494   : > { %v3199_v22 = vadd.f32 %v3630_v4, %v5099_v26  ;;  %v3193_v48 = vpop.f32.mrb[17].mxu1 }
 0x495   : > { %v3194_v27 = vadd.f32 %v5099_v26, %v3193_v48 }
 0x496   : > { %v3249_v42 = vadd.f32 %v3199_v22, %v2958_v34 }
 0x497   : > { %v3248_v1 = vadd.f32 %v3194_v27, %v2957_v23 }
 0x498   : > { %v3273_v28 = vmax.f32 %v3249_v42, 0.0 }
 0x499   : > { %v3272_v29 = vmax.f32 %v3248_v1, 0.0 }
 0x49a   : > { %3297 = vst.msk [vmem:[%s5113_s29 + $0x88] sm:$0xff] %vm1726_vm12, %v3273_v28 }
 0x49b   : > { %3296 = vst.msk [vmem:[%s5113_s29 + $0x80] sm:$0xff] %vm1726_vm12, %v3272_v29 }
 0x4b3   : > { %v3633_v31 = vpop.f32.mrb[18].mxu1 }
 0x4b4   : > { %v3209_v32 = vadd.f32 %v3633_v31, %v5099_v26  ;;  %v3203_v10 = vpop.f32.mrb[19].mxu1 }
 0x4b5   : > { %v3204_v9 = vadd.f32 %v5099_v26, %v3203_v10 }
 0x4b6   : > { %v3251_v35 = vadd.f32 %v3209_v32, %v2960_v30 }
 0x4b7   : > { %v3250_v36 = vadd.f32 %v3204_v9, %v2959_v33 }
 0x4b8   : > { %v3275_v25 = vmax.f32 %v3251_v35, 0.0 }
 0x4b9   : > { %v3274_v37 = vmax.f32 %v3250_v36, 0.0 }
 0x4ba   : > { %3299 = vst.msk [vmem:[%s5113_s29 + $0x98] sm:$0xff] %vm1726_vm12, %v3275_v25 }
 0x4bb   : > { %3298 = vst.msk [vmem:[%s5113_s29 + $0x90] sm:$0xff] %vm1726_vm12, %v3274_v37 }
 0x4cc   : > { %v3636_v11 = vpop.f32.mrb[20].mxu1 }
 0x4cd   : > { %v3219_v39 = vadd.f32 %v3636_v11, %v5099_v26  ;;  %v3213_v41 = vpop.f32.mrb[21].mxu1 }
 0x4ce   : > { %v3214_v24 = vadd.f32 %v5099_v26, %v3213_v41 }
 0x4cf   : > { %v3253_v6 = vadd.f32 %v3219_v39, %v2962_v38 }
 0x4d0   : > { %v3252_v43 = vadd.f32 %v3214_v24, %v2961_v40 }
 0x4d1   : > { %v3277_v50 = vmax.f32 %v3253_v6, 0.0 }
 0x4d2   : > { %v3276_v44 = vmax.f32 %v3252_v43, 0.0 }
 0x4d3   : > { %3301 = vst.msk [vmem:[%s5113_s29 + $0xa8] sm:$0xff] %vm1726_vm12, %v3277_v50 }
 0x4d4   : > { %3300 = vst.msk [vmem:[%s5113_s29 + $0xa0] sm:$0xff] %vm1726_vm12, %v3276_v44 }
 0x4d8   : > { %v3639_v46 = vpop.f32.mrb[22].mxu1 }
 0x4d9   : > { %v3229_v47 = vadd.f32 %v3639_v46, %v5099_v26  ;;  %v3223_v12 = vpop.f32.mrb[23].mxu1 }
 0x4da   : > { %v3224_v51 = vadd.f32 %v5099_v26, %v3223_v12 }
 0x4db   : > { %v3255_v5 = vadd.f32 %v3229_v47, %v2964_v45 }
 0x4dc   : > { %v3254_v52 = vadd.f32 %v3224_v51, %v2963_v49 }
 0x4dd   : > { %v3279_v53 = vmax.f32 %v3255_v5, 0.0 }
 0x4de   : > { %v3278_v20 = vmax.f32 %v3254_v52, 0.0 }
 0x4df   : > { %3303 = vst.msk [vmem:[%s5113_s29 + $0xb8] sm:$0xff] %vm1726_vm12, %v3279_v53 }
 0x4e0   : > { %3302 = vst.msk [vmem:[%s5113_s29 + $0xb0] sm:$0xff] %vm1726_vm12, %v3278_v20 }
 0x4e1 PF: > { %s15_s18 = sadd.s32 1, %s3679_s18  }
 0x4e2   : > { %p12_p4 = scmp.ge.s32.totalorder %s15_s18, 4  }
 0x4e4   :  { %14 = sbr.rel (!%p12_p4) target bundleno = 1 (0x1), region = 76 }

</bundles_post_ra>
